<compile_context>
chip_gen: v6e
topology: v6e:2x2x1
jax: 0.10.0
libtpu: 0.0.40
codegen_flags: <defaults>
</compile_context>

<pallas_src>
import functools
import math

import jax
import jax.numpy as jnp
from jax.experimental import pallas as pl
from jax.experimental.pallas import tpu as pltpu


# ---------------------------------------------------------------------------
# In-kernel helpers (traced inside the fused kernel; operate on values)
# ---------------------------------------------------------------------------
def _layernorm(x, gamma, beta, eps=1e-5):
    # Fused single-pass statistics: var = E[x^2] - E[x]^2.  Both reductions
    # are independent (no serialized second pass over (x - mu)^2).
    mu = jnp.mean(x, axis=-1, keepdims=True)
    msq = jnp.mean(x * x, axis=-1, keepdims=True)
    var = msq - mu * mu
    return (x - mu) * jax.lax.rsqrt(var + eps) * gamma + beta


def _transformer_block(h, vec_ref, row, qkvw_ref, qkvb_ref, ow_ref,
                       fc1w_ref, fc2w_ref, *, n_heads, batch, seq):
    """h: (B*S, E_in) -> (B*S, E_out).

    qkvw_ref: (3, H, E_in, Dh)   per-head q/k/v projection weights
    qkvb_ref: (3, H, 1, Dh)      per-head q/k/v projection biases
    ow_ref:   (H, Dh, E_in)      out-proj weight, split by head along rows
    vec_ref:  (14, 128)          packed bias / LayerNorm row-vectors
    """
    bs, e_in = h.shape
    d_h = e_in // n_heads
    ffn = fc1w_ref.shape[1]
    e_out = fc2w_ref.shape[1]
    scale = 1.0 / math.sqrt(d_h)

    def vec(r, width):  # (1, width) static slice, lane offset 0
        return vec_ref[row + r:row + r + 1, :width]

    out_b = vec(0, e_in)
    ln1_g, ln1_b = vec(1, e_in), vec(2, e_in)
    fc1_b, fc2_b = vec(3, ffn), vec(4, e_out)
    ln2_g, ln2_b = vec(5, e_out), vec(6, e_out)

    # --- multi-head self-attention (nn.MultiheadAttention, dropout=0) -------
    # Per-head projection weights -> no lane-offset slicing of q/k/v;
    # per-head out-proj accumulation -> no lane-axis concatenate.
    attn = jnp.zeros((bs, e_in), jnp.float32) + out_b
    for hh in range(n_heads):  # static unroll (n_heads = 4)
        qh = jnp.dot(h, qkvw_ref[0, hh],
                     preferred_element_type=jnp.float32) + qkvb_ref[0, hh]
        kh = jnp.dot(h, qkvw_ref[1, hh],
                     preferred_element_type=jnp.float32) + qkvb_ref[1, hh]
        vh = jnp.dot(h, qkvw_ref[2, hh],
                     preferred_element_type=jnp.float32) + qkvb_ref[2, hh]
        # (B*S, Dh) -> (B, S, Dh): leading-dim split, layout-preserving.
        qb = qh.reshape(batch, seq, d_h)
        kb = kh.reshape(batch, seq, d_h)
        vb = vh.reshape(batch, seq, d_h)

        s = jnp.einsum("bqd,bkd->bqk", qb, kb,
                       preferred_element_type=jnp.float32) * scale
        m = jnp.max(s, axis=-1, keepdims=True)
        p = jnp.exp(s - m)
        denom = jnp.sum(p, axis=-1, keepdims=True)
        # TODO(synk): approx reciprocal -> softmax rows sum to 1 +- ~1e-3;
        # use `p / denom` for bit-accurate comparison tests.
        p = p * pl.reciprocal(denom, approx=True)
        oh = jnp.einsum("bqk,bkd->bqd", p, vb,
                        preferred_element_type=jnp.float32)

        # Accumulate out-proj contribution of this head (sublane-aligned
        # row-block of the resident weight).
        attn = attn + jnp.dot(oh.reshape(bs, d_h), ow_ref[hh],
                              preferred_element_type=jnp.float32)

    h1 = _layernorm(attn + h, ln1_g, ln1_b)

    # --- feed-forward --------------------------------------------------------
    ff = jnp.dot(h1, fc1w_ref[...], preferred_element_type=jnp.float32) + fc1_b
    ff = jnp.maximum(ff, 0.0)
    ff = jnp.dot(ff, fc2w_ref[...], preferred_element_type=jnp.float32) + fc2_b
    if e_out == e_in:  # residual only when dims match (block1: 32 -> 64 skips)
        ff = ff + h1
    return _layernorm(ff, ln2_g, ln2_b)


# ---------------------------------------------------------------------------
# Fused forward kernel: one grid step for the whole (tiny) batch
# ---------------------------------------------------------------------------
def _forward_kernel(x_ref, posemb_ref, emb_w_ref, vec_ref,
                    b1_qkvw, b1_qkvb, b1_ow, b1_fc1w, b1_fc2w,
                    b2_qkvw, b2_qkvb, b2_ow, b2_fc1w, b2_fc2w,
                    o_ref, *, n_heads, batch, seq):
    # Embedding for all B*S rows in one matmul; emb bias is pre-folded into
    # the tiled positional encoding.
    h = jnp.dot(x_ref[...], emb_w_ref[...],
                preferred_element_type=jnp.float32) + posemb_ref[...]

    # permute(1,0,2)/back in the PyTorch code are layout no-ops here.
    h = _transformer_block(h, vec_ref, 0, b1_qkvw, b1_qkvb, b1_ow,
                           b1_fc1w, b1_fc2w,
                           n_heads=n_heads, batch=batch, seq=seq)
    h = _transformer_block(h, vec_ref, 7, b2_qkvw, b2_qkvb, b2_ow,
                           b2_fc1w, b2_fc2w,
                           n_heads=n_heads, batch=batch, seq=seq)
    o_ref[...] = h.astype(o_ref.dtype)


# ---------------------------------------------------------------------------
# Host-side packing + pallas_call wrapper
# ---------------------------------------------------------------------------
def _round_up(n, m):
    return ((n + m - 1) // m) * m


def _prep_block(p, n_heads):
    """Split fused qkv / out-proj weights per head (done once, host-side)."""
    e_in = p["out_proj_w"].shape[0]
    d_h = e_in // n_heads
    qw, kw, vw = jnp.split(p["in_proj_w"], 3, axis=1)  # (E_in, E_in) each

    def per_head(w):  # (E_in, E_in) -> (H, E_in, Dh)
        return w.reshape(e_in, n_heads, d_h).transpose(1, 0, 2)

    qkvw = jnp.stack([per_head(qw), per_head(kw), per_head(vw)])  # (3,H,E,Dh)
    qb, kb, vb = jnp.split(p["in_proj_b"], 3)
    qkvb = jnp.stack([b.reshape(n_heads, 1, d_h) for b in (qb, kb, vb)])
    ow = p["out_proj_w"].reshape(n_heads, d_h, e_in)  # (H, Dh, E_in)
    return qkvw, qkvb, ow, p["fc1_w"], p["fc2_w"]


def _vec_rows(p):
    return [p["out_proj_b"], p["ln1_g"], p["ln1_b"],
            p["fc1_b"], p["fc2_b"], p["ln2_g"], p["ln2_b"]]


def threats_nn_forward(x, params, n_heads):
    """x: (B, S, input_dim) float32 -> (B, S, hidden_dim)."""
    B, S, d_in = x.shape
    hidden = params["block2"]["fc2_w"].shape[1]
    bs = B * S

    # ---- host-side packing (tiny one-off XLA ops under jit) ----------------
    # Pad input feature dim (9 -> 16) with zero columns / zero weight rows:
    # numerically exact, avoids awkward (.,9) tiling of the first matmul.
    d_pad = _round_up(d_in, 8)
    x2 = jnp.pad(x.reshape(bs, d_in), ((0, 0), (0, d_pad - d_in)))
    emb_w = jnp.pad(params["emb_w"], ((0, d_pad - d_in), (0, 0)))
    # Fold embedding bias into the positional encoding, tile over batch.
    posemb = jnp.tile(params["pos"] + params["emb_b"][None, :], (B, 1))

    # Pack all small bias / LayerNorm row-vectors into one lane-dense array.
    rows = _vec_rows(params["block1"]) + _vec_rows(params["block2"])
    vec_w = _round_up(max(r.shape[0] for r in rows), 128)
    vec = jnp.concatenate(
        [jnp.pad(r, (0, vec_w - r.shape[0]))[None, :] for r in rows], axis=0)

    b1 = _prep_block(params["block1"], n_heads)
    b2 = _prep_block(params["block2"], n_heads)

    inputs = [x2, posemb, emb_w, vec, *b1, *b2]

    def whole(a):
        # Whole-array block; same block every step -> stays VMEM-resident.
        return pl.BlockSpec(a.shape, lambda i, nd=a.ndim: (0,) * nd)

    out2 = pl.pallas_call(
        functools.partial(_forward_kernel, n_heads=n_heads, batch=B, seq=S),
        out_shape=jax.ShapeDtypeStruct((bs, hidden), jnp.float32),
        grid=(1,),  # B folded into M: a single step, no per-step overhead
        in_specs=[whole(a) for a in inputs],
        out_specs=pl.BlockSpec((bs, hidden), lambda i: (0, 0)),
    )(*inputs)
    return out2.reshape(B, S, hidden)


# ---------------------------------------------------------------------------
# Deterministic parameter init (self-consistent with the kernel's layout)
# ---------------------------------------------------------------------------
def _dense(key, fan_in, fan_out):
    return jax.random.normal(key, (fan_in, fan_out), jnp.float32) * 0.02


def init_block_params(key, dim_in, dim_out, ffn_hidden):
    ks = jax.random.split(key, 6)
    return {
        "in_proj_w": _dense(ks[0], dim_in, 3 * dim_in),
        "in_proj_b": jnp.zeros((3 * dim_in,), jnp.float32),
        "out_proj_w": _dense(ks[1], dim_in, dim_in),
        "out_proj_b": jnp.zeros((dim_in,), jnp.float32),
        "ln1_g": jnp.ones((dim_in,), jnp.float32),
        "ln1_b": jnp.zeros((dim_in,), jnp.float32),
        "fc1_w": _dense(ks[2], dim_in, ffn_hidden),
        "fc1_b": jnp.zeros((ffn_hidden,), jnp.float32),
        "fc2_w": _dense(ks[3], ffn_hidden, dim_out),
        "fc2_b": jnp.zeros((dim_out,), jnp.float32),
        "ln2_g": jnp.ones((dim_out,), jnp.float32),
        "ln2_b": jnp.zeros((dim_out,), jnp.float32),
    }


def init_params(key, seq_len, input_dim, emb_dim, hidden_dim):
    k_emb, k_pos, k_b1, k_b2 = jax.random.split(key, 4)
    return {
        "emb_w": _dense(k_emb, input_dim, emb_dim),
        "emb_b": jnp.zeros((emb_dim,), jnp.float32),
        "pos": jax.random.normal(k_pos, (seq_len, emb_dim), jnp.float32),
        "block1": init_block_params(k_b1, emb_dim, hidden_dim, hidden_dim),
        "block2": init_block_params(k_b2, hidden_dim, hidden_dim, hidden_dim),
    }


# ---------------------------------------------------------------------------
if __name__ == "__main__":
    # Small shapes consistent with ThreatsNN(seq_len, input_dim=9, ...)
    B, S, INPUT_DIM = 2, 8, 9
    EMB_DIM, N_HEADS, HIDDEN_DIM = 32, 4, 64

    key = jax.random.PRNGKey(0)
    k_params, k_x = jax.random.split(key)
    params = init_params(k_params, S, INPUT_DIM, EMB_DIM, HIDDEN_DIM)
    x = jax.random.normal(k_x, (B, S, INPUT_DIM), jnp.float32)

    fwd = jax.jit(threats_nn_forward, static_argnames="n_heads")
    out = jax.block_until_ready(fwd(x, params, n_heads=N_HEADS))

    assert out.shape == (B, S, HIDDEN_DIM), out.shape
    assert bool(jnp.all(jnp.isfinite(out)))
    print("KERNEL_OK")
</pallas_src>

<mosaic_0001>
module attributes {stable_mosaic.version = 11 : i64} {
  func.func @_forward_kernel(%arg0: i32, %arg1: memref<16x16xf32, #tpu.memory_space<vmem>>, %arg2: memref<16x32xf32, #tpu.memory_space<vmem>>, %arg3: memref<16x32xf32, #tpu.memory_space<vmem>>, %arg4: memref<14x128xf32, #tpu.memory_space<vmem>>, %arg5: memref<3x4x32x8xf32, #tpu.memory_space<vmem>>, %arg6: memref<3x4x1x8xf32, #tpu.memory_space<vmem>>, %arg7: memref<4x8x32xf32, #tpu.memory_space<vmem>>, %arg8: memref<32x64xf32, #tpu.memory_space<vmem>>, %arg9: memref<64x64xf32, #tpu.memory_space<vmem>>, %arg10: memref<3x4x64x16xf32, #tpu.memory_space<vmem>>, %arg11: memref<3x4x1x16xf32, #tpu.memory_space<vmem>>, %arg12: memref<4x16x64xf32, #tpu.memory_space<vmem>>, %arg13: memref<64x64xf32, #tpu.memory_space<vmem>>, %arg14: memref<64x64xf32, #tpu.memory_space<vmem>>, %arg15: memref<16x64xf32, #tpu.memory_space<vmem>>) attributes {dimension_semantics = [#tpu.dimension_semantics<arbitrary>], iteration_bounds = array<i64: 1>, scalar_prefetch = 0 : i64, scratch_operands = 0 : i64, tpu.core_type = #tpu.core_type<tc>, window_params = [{pipeline_mode = #tpu.pipeline_mode<synchronous>, transform_indices = @transform_0, window_bounds = array<i64: 16, 16>}, {pipeline_mode = #tpu.pipeline_mode<synchronous>, transform_indices = @transform_1, window_bounds = array<i64: 16, 32>}, {pipeline_mode = #tpu.pipeline_mode<synchronous>, transform_indices = @transform_2, window_bounds = array<i64: 16, 32>}, {pipeline_mode = #tpu.pipeline_mode<synchronous>, transform_indices = @transform_3, window_bounds = array<i64: 14, 128>}, {pipeline_mode = #tpu.pipeline_mode<synchronous>, transform_indices = @transform_4, window_bounds = array<i64: 3, 4, 32, 8>}, {pipeline_mode = #tpu.pipeline_mode<synchronous>, transform_indices = @transform_5, window_bounds = array<i64: 3, 4, 1, 8>}, {pipeline_mode = #tpu.pipeline_mode<synchronous>, transform_indices = @transform_6, window_bounds = array<i64: 4, 8, 32>}, {pipeline_mode = #tpu.pipeline_mode<synchronous>, transform_indices = @transform_7, window_bounds = array<i64: 32, 64>}, {pipeline_mode = #tpu.pipeline_mode<synchronous>, transform_indices = @transform_8, window_bounds = array<i64: 64, 64>}, {pipeline_mode = #tpu.pipeline_mode<synchronous>, transform_indices = @transform_9, window_bounds = array<i64: 3, 4, 64, 16>}, {pipeline_mode = #tpu.pipeline_mode<synchronous>, transform_indices = @transform_10, window_bounds = array<i64: 3, 4, 1, 16>}, {pipeline_mode = #tpu.pipeline_mode<synchronous>, transform_indices = @transform_11, window_bounds = array<i64: 4, 16, 64>}, {pipeline_mode = #tpu.pipeline_mode<synchronous>, transform_indices = @transform_12, window_bounds = array<i64: 64, 64>}, {pipeline_mode = #tpu.pipeline_mode<synchronous>, transform_indices = @transform_13, window_bounds = array<i64: 64, 64>}, {pipeline_mode = #tpu.pipeline_mode<synchronous>, transform_indices = @transform_14, window_bounds = array<i64: 16, 64>}]} {
    %c0 = arith.constant 0 : index
    %c0_0 = arith.constant 0 : index
    %0 = vector.load %arg1[%c0, %c0_0] : memref<16x16xf32, #tpu.memory_space<vmem>>, vector<16x16xf32>
    %c0_1 = arith.constant 0 : index
    %c0_2 = arith.constant 0 : index
    %1 = vector.load %arg3[%c0_1, %c0_2] : memref<16x32xf32, #tpu.memory_space<vmem>>, vector<16x32xf32>
    %cst = arith.constant dense<0.000000e+00> : vector<16x32xf32>
    %2 = tpu.matmul %0, %1, %cst {dimension_numbers = #tpu.dot_dimension_numbers<[1], [0], [0], [1], [0, 0, 1, 1], [], []>} : vector<16x16xf32>, vector<16x32xf32>, vector<16x32xf32> -> vector<16x32xf32>
    %c0_3 = arith.constant 0 : index
    %c0_4 = arith.constant 0 : index
    %3 = vector.load %arg2[%c0_3, %c0_4] : memref<16x32xf32, #tpu.memory_space<vmem>>, vector<16x32xf32>
    %4 = arith.addf %2, %3 : vector<16x32xf32>
    %c0_5 = arith.constant 0 : index
    %c0_6 = arith.constant 0 : index
    %5 = vector.load %arg4[%c0_5, %c0_6] : memref<14x128xf32, #tpu.memory_space<vmem>>, vector<1x32xf32>
    %c1 = arith.constant 1 : index
    %c0_7 = arith.constant 0 : index
    %6 = vector.load %arg4[%c1, %c0_7] : memref<14x128xf32, #tpu.memory_space<vmem>>, vector<1x32xf32>
    %c2 = arith.constant 2 : index
    %c0_8 = arith.constant 0 : index
    %7 = vector.load %arg4[%c2, %c0_8] : memref<14x128xf32, #tpu.memory_space<vmem>>, vector<1x32xf32>
    %c3 = arith.constant 3 : index
    %c0_9 = arith.constant 0 : index
    %8 = vector.load %arg4[%c3, %c0_9] : memref<14x128xf32, #tpu.memory_space<vmem>>, vector<1x64xf32>
    %c4 = arith.constant 4 : index
    %c0_10 = arith.constant 0 : index
    %9 = vector.load %arg4[%c4, %c0_10] : memref<14x128xf32, #tpu.memory_space<vmem>>, vector<1x64xf32>
    %c5 = arith.constant 5 : index
    %c0_11 = arith.constant 0 : index
    %10 = vector.load %arg4[%c5, %c0_11] : memref<14x128xf32, #tpu.memory_space<vmem>>, vector<1x64xf32>
    %c6 = arith.constant 6 : index
    %c0_12 = arith.constant 0 : index
    %11 = vector.load %arg4[%c6, %c0_12] : memref<14x128xf32, #tpu.memory_space<vmem>>, vector<1x64xf32>
    %cst_13 = arith.constant 0.000000e+00 : f32
    %12 = vector.broadcast %cst_13 : f32 to vector<16x32xf32>
    %13 = vector.broadcast %5 : vector<1x32xf32> to vector<16x32xf32>
    %14 = arith.addf %12, %13 : vector<16x32xf32>
    %c0_14 = arith.constant 0 : index
    %c0_15 = arith.constant 0 : index
    %c0_16 = arith.constant 0 : index
    %c0_17 = arith.constant 0 : index
    %15 = vector.load %arg5[%c0_14, %c0_15, %c0_16, %c0_17] : memref<3x4x32x8xf32, #tpu.memory_space<vmem>>, vector<1x1x32x8xf32>
    %16 = vector.shape_cast %15 : vector<1x1x32x8xf32> to vector<32x8xf32>
    %cst_18 = arith.constant dense<0.000000e+00> : vector<16x8xf32>
    %17 = tpu.matmul %4, %16, %cst_18 {dimension_numbers = #tpu.dot_dimension_numbers<[1], [0], [0], [1], [0, 0, 1, 1], [], []>} : vector<16x32xf32>, vector<32x8xf32>, vector<16x8xf32> -> vector<16x8xf32>
    %c0_19 = arith.constant 0 : index
    %c0_20 = arith.constant 0 : index
    %c0_21 = arith.constant 0 : index
    %c0_22 = arith.constant 0 : index
    %18 = vector.load %arg6[%c0_19, %c0_20, %c0_21, %c0_22] : memref<3x4x1x8xf32, #tpu.memory_space<vmem>>, vector<1x1x1x8xf32>
    %19 = vector.shape_cast %18 : vector<1x1x1x8xf32> to vector<1x8xf32>
    %20 = vector.broadcast %19 : vector<1x8xf32> to vector<16x8xf32>
    %21 = arith.addf %17, %20 : vector<16x8xf32>
    %c1_23 = arith.constant 1 : index
    %c0_24 = arith.constant 0 : index
    %c0_25 = arith.constant 0 : index
    %c0_26 = arith.constant 0 : index
    %22 = vector.load %arg5[%c1_23, %c0_24, %c0_25, %c0_26] : memref<3x4x32x8xf32, #tpu.memory_space<vmem>>, vector<1x1x32x8xf32>
    %23 = vector.shape_cast %22 : vector<1x1x32x8xf32> to vector<32x8xf32>
    %cst_27 = arith.constant dense<0.000000e+00> : vector<16x8xf32>
    %24 = tpu.matmul %4, %23, %cst_27 {dimension_numbers = #tpu.dot_dimension_numbers<[1], [0], [0], [1], [0, 0, 1, 1], [], []>} : vector<16x32xf32>, vector<32x8xf32>, vector<16x8xf32> -> vector<16x8xf32>
    %c1_28 = arith.constant 1 : index
    %c0_29 = arith.constant 0 : index
    %c0_30 = arith.constant 0 : index
    %c0_31 = arith.constant 0 : index
    %25 = vector.load %arg6[%c1_28, %c0_29, %c0_30, %c0_31] : memref<3x4x1x8xf32, #tpu.memory_space<vmem>>, vector<1x1x1x8xf32>
    %26 = vector.shape_cast %25 : vector<1x1x1x8xf32> to vector<1x8xf32>
    %27 = vector.broadcast %26 : vector<1x8xf32> to vector<16x8xf32>
    %28 = arith.addf %24, %27 : vector<16x8xf32>
    %c2_32 = arith.constant 2 : index
    %c0_33 = arith.constant 0 : index
    %c0_34 = arith.constant 0 : index
    %c0_35 = arith.constant 0 : index
    %29 = vector.load %arg5[%c2_32, %c0_33, %c0_34, %c0_35] : memref<3x4x32x8xf32, #tpu.memory_space<vmem>>, vector<1x1x32x8xf32>
    %30 = vector.shape_cast %29 : vector<1x1x32x8xf32> to vector<32x8xf32>
    %cst_36 = arith.constant dense<0.000000e+00> : vector<16x8xf32>
    %31 = tpu.matmul %4, %30, %cst_36 {dimension_numbers = #tpu.dot_dimension_numbers<[1], [0], [0], [1], [0, 0, 1, 1], [], []>} : vector<16x32xf32>, vector<32x8xf32>, vector<16x8xf32> -> vector<16x8xf32>
    %c2_37 = arith.constant 2 : index
    %c0_38 = arith.constant 0 : index
    %c0_39 = arith.constant 0 : index
    %c0_40 = arith.constant 0 : index
    %32 = vector.load %arg6[%c2_37, %c0_38, %c0_39, %c0_40] : memref<3x4x1x8xf32, #tpu.memory_space<vmem>>, vector<1x1x1x8xf32>
    %33 = vector.shape_cast %32 : vector<1x1x1x8xf32> to vector<1x8xf32>
    %34 = vector.broadcast %33 : vector<1x8xf32> to vector<16x8xf32>
    %35 = arith.addf %31, %34 : vector<16x8xf32>
    %36 = vector.shape_cast %21 : vector<16x8xf32> to vector<2x8x8xf32>
    %37 = vector.shape_cast %28 : vector<16x8xf32> to vector<2x8x8xf32>
    %38 = vector.shape_cast %35 : vector<16x8xf32> to vector<2x8x8xf32>
    "tpu.trace_start"() <{level = 10 : i32, message = "bqd,bkd->bqk"}> : () -> ()
    %cst_41 = arith.constant dense<0.000000e+00> : vector<2x8x8xf32>
    %39 = tpu.matmul %36, %37, %cst_41 {dimension_numbers = #tpu.dot_dimension_numbers<[2], [2], [1], [1], [0, 0, 0, 1, 1, 1], [0], [0]>} : vector<2x8x8xf32>, vector<2x8x8xf32>, vector<2x8x8xf32> -> vector<2x8x8xf32>
    "tpu.trace_stop"() : () -> ()
    %cst_42 = arith.constant 0.353553385 : f32
    %40 = vector.broadcast %cst_42 : f32 to vector<2x8x8xf32>
    %41 = arith.mulf %39, %40 : vector<2x8x8xf32>
    %cst_43 = arith.constant dense<0xFF800000> : vector<2x8xf32>
    %42 = vector.multi_reduction <maximumf>, %41, %cst_43 [2] : vector<2x8x8xf32> to vector<2x8xf32>
    %43 = vector.shape_cast %42 : vector<2x8xf32> to vector<2x8x1xf32>
    %44 = vector.broadcast %43 : vector<2x8x1xf32> to vector<2x8x8xf32>
    %45 = arith.subf %41, %44 : vector<2x8x8xf32>
    %46 = math.exp %45 : vector<2x8x8xf32>
    %cst_44 = arith.constant dense<0.000000e+00> : vector<2x8xf32>
    %47 = vector.multi_reduction <add>, %46, %cst_44 [2] : vector<2x8x8xf32> to vector<2x8xf32>
    %48 = vector.shape_cast %47 : vector<2x8xf32> to vector<2x8x1xf32>
    %49 = tpu.reciprocal %48 {approx = true} : vector<2x8x1xf32> -> vector<2x8x1xf32>
    %50 = vector.broadcast %49 : vector<2x8x1xf32> to vector<2x8x8xf32>
    %51 = arith.mulf %46, %50 : vector<2x8x8xf32>
    "tpu.trace_start"() <{level = 10 : i32, message = "bqk,bkd->bqd"}> : () -> ()
    %cst_45 = arith.constant dense<0.000000e+00> : vector<2x8x8xf32>
    %52 = tpu.matmul %51, %38, %cst_45 {dimension_numbers = #tpu.dot_dimension_numbers<[2], [1], [1], [2], [0, 0, 0, 1, 1, 2], [0], [0]>} : vector<2x8x8xf32>, vector<2x8x8xf32>, vector<2x8x8xf32> -> vector<2x8x8xf32>
    "tpu.trace_stop"() : () -> ()
    %53 = vector.shape_cast %52 : vector<2x8x8xf32> to vector<16x8xf32>
    %c0_46 = arith.constant 0 : index
    %c0_47 = arith.constant 0 : index
    %c0_48 = arith.constant 0 : index
    %54 = vector.load %arg7[%c0_46, %c0_47, %c0_48] : memref<4x8x32xf32, #tpu.memory_space<vmem>>, vector<1x8x32xf32>
    %55 = vector.shape_cast %54 : vector<1x8x32xf32> to vector<8x32xf32>
    %cst_49 = arith.constant dense<0.000000e+00> : vector<16x32xf32>
    %56 = tpu.matmul %53, %55, %cst_49 {dimension_numbers = #tpu.dot_dimension_numbers<[1], [0], [0], [1], [0, 0, 1, 1], [], []>} : vector<16x8xf32>, vector<8x32xf32>, vector<16x32xf32> -> vector<16x32xf32>
    %57 = arith.addf %14, %56 : vector<16x32xf32>
    %c0_50 = arith.constant 0 : index
    %c1_51 = arith.constant 1 : index
    %c0_52 = arith.constant 0 : index
    %c0_53 = arith.constant 0 : index
    %58 = vector.load %arg5[%c0_50, %c1_51, %c0_52, %c0_53] : memref<3x4x32x8xf32, #tpu.memory_space<vmem>>, vector<1x1x32x8xf32>
    %59 = vector.shape_cast %58 : vector<1x1x32x8xf32> to vector<32x8xf32>
    %cst_54 = arith.constant dense<0.000000e+00> : vector<16x8xf32>
    %60 = tpu.matmul %4, %59, %cst_54 {dimension_numbers = #tpu.dot_dimension_numbers<[1], [0], [0], [1], [0, 0, 1, 1], [], []>} : vector<16x32xf32>, vector<32x8xf32>, vector<16x8xf32> -> vector<16x8xf32>
    %c0_55 = arith.constant 0 : index
    %c1_56 = arith.constant 1 : index
    %c0_57 = arith.constant 0 : index
    %c0_58 = arith.constant 0 : index
    %61 = vector.load %arg6[%c0_55, %c1_56, %c0_57, %c0_58] : memref<3x4x1x8xf32, #tpu.memory_space<vmem>>, vector<1x1x1x8xf32>
    %62 = vector.shape_cast %61 : vector<1x1x1x8xf32> to vector<1x8xf32>
    %63 = vector.broadcast %62 : vector<1x8xf32> to vector<16x8xf32>
    %64 = arith.addf %60, %63 : vector<16x8xf32>
    %c1_59 = arith.constant 1 : index
    %c1_60 = arith.constant 1 : index
    %c0_61 = arith.constant 0 : index
    %c0_62 = arith.constant 0 : index
    %65 = vector.load %arg5[%c1_59, %c1_60, %c0_61, %c0_62] : memref<3x4x32x8xf32, #tpu.memory_space<vmem>>, vector<1x1x32x8xf32>
    %66 = vector.shape_cast %65 : vector<1x1x32x8xf32> to vector<32x8xf32>
    %cst_63 = arith.constant dense<0.000000e+00> : vector<16x8xf32>
    %67 = tpu.matmul %4, %66, %cst_63 {dimension_numbers = #tpu.dot_dimension_numbers<[1], [0], [0], [1], [0, 0, 1, 1], [], []>} : vector<16x32xf32>, vector<32x8xf32>, vector<16x8xf32> -> vector<16x8xf32>
    %c1_64 = arith.constant 1 : index
    %c1_65 = arith.constant 1 : index
    %c0_66 = arith.constant 0 : index
    %c0_67 = arith.constant 0 : index
    %68 = vector.load %arg6[%c1_64, %c1_65, %c0_66, %c0_67] : memref<3x4x1x8xf32, #tpu.memory_space<vmem>>, vector<1x1x1x8xf32>
    %69 = vector.shape_cast %68 : vector<1x1x1x8xf32> to vector<1x8xf32>
    %70 = vector.broadcast %69 : vector<1x8xf32> to vector<16x8xf32>
    %71 = arith.addf %67, %70 : vector<16x8xf32>
    %c2_68 = arith.constant 2 : index
    %c1_69 = arith.constant 1 : index
    %c0_70 = arith.constant 0 : index
    %c0_71 = arith.constant 0 : index
    %72 = vector.load %arg5[%c2_68, %c1_69, %c0_70, %c0_71] : memref<3x4x32x8xf32, #tpu.memory_space<vmem>>, vector<1x1x32x8xf32>
    %73 = vector.shape_cast %72 : vector<1x1x32x8xf32> to vector<32x8xf32>
    %cst_72 = arith.constant dense<0.000000e+00> : vector<16x8xf32>
    %74 = tpu.matmul %4, %73, %cst_72 {dimension_numbers = #tpu.dot_dimension_numbers<[1], [0], [0], [1], [0, 0, 1, 1], [], []>} : vector<16x32xf32>, vector<32x8xf32>, vector<16x8xf32> -> vector<16x8xf32>
    %c2_73 = arith.constant 2 : index
    %c1_74 = arith.constant 1 : index
    %c0_75 = arith.constant 0 : index
    %c0_76 = arith.constant 0 : index
    %75 = vector.load %arg6[%c2_73, %c1_74, %c0_75, %c0_76] : memref<3x4x1x8xf32, #tpu.memory_space<vmem>>, vector<1x1x1x8xf32>
    %76 = vector.shape_cast %75 : vector<1x1x1x8xf32> to vector<1x8xf32>
    %77 = vector.broadcast %76 : vector<1x8xf32> to vector<16x8xf32>
    %78 = arith.addf %74, %77 : vector<16x8xf32>
    %79 = vector.shape_cast %64 : vector<16x8xf32> to vector<2x8x8xf32>
    %80 = vector.shape_cast %71 : vector<16x8xf32> to vector<2x8x8xf32>
    %81 = vector.shape_cast %78 : vector<16x8xf32> to vector<2x8x8xf32>
    "tpu.trace_start"() <{level = 10 : i32, message = "bqd,bkd->bqk"}> : () -> ()
    %cst_77 = arith.constant dense<0.000000e+00> : vector<2x8x8xf32>
    %82 = tpu.matmul %79, %80, %cst_77 {dimension_numbers = #tpu.dot_dimension_numbers<[2], [2], [1], [1], [0, 0, 0, 1, 1, 1], [0], [0]>} : vector<2x8x8xf32>, vector<2x8x8xf32>, vector<2x8x8xf32> -> vector<2x8x8xf32>
    "tpu.trace_stop"() : () -> ()
    %cst_78 = arith.constant 0.353553385 : f32
    %83 = vector.broadcast %cst_78 : f32 to vector<2x8x8xf32>
    %84 = arith.mulf %82, %83 : vector<2x8x8xf32>
    %cst_79 = arith.constant dense<0xFF800000> : vector<2x8xf32>
    %85 = vector.multi_reduction <maximumf>, %84, %cst_79 [2] : vector<2x8x8xf32> to vector<2x8xf32>
    %86 = vector.shape_cast %85 : vector<2x8xf32> to vector<2x8x1xf32>
    %87 = vector.broadcast %86 : vector<2x8x1xf32> to vector<2x8x8xf32>
    %88 = arith.subf %84, %87 : vector<2x8x8xf32>
    %89 = math.exp %88 : vector<2x8x8xf32>
    %cst_80 = arith.constant dense<0.000000e+00> : vector<2x8xf32>
    %90 = vector.multi_reduction <add>, %89, %cst_80 [2] : vector<2x8x8xf32> to vector<2x8xf32>
    %91 = vector.shape_cast %90 : vector<2x8xf32> to vector<2x8x1xf32>
    %92 = tpu.reciprocal %91 {approx = true} : vector<2x8x1xf32> -> vector<2x8x1xf32>
    %93 = vector.broadcast %92 : vector<2x8x1xf32> to vector<2x8x8xf32>
    %94 = arith.mulf %89, %93 : vector<2x8x8xf32>
    "tpu.trace_start"() <{level = 10 : i32, message = "bqk,bkd->bqd"}> : () -> ()
    %cst_81 = arith.constant dense<0.000000e+00> : vector<2x8x8xf32>
    %95 = tpu.matmul %94, %81, %cst_81 {dimension_numbers = #tpu.dot_dimension_numbers<[2], [1], [1], [2], [0, 0, 0, 1, 1, 2], [0], [0]>} : vector<2x8x8xf32>, vector<2x8x8xf32>, vector<2x8x8xf32> -> vector<2x8x8xf32>
    "tpu.trace_stop"() : () -> ()
    %96 = vector.shape_cast %95 : vector<2x8x8xf32> to vector<16x8xf32>
    %c1_82 = arith.constant 1 : index
    %c0_83 = arith.constant 0 : index
    %c0_84 = arith.constant 0 : index
    %97 = vector.load %arg7[%c1_82, %c0_83, %c0_84] : memref<4x8x32xf32, #tpu.memory_space<vmem>>, vector<1x8x32xf32>
    %98 = vector.shape_cast %97 : vector<1x8x32xf32> to vector<8x32xf32>
    %cst_85 = arith.constant dense<0.000000e+00> : vector<16x32xf32>
    %99 = tpu.matmul %96, %98, %cst_85 {dimension_numbers = #tpu.dot_dimension_numbers<[1], [0], [0], [1], [0, 0, 1, 1], [], []>} : vector<16x8xf32>, vector<8x32xf32>, vector<16x32xf32> -> vector<16x32xf32>
    %100 = arith.addf %57, %99 : vector<16x32xf32>
    %c0_86 = arith.constant 0 : index
    %c2_87 = arith.constant 2 : index
    %c0_88 = arith.constant 0 : index
    %c0_89 = arith.constant 0 : index
    %101 = vector.load %arg5[%c0_86, %c2_87, %c0_88, %c0_89] : memref<3x4x32x8xf32, #tpu.memory_space<vmem>>, vector<1x1x32x8xf32>
    %102 = vector.shape_cast %101 : vector<1x1x32x8xf32> to vector<32x8xf32>
    %cst_90 = arith.constant dense<0.000000e+00> : vector<16x8xf32>
    %103 = tpu.matmul %4, %102, %cst_90 {dimension_numbers = #tpu.dot_dimension_numbers<[1], [0], [0], [1], [0, 0, 1, 1], [], []>} : vector<16x32xf32>, vector<32x8xf32>, vector<16x8xf32> -> vector<16x8xf32>
    %c0_91 = arith.constant 0 : index
    %c2_92 = arith.constant 2 : index
    %c0_93 = arith.constant 0 : index
    %c0_94 = arith.constant 0 : index
    %104 = vector.load %arg6[%c0_91, %c2_92, %c0_93, %c0_94] : memref<3x4x1x8xf32, #tpu.memory_space<vmem>>, vector<1x1x1x8xf32>
    %105 = vector.shape_cast %104 : vector<1x1x1x8xf32> to vector<1x8xf32>
    %106 = vector.broadcast %105 : vector<1x8xf32> to vector<16x8xf32>
    %107 = arith.addf %103, %106 : vector<16x8xf32>
    %c1_95 = arith.constant 1 : index
    %c2_96 = arith.constant 2 : index
    %c0_97 = arith.constant 0 : index
    %c0_98 = arith.constant 0 : index
    %108 = vector.load %arg5[%c1_95, %c2_96, %c0_97, %c0_98] : memref<3x4x32x8xf32, #tpu.memory_space<vmem>>, vector<1x1x32x8xf32>
    %109 = vector.shape_cast %108 : vector<1x1x32x8xf32> to vector<32x8xf32>
    %cst_99 = arith.constant dense<0.000000e+00> : vector<16x8xf32>
    %110 = tpu.matmul %4, %109, %cst_99 {dimension_numbers = #tpu.dot_dimension_numbers<[1], [0], [0], [1], [0, 0, 1, 1], [], []>} : vector<16x32xf32>, vector<32x8xf32>, vector<16x8xf32> -> vector<16x8xf32>
    %c1_100 = arith.constant 1 : index
    %c2_101 = arith.constant 2 : index
    %c0_102 = arith.constant 0 : index
    %c0_103 = arith.constant 0 : index
    %111 = vector.load %arg6[%c1_100, %c2_101, %c0_102, %c0_103] : memref<3x4x1x8xf32, #tpu.memory_space<vmem>>, vector<1x1x1x8xf32>
    %112 = vector.shape_cast %111 : vector<1x1x1x8xf32> to vector<1x8xf32>
    %113 = vector.broadcast %112 : vector<1x8xf32> to vector<16x8xf32>
    %114 = arith.addf %110, %113 : vector<16x8xf32>
    %c2_104 = arith.constant 2 : index
    %c2_105 = arith.constant 2 : index
    %c0_106 = arith.constant 0 : index
    %c0_107 = arith.constant 0 : index
    %115 = vector.load %arg5[%c2_104, %c2_105, %c0_106, %c0_107] : memref<3x4x32x8xf32, #tpu.memory_space<vmem>>, vector<1x1x32x8xf32>
    %116 = vector.shape_cast %115 : vector<1x1x32x8xf32> to vector<32x8xf32>
    %cst_108 = arith.constant dense<0.000000e+00> : vector<16x8xf32>
    %117 = tpu.matmul %4, %116, %cst_108 {dimension_numbers = #tpu.dot_dimension_numbers<[1], [0], [0], [1], [0, 0, 1, 1], [], []>} : vector<16x32xf32>, vector<32x8xf32>, vector<16x8xf32> -> vector<16x8xf32>
    %c2_109 = arith.constant 2 : index
    %c2_110 = arith.constant 2 : index
    %c0_111 = arith.constant 0 : index
    %c0_112 = arith.constant 0 : index
    %118 = vector.load %arg6[%c2_109, %c2_110, %c0_111, %c0_112] : memref<3x4x1x8xf32, #tpu.memory_space<vmem>>, vector<1x1x1x8xf32>
    %119 = vector.shape_cast %118 : vector<1x1x1x8xf32> to vector<1x8xf32>
    %120 = vector.broadcast %119 : vector<1x8xf32> to vector<16x8xf32>
    %121 = arith.addf %117, %120 : vector<16x8xf32>
    %122 = vector.shape_cast %107 : vector<16x8xf32> to vector<2x8x8xf32>
    %123 = vector.shape_cast %114 : vector<16x8xf32> to vector<2x8x8xf32>
    %124 = vector.shape_cast %121 : vector<16x8xf32> to vector<2x8x8xf32>
    "tpu.trace_start"() <{level = 10 : i32, message = "bqd,bkd->bqk"}> : () -> ()
    %cst_113 = arith.constant dense<0.000000e+00> : vector<2x8x8xf32>
    %125 = tpu.matmul %122, %123, %cst_113 {dimension_numbers = #tpu.dot_dimension_numbers<[2], [2], [1], [1], [0, 0, 0, 1, 1, 1], [0], [0]>} : vector<2x8x8xf32>, vector<2x8x8xf32>, vector<2x8x8xf32> -> vector<2x8x8xf32>
    "tpu.trace_stop"() : () -> ()
    %cst_114 = arith.constant 0.353553385 : f32
    %126 = vector.broadcast %cst_114 : f32 to vector<2x8x8xf32>
    %127 = arith.mulf %125, %126 : vector<2x8x8xf32>
    %cst_115 = arith.constant dense<0xFF800000> : vector<2x8xf32>
    %128 = vector.multi_reduction <maximumf>, %127, %cst_115 [2] : vector<2x8x8xf32> to vector<2x8xf32>
    %129 = vector.shape_cast %128 : vector<2x8xf32> to vector<2x8x1xf32>
    %130 = vector.broadcast %129 : vector<2x8x1xf32> to vector<2x8x8xf32>
    %131 = arith.subf %127, %130 : vector<2x8x8xf32>
    %132 = math.exp %131 : vector<2x8x8xf32>
    %cst_116 = arith.constant dense<0.000000e+00> : vector<2x8xf32>
    %133 = vector.multi_reduction <add>, %132, %cst_116 [2] : vector<2x8x8xf32> to vector<2x8xf32>
    %134 = vector.shape_cast %133 : vector<2x8xf32> to vector<2x8x1xf32>
    %135 = tpu.reciprocal %134 {approx = true} : vector<2x8x1xf32> -> vector<2x8x1xf32>
    %136 = vector.broadcast %135 : vector<2x8x1xf32> to vector<2x8x8xf32>
    %137 = arith.mulf %132, %136 : vector<2x8x8xf32>
    "tpu.trace_start"() <{level = 10 : i32, message = "bqk,bkd->bqd"}> : () -> ()
    %cst_117 = arith.constant dense<0.000000e+00> : vector<2x8x8xf32>
    %138 = tpu.matmul %137, %124, %cst_117 {dimension_numbers = #tpu.dot_dimension_numbers<[2], [1], [1], [2], [0, 0, 0, 1, 1, 2], [0], [0]>} : vector<2x8x8xf32>, vector<2x8x8xf32>, vector<2x8x8xf32> -> vector<2x8x8xf32>
    "tpu.trace_stop"() : () -> ()
    %139 = vector.shape_cast %138 : vector<2x8x8xf32> to vector<16x8xf32>
    %c2_118 = arith.constant 2 : index
    %c0_119 = arith.constant 0 : index
    %c0_120 = arith.constant 0 : index
    %140 = vector.load %arg7[%c2_118, %c0_119, %c0_120] : memref<4x8x32xf32, #tpu.memory_space<vmem>>, vector<1x8x32xf32>
    %141 = vector.shape_cast %140 : vector<1x8x32xf32> to vector<8x32xf32>
    %cst_121 = arith.constant dense<0.000000e+00> : vector<16x32xf32>
    %142 = tpu.matmul %139, %141, %cst_121 {dimension_numbers = #tpu.dot_dimension_numbers<[1], [0], [0], [1], [0, 0, 1, 1], [], []>} : vector<16x8xf32>, vector<8x32xf32>, vector<16x32xf32> -> vector<16x32xf32>
    %143 = arith.addf %100, %142 : vector<16x32xf32>
    %c0_122 = arith.constant 0 : index
    %c3_123 = arith.constant 3 : index
    %c0_124 = arith.constant 0 : index
    %c0_125 = arith.constant 0 : index
    %144 = vector.load %arg5[%c0_122, %c3_123, %c0_124, %c0_125] : memref<3x4x32x8xf32, #tpu.memory_space<vmem>>, vector<1x1x32x8xf32>
    %145 = vector.shape_cast %144 : vector<1x1x32x8xf32> to vector<32x8xf32>
    %cst_126 = arith.constant dense<0.000000e+00> : vector<16x8xf32>
    %146 = tpu.matmul %4, %145, %cst_126 {dimension_numbers = #tpu.dot_dimension_numbers<[1], [0], [0], [1], [0, 0, 1, 1], [], []>} : vector<16x32xf32>, vector<32x8xf32>, vector<16x8xf32> -> vector<16x8xf32>
    %c0_127 = arith.constant 0 : index
    %c3_128 = arith.constant 3 : index
    %c0_129 = arith.constant 0 : index
    %c0_130 = arith.constant 0 : index
    %147 = vector.load %arg6[%c0_127, %c3_128, %c0_129, %c0_130] : memref<3x4x1x8xf32, #tpu.memory_space<vmem>>, vector<1x1x1x8xf32>
    %148 = vector.shape_cast %147 : vector<1x1x1x8xf32> to vector<1x8xf32>
    %149 = vector.broadcast %148 : vector<1x8xf32> to vector<16x8xf32>
    %150 = arith.addf %146, %149 : vector<16x8xf32>
    %c1_131 = arith.constant 1 : index
    %c3_132 = arith.constant 3 : index
    %c0_133 = arith.constant 0 : index
    %c0_134 = arith.constant 0 : index
    %151 = vector.load %arg5[%c1_131, %c3_132, %c0_133, %c0_134] : memref<3x4x32x8xf32, #tpu.memory_space<vmem>>, vector<1x1x32x8xf32>
    %152 = vector.shape_cast %151 : vector<1x1x32x8xf32> to vector<32x8xf32>
    %cst_135 = arith.constant dense<0.000000e+00> : vector<16x8xf32>
    %153 = tpu.matmul %4, %152, %cst_135 {dimension_numbers = #tpu.dot_dimension_numbers<[1], [0], [0], [1], [0, 0, 1, 1], [], []>} : vector<16x32xf32>, vector<32x8xf32>, vector<16x8xf32> -> vector<16x8xf32>
    %c1_136 = arith.constant 1 : index
    %c3_137 = arith.constant 3 : index
    %c0_138 = arith.constant 0 : index
    %c0_139 = arith.constant 0 : index
    %154 = vector.load %arg6[%c1_136, %c3_137, %c0_138, %c0_139] : memref<3x4x1x8xf32, #tpu.memory_space<vmem>>, vector<1x1x1x8xf32>
    %155 = vector.shape_cast %154 : vector<1x1x1x8xf32> to vector<1x8xf32>
    %156 = vector.broadcast %155 : vector<1x8xf32> to vector<16x8xf32>
    %157 = arith.addf %153, %156 : vector<16x8xf32>
    %c2_140 = arith.constant 2 : index
    %c3_141 = arith.constant 3 : index
    %c0_142 = arith.constant 0 : index
    %c0_143 = arith.constant 0 : index
    %158 = vector.load %arg5[%c2_140, %c3_141, %c0_142, %c0_143] : memref<3x4x32x8xf32, #tpu.memory_space<vmem>>, vector<1x1x32x8xf32>
    %159 = vector.shape_cast %158 : vector<1x1x32x8xf32> to vector<32x8xf32>
    %cst_144 = arith.constant dense<0.000000e+00> : vector<16x8xf32>
    %160 = tpu.matmul %4, %159, %cst_144 {dimension_numbers = #tpu.dot_dimension_numbers<[1], [0], [0], [1], [0, 0, 1, 1], [], []>} : vector<16x32xf32>, vector<32x8xf32>, vector<16x8xf32> -> vector<16x8xf32>
    %c2_145 = arith.constant 2 : index
    %c3_146 = arith.constant 3 : index
    %c0_147 = arith.constant 0 : index
    %c0_148 = arith.constant 0 : index
    %161 = vector.load %arg6[%c2_145, %c3_146, %c0_147, %c0_148] : memref<3x4x1x8xf32, #tpu.memory_space<vmem>>, vector<1x1x1x8xf32>
    %162 = vector.shape_cast %161 : vector<1x1x1x8xf32> to vector<1x8xf32>
    %163 = vector.broadcast %162 : vector<1x8xf32> to vector<16x8xf32>
    %164 = arith.addf %160, %163 : vector<16x8xf32>
    %165 = vector.shape_cast %150 : vector<16x8xf32> to vector<2x8x8xf32>
    %166 = vector.shape_cast %157 : vector<16x8xf32> to vector<2x8x8xf32>
    %167 = vector.shape_cast %164 : vector<16x8xf32> to vector<2x8x8xf32>
    "tpu.trace_start"() <{level = 10 : i32, message = "bqd,bkd->bqk"}> : () -> ()
    %cst_149 = arith.constant dense<0.000000e+00> : vector<2x8x8xf32>
    %168 = tpu.matmul %165, %166, %cst_149 {dimension_numbers = #tpu.dot_dimension_numbers<[2], [2], [1], [1], [0, 0, 0, 1, 1, 1], [0], [0]>} : vector<2x8x8xf32>, vector<2x8x8xf32>, vector<2x8x8xf32> -> vector<2x8x8xf32>
    "tpu.trace_stop"() : () -> ()
    %cst_150 = arith.constant 0.353553385 : f32
    %169 = vector.broadcast %cst_150 : f32 to vector<2x8x8xf32>
    %170 = arith.mulf %168, %169 : vector<2x8x8xf32>
    %cst_151 = arith.constant dense<0xFF800000> : vector<2x8xf32>
    %171 = vector.multi_reduction <maximumf>, %170, %cst_151 [2] : vector<2x8x8xf32> to vector<2x8xf32>
    %172 = vector.shape_cast %171 : vector<2x8xf32> to vector<2x8x1xf32>
    %173 = vector.broadcast %172 : vector<2x8x1xf32> to vector<2x8x8xf32>
    %174 = arith.subf %170, %173 : vector<2x8x8xf32>
    %175 = math.exp %174 : vector<2x8x8xf32>
    %cst_152 = arith.constant dense<0.000000e+00> : vector<2x8xf32>
    %176 = vector.multi_reduction <add>, %175, %cst_152 [2] : vector<2x8x8xf32> to vector<2x8xf32>
    %177 = vector.shape_cast %176 : vector<2x8xf32> to vector<2x8x1xf32>
    %178 = tpu.reciprocal %177 {approx = true} : vector<2x8x1xf32> -> vector<2x8x1xf32>
    %179 = vector.broadcast %178 : vector<2x8x1xf32> to vector<2x8x8xf32>
    %180 = arith.mulf %175, %179 : vector<2x8x8xf32>
    "tpu.trace_start"() <{level = 10 : i32, message = "bqk,bkd->bqd"}> : () -> ()
    %cst_153 = arith.constant dense<0.000000e+00> : vector<2x8x8xf32>
    %181 = tpu.matmul %180, %167, %cst_153 {dimension_numbers = #tpu.dot_dimension_numbers<[2], [1], [1], [2], [0, 0, 0, 1, 1, 2], [0], [0]>} : vector<2x8x8xf32>, vector<2x8x8xf32>, vector<2x8x8xf32> -> vector<2x8x8xf32>
    "tpu.trace_stop"() : () -> ()
    %182 = vector.shape_cast %181 : vector<2x8x8xf32> to vector<16x8xf32>
    %c3_154 = arith.constant 3 : index
    %c0_155 = arith.constant 0 : index
    %c0_156 = arith.constant 0 : index
    %183 = vector.load %arg7[%c3_154, %c0_155, %c0_156] : memref<4x8x32xf32, #tpu.memory_space<vmem>>, vector<1x8x32xf32>
    %184 = vector.shape_cast %183 : vector<1x8x32xf32> to vector<8x32xf32>
    %cst_157 = arith.constant dense<0.000000e+00> : vector<16x32xf32>
    %185 = tpu.matmul %182, %184, %cst_157 {dimension_numbers = #tpu.dot_dimension_numbers<[1], [0], [0], [1], [0, 0, 1, 1], [], []>} : vector<16x8xf32>, vector<8x32xf32>, vector<16x32xf32> -> vector<16x32xf32>
    %186 = arith.addf %143, %185 : vector<16x32xf32>
    %187 = arith.addf %186, %4 : vector<16x32xf32>
    %cst_158 = arith.constant dense<0.000000e+00> : vector<16xf32>
    %188 = vector.multi_reduction <add>, %187, %cst_158 [1] : vector<16x32xf32> to vector<16xf32>
    %189 = vector.shape_cast %188 : vector<16xf32> to vector<16x1xf32>
    %cst_159 = arith.constant 3.200000e+01 : f32
    %190 = vector.broadcast %cst_159 : f32 to vector<16x1xf32>
    %191 = arith.divf %189, %190 : vector<16x1xf32>
    %192 = arith.mulf %187, %187 : vector<16x32xf32>
    %cst_160 = arith.constant dense<0.000000e+00> : vector<16xf32>
    %193 = vector.multi_reduction <add>, %192, %cst_160 [1] : vector<16x32xf32> to vector<16xf32>
    %194 = vector.shape_cast %193 : vector<16xf32> to vector<16x1xf32>
    %cst_161 = arith.constant 3.200000e+01 : f32
    %195 = vector.broadcast %cst_161 : f32 to vector<16x1xf32>
    %196 = arith.divf %194, %195 : vector<16x1xf32>
    %197 = arith.mulf %191, %191 : vector<16x1xf32>
    %198 = arith.subf %196, %197 : vector<16x1xf32>
    %199 = vector.broadcast %191 : vector<16x1xf32> to vector<16x32xf32>
    %200 = arith.subf %187, %199 : vector<16x32xf32>
    %cst_162 = arith.constant 9.99999974E-6 : f32
    %201 = vector.broadcast %cst_162 : f32 to vector<16x1xf32>
    %202 = arith.addf %198, %201 : vector<16x1xf32>
    %203 = math.rsqrt %202 : vector<16x1xf32>
    %204 = vector.broadcast %203 : vector<16x1xf32> to vector<16x32xf32>
    %205 = arith.mulf %200, %204 : vector<16x32xf32>
    %206 = vector.broadcast %6 : vector<1x32xf32> to vector<16x32xf32>
    %207 = arith.mulf %205, %206 : vector<16x32xf32>
    %208 = vector.broadcast %7 : vector<1x32xf32> to vector<16x32xf32>
    %209 = arith.addf %207, %208 : vector<16x32xf32>
    %c0_163 = arith.constant 0 : index
    %c0_164 = arith.constant 0 : index
    %210 = vector.load %arg8[%c0_163, %c0_164] : memref<32x64xf32, #tpu.memory_space<vmem>>, vector<32x64xf32>
    %cst_165 = arith.constant dense<0.000000e+00> : vector<16x64xf32>
    %211 = tpu.matmul %209, %210, %cst_165 {dimension_numbers = #tpu.dot_dimension_numbers<[1], [0], [0], [1], [0, 0, 1, 1], [], []>} : vector<16x32xf32>, vector<32x64xf32>, vector<16x64xf32> -> vector<16x64xf32>
    %212 = vector.broadcast %8 : vector<1x64xf32> to vector<16x64xf32>
    %213 = arith.addf %211, %212 : vector<16x64xf32>
    %cst_166 = arith.constant 0.000000e+00 : f32
    %214 = vector.broadcast %cst_166 : f32 to vector<16x64xf32>
    %215 = arith.maximumf %213, %214 : vector<16x64xf32>
    %c0_167 = arith.constant 0 : index
    %c0_168 = arith.constant 0 : index
    %216 = vector.load %arg9[%c0_167, %c0_168] : memref<64x64xf32, #tpu.memory_space<vmem>>, vector<64x64xf32>
    %cst_169 = arith.constant dense<0.000000e+00> : vector<16x64xf32>
    %217 = tpu.matmul %215, %216, %cst_169 {dimension_numbers = #tpu.dot_dimension_numbers<[1], [0], [0], [1], [0, 0, 1, 1], [], []>} : vector<16x64xf32>, vector<64x64xf32>, vector<16x64xf32> -> vector<16x64xf32>
    %218 = vector.broadcast %9 : vector<1x64xf32> to vector<16x64xf32>
    %219 = arith.addf %217, %218 : vector<16x64xf32>
    %cst_170 = arith.constant dense<0.000000e+00> : vector<16xf32>
    %220 = vector.multi_reduction <add>, %219, %cst_170 [1] : vector<16x64xf32> to vector<16xf32>
    %221 = vector.shape_cast %220 : vector<16xf32> to vector<16x1xf32>
    %cst_171 = arith.constant 6.400000e+01 : f32
    %222 = vector.broadcast %cst_171 : f32 to vector<16x1xf32>
    %223 = arith.divf %221, %222 : vector<16x1xf32>
    %224 = arith.mulf %219, %219 : vector<16x64xf32>
    %cst_172 = arith.constant dense<0.000000e+00> : vector<16xf32>
    %225 = vector.multi_reduction <add>, %224, %cst_172 [1] : vector<16x64xf32> to vector<16xf32>
    %226 = vector.shape_cast %225 : vector<16xf32> to vector<16x1xf32>
    %cst_173 = arith.constant 6.400000e+01 : f32
    %227 = vector.broadcast %cst_173 : f32 to vector<16x1xf32>
    %228 = arith.divf %226, %227 : vector<16x1xf32>
    %229 = arith.mulf %223, %223 : vector<16x1xf32>
    %230 = arith.subf %228, %229 : vector<16x1xf32>
    %231 = vector.broadcast %223 : vector<16x1xf32> to vector<16x64xf32>
    %232 = arith.subf %219, %231 : vector<16x64xf32>
    %cst_174 = arith.constant 9.99999974E-6 : f32
    %233 = vector.broadcast %cst_174 : f32 to vector<16x1xf32>
    %234 = arith.addf %230, %233 : vector<16x1xf32>
    %235 = math.rsqrt %234 : vector<16x1xf32>
    %236 = vector.broadcast %235 : vector<16x1xf32> to vector<16x64xf32>
    %237 = arith.mulf %232, %236 : vector<16x64xf32>
    %238 = vector.broadcast %10 : vector<1x64xf32> to vector<16x64xf32>
    %239 = arith.mulf %237, %238 : vector<16x64xf32>
    %240 = vector.broadcast %11 : vector<1x64xf32> to vector<16x64xf32>
    %241 = arith.addf %239, %240 : vector<16x64xf32>
    %c7 = arith.constant 7 : index
    %c0_175 = arith.constant 0 : index
    %242 = vector.load %arg4[%c7, %c0_175] : memref<14x128xf32, #tpu.memory_space<vmem>>, vector<1x64xf32>
    %c8 = arith.constant 8 : index
    %c0_176 = arith.constant 0 : index
    %243 = vector.load %arg4[%c8, %c0_176] : memref<14x128xf32, #tpu.memory_space<vmem>>, vector<1x64xf32>
    %c9 = arith.constant 9 : index
    %c0_177 = arith.constant 0 : index
    %244 = vector.load %arg4[%c9, %c0_177] : memref<14x128xf32, #tpu.memory_space<vmem>>, vector<1x64xf32>
    %c10 = arith.constant 10 : index
    %c0_178 = arith.constant 0 : index
    %245 = vector.load %arg4[%c10, %c0_178] : memref<14x128xf32, #tpu.memory_space<vmem>>, vector<1x64xf32>
    %c11 = arith.constant 11 : index
    %c0_179 = arith.constant 0 : index
    %246 = vector.load %arg4[%c11, %c0_179] : memref<14x128xf32, #tpu.memory_space<vmem>>, vector<1x64xf32>
    %c12 = arith.constant 12 : index
    %c0_180 = arith.constant 0 : index
    %247 = vector.load %arg4[%c12, %c0_180] : memref<14x128xf32, #tpu.memory_space<vmem>>, vector<1x64xf32>
    %c13 = arith.constant 13 : index
    %c0_181 = arith.constant 0 : index
    %248 = vector.load %arg4[%c13, %c0_181] : memref<14x128xf32, #tpu.memory_space<vmem>>, vector<1x64xf32>
    %cst_182 = arith.constant 0.000000e+00 : f32
    %249 = vector.broadcast %cst_182 : f32 to vector<16x64xf32>
    %250 = vector.broadcast %242 : vector<1x64xf32> to vector<16x64xf32>
    %251 = arith.addf %249, %250 : vector<16x64xf32>
    %c0_183 = arith.constant 0 : index
    %c0_184 = arith.constant 0 : index
    %c0_185 = arith.constant 0 : index
    %c0_186 = arith.constant 0 : index
    %252 = vector.load %arg10[%c0_183, %c0_184, %c0_185, %c0_186] : memref<3x4x64x16xf32, #tpu.memory_space<vmem>>, vector<1x1x64x16xf32>
    %253 = vector.shape_cast %252 : vector<1x1x64x16xf32> to vector<64x16xf32>
    %cst_187 = arith.constant dense<0.000000e+00> : vector<16x16xf32>
    %254 = tpu.matmul %241, %253, %cst_187 {dimension_numbers = #tpu.dot_dimension_numbers<[1], [0], [0], [1], [0, 0, 1, 1], [], []>} : vector<16x64xf32>, vector<64x16xf32>, vector<16x16xf32> -> vector<16x16xf32>
    %c0_188 = arith.constant 0 : index
    %c0_189 = arith.constant 0 : index
    %c0_190 = arith.constant 0 : index
    %c0_191 = arith.constant 0 : index
    %255 = vector.load %arg11[%c0_188, %c0_189, %c0_190, %c0_191] : memref<3x4x1x16xf32, #tpu.memory_space<vmem>>, vector<1x1x1x16xf32>
    %256 = vector.shape_cast %255 : vector<1x1x1x16xf32> to vector<1x16xf32>
    %257 = vector.broadcast %256 : vector<1x16xf32> to vector<16x16xf32>
    %258 = arith.addf %254, %257 : vector<16x16xf32>
    %c1_192 = arith.constant 1 : index
    %c0_193 = arith.constant 0 : index
    %c0_194 = arith.constant 0 : index
    %c0_195 = arith.constant 0 : index
    %259 = vector.load %arg10[%c1_192, %c0_193, %c0_194, %c0_195] : memref<3x4x64x16xf32, #tpu.memory_space<vmem>>, vector<1x1x64x16xf32>
    %260 = vector.shape_cast %259 : vector<1x1x64x16xf32> to vector<64x16xf32>
    %cst_196 = arith.constant dense<0.000000e+00> : vector<16x16xf32>
    %261 = tpu.matmul %241, %260, %cst_196 {dimension_numbers = #tpu.dot_dimension_numbers<[1], [0], [0], [1], [0, 0, 1, 1], [], []>} : vector<16x64xf32>, vector<64x16xf32>, vector<16x16xf32> -> vector<16x16xf32>
    %c1_197 = arith.constant 1 : index
    %c0_198 = arith.constant 0 : index
    %c0_199 = arith.constant 0 : index
    %c0_200 = arith.constant 0 : index
    %262 = vector.load %arg11[%c1_197, %c0_198, %c0_199, %c0_200] : memref<3x4x1x16xf32, #tpu.memory_space<vmem>>, vector<1x1x1x16xf32>
    %263 = vector.shape_cast %262 : vector<1x1x1x16xf32> to vector<1x16xf32>
    %264 = vector.broadcast %263 : vector<1x16xf32> to vector<16x16xf32>
    %265 = arith.addf %261, %264 : vector<16x16xf32>
    %c2_201 = arith.constant 2 : index
    %c0_202 = arith.constant 0 : index
    %c0_203 = arith.constant 0 : index
    %c0_204 = arith.constant 0 : index
    %266 = vector.load %arg10[%c2_201, %c0_202, %c0_203, %c0_204] : memref<3x4x64x16xf32, #tpu.memory_space<vmem>>, vector<1x1x64x16xf32>
    %267 = vector.shape_cast %266 : vector<1x1x64x16xf32> to vector<64x16xf32>
    %cst_205 = arith.constant dense<0.000000e+00> : vector<16x16xf32>
    %268 = tpu.matmul %241, %267, %cst_205 {dimension_numbers = #tpu.dot_dimension_numbers<[1], [0], [0], [1], [0, 0, 1, 1], [], []>} : vector<16x64xf32>, vector<64x16xf32>, vector<16x16xf32> -> vector<16x16xf32>
    %c2_206 = arith.constant 2 : index
    %c0_207 = arith.constant 0 : index
    %c0_208 = arith.constant 0 : index
    %c0_209 = arith.constant 0 : index
    %269 = vector.load %arg11[%c2_206, %c0_207, %c0_208, %c0_209] : memref<3x4x1x16xf32, #tpu.memory_space<vmem>>, vector<1x1x1x16xf32>
    %270 = vector.shape_cast %269 : vector<1x1x1x16xf32> to vector<1x16xf32>
    %271 = vector.broadcast %270 : vector<1x16xf32> to vector<16x16xf32>
    %272 = arith.addf %268, %271 : vector<16x16xf32>
    %273 = vector.shape_cast %258 : vector<16x16xf32> to vector<2x8x16xf32>
    %274 = vector.shape_cast %265 : vector<16x16xf32> to vector<2x8x16xf32>
    %275 = vector.shape_cast %272 : vector<16x16xf32> to vector<2x8x16xf32>
    "tpu.trace_start"() <{level = 10 : i32, message = "bqd,bkd->bqk"}> : () -> ()
    %cst_210 = arith.constant dense<0.000000e+00> : vector<2x8x8xf32>
    %276 = tpu.matmul %273, %274, %cst_210 {dimension_numbers = #tpu.dot_dimension_numbers<[2], [2], [1], [1], [0, 0, 0, 1, 1, 1], [0], [0]>} : vector<2x8x16xf32>, vector<2x8x16xf32>, vector<2x8x8xf32> -> vector<2x8x8xf32>
    "tpu.trace_stop"() : () -> ()
    %cst_211 = arith.constant 2.500000e-01 : f32
    %277 = vector.broadcast %cst_211 : f32 to vector<2x8x8xf32>
    %278 = arith.mulf %276, %277 : vector<2x8x8xf32>
    %cst_212 = arith.constant dense<0xFF800000> : vector<2x8xf32>
    %279 = vector.multi_reduction <maximumf>, %278, %cst_212 [2] : vector<2x8x8xf32> to vector<2x8xf32>
    %280 = vector.shape_cast %279 : vector<2x8xf32> to vector<2x8x1xf32>
    %281 = vector.broadcast %280 : vector<2x8x1xf32> to vector<2x8x8xf32>
    %282 = arith.subf %278, %281 : vector<2x8x8xf32>
    %283 = math.exp %282 : vector<2x8x8xf32>
    %cst_213 = arith.constant dense<0.000000e+00> : vector<2x8xf32>
    %284 = vector.multi_reduction <add>, %283, %cst_213 [2] : vector<2x8x8xf32> to vector<2x8xf32>
    %285 = vector.shape_cast %284 : vector<2x8xf32> to vector<2x8x1xf32>
    %286 = tpu.reciprocal %285 {approx = true} : vector<2x8x1xf32> -> vector<2x8x1xf32>
    %287 = vector.broadcast %286 : vector<2x8x1xf32> to vector<2x8x8xf32>
    %288 = arith.mulf %283, %287 : vector<2x8x8xf32>
    "tpu.trace_start"() <{level = 10 : i32, message = "bqk,bkd->bqd"}> : () -> ()
    %cst_214 = arith.constant dense<0.000000e+00> : vector<2x8x16xf32>
    %289 = tpu.matmul %288, %275, %cst_214 {dimension_numbers = #tpu.dot_dimension_numbers<[2], [1], [1], [2], [0, 0, 0, 1, 1, 2], [0], [0]>} : vector<2x8x8xf32>, vector<2x8x16xf32>, vector<2x8x16xf32> -> vector<2x8x16xf32>
    "tpu.trace_stop"() : () -> ()
    %290 = vector.shape_cast %289 : vector<2x8x16xf32> to vector<16x16xf32>
    %c0_215 = arith.constant 0 : index
    %c0_216 = arith.constant 0 : index
    %c0_217 = arith.constant 0 : index
    %291 = vector.load %arg12[%c0_215, %c0_216, %c0_217] : memref<4x16x64xf32, #tpu.memory_space<vmem>>, vector<1x16x64xf32>
    %292 = vector.shape_cast %291 : vector<1x16x64xf32> to vector<16x64xf32>
    %cst_218 = arith.constant dense<0.000000e+00> : vector<16x64xf32>
    %293 = tpu.matmul %290, %292, %cst_218 {dimension_numbers = #tpu.dot_dimension_numbers<[1], [0], [0], [1], [0, 0, 1, 1], [], []>} : vector<16x16xf32>, vector<16x64xf32>, vector<16x64xf32> -> vector<16x64xf32>
    %294 = arith.addf %251, %293 : vector<16x64xf32>
    %c0_219 = arith.constant 0 : index
    %c1_220 = arith.constant 1 : index
    %c0_221 = arith.constant 0 : index
    %c0_222 = arith.constant 0 : index
    %295 = vector.load %arg10[%c0_219, %c1_220, %c0_221, %c0_222] : memref<3x4x64x16xf32, #tpu.memory_space<vmem>>, vector<1x1x64x16xf32>
    %296 = vector.shape_cast %295 : vector<1x1x64x16xf32> to vector<64x16xf32>
    %cst_223 = arith.constant dense<0.000000e+00> : vector<16x16xf32>
    %297 = tpu.matmul %241, %296, %cst_223 {dimension_numbers = #tpu.dot_dimension_numbers<[1], [0], [0], [1], [0, 0, 1, 1], [], []>} : vector<16x64xf32>, vector<64x16xf32>, vector<16x16xf32> -> vector<16x16xf32>
    %c0_224 = arith.constant 0 : index
    %c1_225 = arith.constant 1 : index
    %c0_226 = arith.constant 0 : index
    %c0_227 = arith.constant 0 : index
    %298 = vector.load %arg11[%c0_224, %c1_225, %c0_226, %c0_227] : memref<3x4x1x16xf32, #tpu.memory_space<vmem>>, vector<1x1x1x16xf32>
    %299 = vector.shape_cast %298 : vector<1x1x1x16xf32> to vector<1x16xf32>
    %300 = vector.broadcast %299 : vector<1x16xf32> to vector<16x16xf32>
    %301 = arith.addf %297, %300 : vector<16x16xf32>
    %c1_228 = arith.constant 1 : index
    %c1_229 = arith.constant 1 : index
    %c0_230 = arith.constant 0 : index
    %c0_231 = arith.constant 0 : index
    %302 = vector.load %arg10[%c1_228, %c1_229, %c0_230, %c0_231] : memref<3x4x64x16xf32, #tpu.memory_space<vmem>>, vector<1x1x64x16xf32>
    %303 = vector.shape_cast %302 : vector<1x1x64x16xf32> to vector<64x16xf32>
    %cst_232 = arith.constant dense<0.000000e+00> : vector<16x16xf32>
    %304 = tpu.matmul %241, %303, %cst_232 {dimension_numbers = #tpu.dot_dimension_numbers<[1], [0], [0], [1], [0, 0, 1, 1], [], []>} : vector<16x64xf32>, vector<64x16xf32>, vector<16x16xf32> -> vector<16x16xf32>
    %c1_233 = arith.constant 1 : index
    %c1_234 = arith.constant 1 : index
    %c0_235 = arith.constant 0 : index
    %c0_236 = arith.constant 0 : index
    %305 = vector.load %arg11[%c1_233, %c1_234, %c0_235, %c0_236] : memref<3x4x1x16xf32, #tpu.memory_space<vmem>>, vector<1x1x1x16xf32>
    %306 = vector.shape_cast %305 : vector<1x1x1x16xf32> to vector<1x16xf32>
    %307 = vector.broadcast %306 : vector<1x16xf32> to vector<16x16xf32>
    %308 = arith.addf %304, %307 : vector<16x16xf32>
    %c2_237 = arith.constant 2 : index
    %c1_238 = arith.constant 1 : index
    %c0_239 = arith.constant 0 : index
    %c0_240 = arith.constant 0 : index
    %309 = vector.load %arg10[%c2_237, %c1_238, %c0_239, %c0_240] : memref<3x4x64x16xf32, #tpu.memory_space<vmem>>, vector<1x1x64x16xf32>
    %310 = vector.shape_cast %309 : vector<1x1x64x16xf32> to vector<64x16xf32>
    %cst_241 = arith.constant dense<0.000000e+00> : vector<16x16xf32>
    %311 = tpu.matmul %241, %310, %cst_241 {dimension_numbers = #tpu.dot_dimension_numbers<[1], [0], [0], [1], [0, 0, 1, 1], [], []>} : vector<16x64xf32>, vector<64x16xf32>, vector<16x16xf32> -> vector<16x16xf32>
    %c2_242 = arith.constant 2 : index
    %c1_243 = arith.constant 1 : index
    %c0_244 = arith.constant 0 : index
    %c0_245 = arith.constant 0 : index
    %312 = vector.load %arg11[%c2_242, %c1_243, %c0_244, %c0_245] : memref<3x4x1x16xf32, #tpu.memory_space<vmem>>, vector<1x1x1x16xf32>
    %313 = vector.shape_cast %312 : vector<1x1x1x16xf32> to vector<1x16xf32>
    %314 = vector.broadcast %313 : vector<1x16xf32> to vector<16x16xf32>
    %315 = arith.addf %311, %314 : vector<16x16xf32>
    %316 = vector.shape_cast %301 : vector<16x16xf32> to vector<2x8x16xf32>
    %317 = vector.shape_cast %308 : vector<16x16xf32> to vector<2x8x16xf32>
    %318 = vector.shape_cast %315 : vector<16x16xf32> to vector<2x8x16xf32>
    "tpu.trace_start"() <{level = 10 : i32, message = "bqd,bkd->bqk"}> : () -> ()
    %cst_246 = arith.constant dense<0.000000e+00> : vector<2x8x8xf32>
    %319 = tpu.matmul %316, %317, %cst_246 {dimension_numbers = #tpu.dot_dimension_numbers<[2], [2], [1], [1], [0, 0, 0, 1, 1, 1], [0], [0]>} : vector<2x8x16xf32>, vector<2x8x16xf32>, vector<2x8x8xf32> -> vector<2x8x8xf32>
    "tpu.trace_stop"() : () -> ()
    %cst_247 = arith.constant 2.500000e-01 : f32
    %320 = vector.broadcast %cst_247 : f32 to vector<2x8x8xf32>
    %321 = arith.mulf %319, %320 : vector<2x8x8xf32>
    %cst_248 = arith.constant dense<0xFF800000> : vector<2x8xf32>
    %322 = vector.multi_reduction <maximumf>, %321, %cst_248 [2] : vector<2x8x8xf32> to vector<2x8xf32>
    %323 = vector.shape_cast %322 : vector<2x8xf32> to vector<2x8x1xf32>
    %324 = vector.broadcast %323 : vector<2x8x1xf32> to vector<2x8x8xf32>
    %325 = arith.subf %321, %324 : vector<2x8x8xf32>
    %326 = math.exp %325 : vector<2x8x8xf32>
    %cst_249 = arith.constant dense<0.000000e+00> : vector<2x8xf32>
    %327 = vector.multi_reduction <add>, %326, %cst_249 [2] : vector<2x8x8xf32> to vector<2x8xf32>
    %328 = vector.shape_cast %327 : vector<2x8xf32> to vector<2x8x1xf32>
    %329 = tpu.reciprocal %328 {approx = true} : vector<2x8x1xf32> -> vector<2x8x1xf32>
    %330 = vector.broadcast %329 : vector<2x8x1xf32> to vector<2x8x8xf32>
    %331 = arith.mulf %326, %330 : vector<2x8x8xf32>
    "tpu.trace_start"() <{level = 10 : i32, message = "bqk,bkd->bqd"}> : () -> ()
    %cst_250 = arith.constant dense<0.000000e+00> : vector<2x8x16xf32>
    %332 = tpu.matmul %331, %318, %cst_250 {dimension_numbers = #tpu.dot_dimension_numbers<[2], [1], [1], [2], [0, 0, 0, 1, 1, 2], [0], [0]>} : vector<2x8x8xf32>, vector<2x8x16xf32>, vector<2x8x16xf32> -> vector<2x8x16xf32>
    "tpu.trace_stop"() : () -> ()
    %333 = vector.shape_cast %332 : vector<2x8x16xf32> to vector<16x16xf32>
    %c1_251 = arith.constant 1 : index
    %c0_252 = arith.constant 0 : index
    %c0_253 = arith.constant 0 : index
    %334 = vector.load %arg12[%c1_251, %c0_252, %c0_253] : memref<4x16x64xf32, #tpu.memory_space<vmem>>, vector<1x16x64xf32>
    %335 = vector.shape_cast %334 : vector<1x16x64xf32> to vector<16x64xf32>
    %cst_254 = arith.constant dense<0.000000e+00> : vector<16x64xf32>
    %336 = tpu.matmul %333, %335, %cst_254 {dimension_numbers = #tpu.dot_dimension_numbers<[1], [0], [0], [1], [0, 0, 1, 1], [], []>} : vector<16x16xf32>, vector<16x64xf32>, vector<16x64xf32> -> vector<16x64xf32>
    %337 = arith.addf %294, %336 : vector<16x64xf32>
    %c0_255 = arith.constant 0 : index
    %c2_256 = arith.constant 2 : index
    %c0_257 = arith.constant 0 : index
    %c0_258 = arith.constant 0 : index
    %338 = vector.load %arg10[%c0_255, %c2_256, %c0_257, %c0_258] : memref<3x4x64x16xf32, #tpu.memory_space<vmem>>, vector<1x1x64x16xf32>
    %339 = vector.shape_cast %338 : vector<1x1x64x16xf32> to vector<64x16xf32>
    %cst_259 = arith.constant dense<0.000000e+00> : vector<16x16xf32>
    %340 = tpu.matmul %241, %339, %cst_259 {dimension_numbers = #tpu.dot_dimension_numbers<[1], [0], [0], [1], [0, 0, 1, 1], [], []>} : vector<16x64xf32>, vector<64x16xf32>, vector<16x16xf32> -> vector<16x16xf32>
    %c0_260 = arith.constant 0 : index
    %c2_261 = arith.constant 2 : index
    %c0_262 = arith.constant 0 : index
    %c0_263 = arith.constant 0 : index
    %341 = vector.load %arg11[%c0_260, %c2_261, %c0_262, %c0_263] : memref<3x4x1x16xf32, #tpu.memory_space<vmem>>, vector<1x1x1x16xf32>
    %342 = vector.shape_cast %341 : vector<1x1x1x16xf32> to vector<1x16xf32>
    %343 = vector.broadcast %342 : vector<1x16xf32> to vector<16x16xf32>
    %344 = arith.addf %340, %343 : vector<16x16xf32>
    %c1_264 = arith.constant 1 : index
    %c2_265 = arith.constant 2 : index
    %c0_266 = arith.constant 0 : index
    %c0_267 = arith.constant 0 : index
    %345 = vector.load %arg10[%c1_264, %c2_265, %c0_266, %c0_267] : memref<3x4x64x16xf32, #tpu.memory_space<vmem>>, vector<1x1x64x16xf32>
    %346 = vector.shape_cast %345 : vector<1x1x64x16xf32> to vector<64x16xf32>
    %cst_268 = arith.constant dense<0.000000e+00> : vector<16x16xf32>
    %347 = tpu.matmul %241, %346, %cst_268 {dimension_numbers = #tpu.dot_dimension_numbers<[1], [0], [0], [1], [0, 0, 1, 1], [], []>} : vector<16x64xf32>, vector<64x16xf32>, vector<16x16xf32> -> vector<16x16xf32>
    %c1_269 = arith.constant 1 : index
    %c2_270 = arith.constant 2 : index
    %c0_271 = arith.constant 0 : index
    %c0_272 = arith.constant 0 : index
    %348 = vector.load %arg11[%c1_269, %c2_270, %c0_271, %c0_272] : memref<3x4x1x16xf32, #tpu.memory_space<vmem>>, vector<1x1x1x16xf32>
    %349 = vector.shape_cast %348 : vector<1x1x1x16xf32> to vector<1x16xf32>
    %350 = vector.broadcast %349 : vector<1x16xf32> to vector<16x16xf32>
    %351 = arith.addf %347, %350 : vector<16x16xf32>
    %c2_273 = arith.constant 2 : index
    %c2_274 = arith.constant 2 : index
    %c0_275 = arith.constant 0 : index
    %c0_276 = arith.constant 0 : index
    %352 = vector.load %arg10[%c2_273, %c2_274, %c0_275, %c0_276] : memref<3x4x64x16xf32, #tpu.memory_space<vmem>>, vector<1x1x64x16xf32>
    %353 = vector.shape_cast %352 : vector<1x1x64x16xf32> to vector<64x16xf32>
    %cst_277 = arith.constant dense<0.000000e+00> : vector<16x16xf32>
    %354 = tpu.matmul %241, %353, %cst_277 {dimension_numbers = #tpu.dot_dimension_numbers<[1], [0], [0], [1], [0, 0, 1, 1], [], []>} : vector<16x64xf32>, vector<64x16xf32>, vector<16x16xf32> -> vector<16x16xf32>
    %c2_278 = arith.constant 2 : index
    %c2_279 = arith.constant 2 : index
    %c0_280 = arith.constant 0 : index
    %c0_281 = arith.constant 0 : index
    %355 = vector.load %arg11[%c2_278, %c2_279, %c0_280, %c0_281] : memref<3x4x1x16xf32, #tpu.memory_space<vmem>>, vector<1x1x1x16xf32>
    %356 = vector.shape_cast %355 : vector<1x1x1x16xf32> to vector<1x16xf32>
    %357 = vector.broadcast %356 : vector<1x16xf32> to vector<16x16xf32>
    %358 = arith.addf %354, %357 : vector<16x16xf32>
    %359 = vector.shape_cast %344 : vector<16x16xf32> to vector<2x8x16xf32>
    %360 = vector.shape_cast %351 : vector<16x16xf32> to vector<2x8x16xf32>
    %361 = vector.shape_cast %358 : vector<16x16xf32> to vector<2x8x16xf32>
    "tpu.trace_start"() <{level = 10 : i32, message = "bqd,bkd->bqk"}> : () -> ()
    %cst_282 = arith.constant dense<0.000000e+00> : vector<2x8x8xf32>
    %362 = tpu.matmul %359, %360, %cst_282 {dimension_numbers = #tpu.dot_dimension_numbers<[2], [2], [1], [1], [0, 0, 0, 1, 1, 1], [0], [0]>} : vector<2x8x16xf32>, vector<2x8x16xf32>, vector<2x8x8xf32> -> vector<2x8x8xf32>
    "tpu.trace_stop"() : () -> ()
    %cst_283 = arith.constant 2.500000e-01 : f32
    %363 = vector.broadcast %cst_283 : f32 to vector<2x8x8xf32>
    %364 = arith.mulf %362, %363 : vector<2x8x8xf32>
    %cst_284 = arith.constant dense<0xFF800000> : vector<2x8xf32>
    %365 = vector.multi_reduction <maximumf>, %364, %cst_284 [2] : vector<2x8x8xf32> to vector<2x8xf32>
    %366 = vector.shape_cast %365 : vector<2x8xf32> to vector<2x8x1xf32>
    %367 = vector.broadcast %366 : vector<2x8x1xf32> to vector<2x8x8xf32>
    %368 = arith.subf %364, %367 : vector<2x8x8xf32>
    %369 = math.exp %368 : vector<2x8x8xf32>
    %cst_285 = arith.constant dense<0.000000e+00> : vector<2x8xf32>
    %370 = vector.multi_reduction <add>, %369, %cst_285 [2] : vector<2x8x8xf32> to vector<2x8xf32>
    %371 = vector.shape_cast %370 : vector<2x8xf32> to vector<2x8x1xf32>
    %372 = tpu.reciprocal %371 {approx = true} : vector<2x8x1xf32> -> vector<2x8x1xf32>
    %373 = vector.broadcast %372 : vector<2x8x1xf32> to vector<2x8x8xf32>
    %374 = arith.mulf %369, %373 : vector<2x8x8xf32>
    "tpu.trace_start"() <{level = 10 : i32, message = "bqk,bkd->bqd"}> : () -> ()
    %cst_286 = arith.constant dense<0.000000e+00> : vector<2x8x16xf32>
    %375 = tpu.matmul %374, %361, %cst_286 {dimension_numbers = #tpu.dot_dimension_numbers<[2], [1], [1], [2], [0, 0, 0, 1, 1, 2], [0], [0]>} : vector<2x8x8xf32>, vector<2x8x16xf32>, vector<2x8x16xf32> -> vector<2x8x16xf32>
    "tpu.trace_stop"() : () -> ()
    %376 = vector.shape_cast %375 : vector<2x8x16xf32> to vector<16x16xf32>
    %c2_287 = arith.constant 2 : index
    %c0_288 = arith.constant 0 : index
    %c0_289 = arith.constant 0 : index
    %377 = vector.load %arg12[%c2_287, %c0_288, %c0_289] : memref<4x16x64xf32, #tpu.memory_space<vmem>>, vector<1x16x64xf32>
    %378 = vector.shape_cast %377 : vector<1x16x64xf32> to vector<16x64xf32>
    %cst_290 = arith.constant dense<0.000000e+00> : vector<16x64xf32>
    %379 = tpu.matmul %376, %378, %cst_290 {dimension_numbers = #tpu.dot_dimension_numbers<[1], [0], [0], [1], [0, 0, 1, 1], [], []>} : vector<16x16xf32>, vector<16x64xf32>, vector<16x64xf32> -> vector<16x64xf32>
    %380 = arith.addf %337, %379 : vector<16x64xf32>
    %c0_291 = arith.constant 0 : index
    %c3_292 = arith.constant 3 : index
    %c0_293 = arith.constant 0 : index
    %c0_294 = arith.constant 0 : index
    %381 = vector.load %arg10[%c0_291, %c3_292, %c0_293, %c0_294] : memref<3x4x64x16xf32, #tpu.memory_space<vmem>>, vector<1x1x64x16xf32>
    %382 = vector.shape_cast %381 : vector<1x1x64x16xf32> to vector<64x16xf32>
    %cst_295 = arith.constant dense<0.000000e+00> : vector<16x16xf32>
    %383 = tpu.matmul %241, %382, %cst_295 {dimension_numbers = #tpu.dot_dimension_numbers<[1], [0], [0], [1], [0, 0, 1, 1], [], []>} : vector<16x64xf32>, vector<64x16xf32>, vector<16x16xf32> -> vector<16x16xf32>
    %c0_296 = arith.constant 0 : index
    %c3_297 = arith.constant 3 : index
    %c0_298 = arith.constant 0 : index
    %c0_299 = arith.constant 0 : index
    %384 = vector.load %arg11[%c0_296, %c3_297, %c0_298, %c0_299] : memref<3x4x1x16xf32, #tpu.memory_space<vmem>>, vector<1x1x1x16xf32>
    %385 = vector.shape_cast %384 : vector<1x1x1x16xf32> to vector<1x16xf32>
    %386 = vector.broadcast %385 : vector<1x16xf32> to vector<16x16xf32>
    %387 = arith.addf %383, %386 : vector<16x16xf32>
    %c1_300 = arith.constant 1 : index
    %c3_301 = arith.constant 3 : index
    %c0_302 = arith.constant 0 : index
    %c0_303 = arith.constant 0 : index
    %388 = vector.load %arg10[%c1_300, %c3_301, %c0_302, %c0_303] : memref<3x4x64x16xf32, #tpu.memory_space<vmem>>, vector<1x1x64x16xf32>
    %389 = vector.shape_cast %388 : vector<1x1x64x16xf32> to vector<64x16xf32>
    %cst_304 = arith.constant dense<0.000000e+00> : vector<16x16xf32>
    %390 = tpu.matmul %241, %389, %cst_304 {dimension_numbers = #tpu.dot_dimension_numbers<[1], [0], [0], [1], [0, 0, 1, 1], [], []>} : vector<16x64xf32>, vector<64x16xf32>, vector<16x16xf32> -> vector<16x16xf32>
    %c1_305 = arith.constant 1 : index
    %c3_306 = arith.constant 3 : index
    %c0_307 = arith.constant 0 : index
    %c0_308 = arith.constant 0 : index
    %391 = vector.load %arg11[%c1_305, %c3_306, %c0_307, %c0_308] : memref<3x4x1x16xf32, #tpu.memory_space<vmem>>, vector<1x1x1x16xf32>
    %392 = vector.shape_cast %391 : vector<1x1x1x16xf32> to vector<1x16xf32>
    %393 = vector.broadcast %392 : vector<1x16xf32> to vector<16x16xf32>
    %394 = arith.addf %390, %393 : vector<16x16xf32>
    %c2_309 = arith.constant 2 : index
    %c3_310 = arith.constant 3 : index
    %c0_311 = arith.constant 0 : index
    %c0_312 = arith.constant 0 : index
    %395 = vector.load %arg10[%c2_309, %c3_310, %c0_311, %c0_312] : memref<3x4x64x16xf32, #tpu.memory_space<vmem>>, vector<1x1x64x16xf32>
    %396 = vector.shape_cast %395 : vector<1x1x64x16xf32> to vector<64x16xf32>
    %cst_313 = arith.constant dense<0.000000e+00> : vector<16x16xf32>
    %397 = tpu.matmul %241, %396, %cst_313 {dimension_numbers = #tpu.dot_dimension_numbers<[1], [0], [0], [1], [0, 0, 1, 1], [], []>} : vector<16x64xf32>, vector<64x16xf32>, vector<16x16xf32> -> vector<16x16xf32>
    %c2_314 = arith.constant 2 : index
    %c3_315 = arith.constant 3 : index
    %c0_316 = arith.constant 0 : index
    %c0_317 = arith.constant 0 : index
    %398 = vector.load %arg11[%c2_314, %c3_315, %c0_316, %c0_317] : memref<3x4x1x16xf32, #tpu.memory_space<vmem>>, vector<1x1x1x16xf32>
    %399 = vector.shape_cast %398 : vector<1x1x1x16xf32> to vector<1x16xf32>
    %400 = vector.broadcast %399 : vector<1x16xf32> to vector<16x16xf32>
    %401 = arith.addf %397, %400 : vector<16x16xf32>
    %402 = vector.shape_cast %387 : vector<16x16xf32> to vector<2x8x16xf32>
    %403 = vector.shape_cast %394 : vector<16x16xf32> to vector<2x8x16xf32>
    %404 = vector.shape_cast %401 : vector<16x16xf32> to vector<2x8x16xf32>
    "tpu.trace_start"() <{level = 10 : i32, message = "bqd,bkd->bqk"}> : () -> ()
    %cst_318 = arith.constant dense<0.000000e+00> : vector<2x8x8xf32>
    %405 = tpu.matmul %402, %403, %cst_318 {dimension_numbers = #tpu.dot_dimension_numbers<[2], [2], [1], [1], [0, 0, 0, 1, 1, 1], [0], [0]>} : vector<2x8x16xf32>, vector<2x8x16xf32>, vector<2x8x8xf32> -> vector<2x8x8xf32>
    "tpu.trace_stop"() : () -> ()
    %cst_319 = arith.constant 2.500000e-01 : f32
    %406 = vector.broadcast %cst_319 : f32 to vector<2x8x8xf32>
    %407 = arith.mulf %405, %406 : vector<2x8x8xf32>
    %cst_320 = arith.constant dense<0xFF800000> : vector<2x8xf32>
    %408 = vector.multi_reduction <maximumf>, %407, %cst_320 [2] : vector<2x8x8xf32> to vector<2x8xf32>
    %409 = vector.shape_cast %408 : vector<2x8xf32> to vector<2x8x1xf32>
    %410 = vector.broadcast %409 : vector<2x8x1xf32> to vector<2x8x8xf32>
    %411 = arith.subf %407, %410 : vector<2x8x8xf32>
    %412 = math.exp %411 : vector<2x8x8xf32>
    %cst_321 = arith.constant dense<0.000000e+00> : vector<2x8xf32>
    %413 = vector.multi_reduction <add>, %412, %cst_321 [2] : vector<2x8x8xf32> to vector<2x8xf32>
    %414 = vector.shape_cast %413 : vector<2x8xf32> to vector<2x8x1xf32>
    %415 = tpu.reciprocal %414 {approx = true} : vector<2x8x1xf32> -> vector<2x8x1xf32>
    %416 = vector.broadcast %415 : vector<2x8x1xf32> to vector<2x8x8xf32>
    %417 = arith.mulf %412, %416 : vector<2x8x8xf32>
    "tpu.trace_start"() <{level = 10 : i32, message = "bqk,bkd->bqd"}> : () -> ()
    %cst_322 = arith.constant dense<0.000000e+00> : vector<2x8x16xf32>
    %418 = tpu.matmul %417, %404, %cst_322 {dimension_numbers = #tpu.dot_dimension_numbers<[2], [1], [1], [2], [0, 0, 0, 1, 1, 2], [0], [0]>} : vector<2x8x8xf32>, vector<2x8x16xf32>, vector<2x8x16xf32> -> vector<2x8x16xf32>
    "tpu.trace_stop"() : () -> ()
    %419 = vector.shape_cast %418 : vector<2x8x16xf32> to vector<16x16xf32>
    %c3_323 = arith.constant 3 : index
    %c0_324 = arith.constant 0 : index
    %c0_325 = arith.constant 0 : index
    %420 = vector.load %arg12[%c3_323, %c0_324, %c0_325] : memref<4x16x64xf32, #tpu.memory_space<vmem>>, vector<1x16x64xf32>
    %421 = vector.shape_cast %420 : vector<1x16x64xf32> to vector<16x64xf32>
    %cst_326 = arith.constant dense<0.000000e+00> : vector<16x64xf32>
    %422 = tpu.matmul %419, %421, %cst_326 {dimension_numbers = #tpu.dot_dimension_numbers<[1], [0], [0], [1], [0, 0, 1, 1], [], []>} : vector<16x16xf32>, vector<16x64xf32>, vector<16x64xf32> -> vector<16x64xf32>
    %423 = arith.addf %380, %422 : vector<16x64xf32>
    %424 = arith.addf %423, %241 : vector<16x64xf32>
    %cst_327 = arith.constant dense<0.000000e+00> : vector<16xf32>
    %425 = vector.multi_reduction <add>, %424, %cst_327 [1] : vector<16x64xf32> to vector<16xf32>
    %426 = vector.shape_cast %425 : vector<16xf32> to vector<16x1xf32>
    %cst_328 = arith.constant 6.400000e+01 : f32
    %427 = vector.broadcast %cst_328 : f32 to vector<16x1xf32>
    %428 = arith.divf %426, %427 : vector<16x1xf32>
    %429 = arith.mulf %424, %424 : vector<16x64xf32>
    %cst_329 = arith.constant dense<0.000000e+00> : vector<16xf32>
    %430 = vector.multi_reduction <add>, %429, %cst_329 [1] : vector<16x64xf32> to vector<16xf32>
    %431 = vector.shape_cast %430 : vector<16xf32> to vector<16x1xf32>
    %cst_330 = arith.constant 6.400000e+01 : f32
    %432 = vector.broadcast %cst_330 : f32 to vector<16x1xf32>
    %433 = arith.divf %431, %432 : vector<16x1xf32>
    %434 = arith.mulf %428, %428 : vector<16x1xf32>
    %435 = arith.subf %433, %434 : vector<16x1xf32>
    %436 = vector.broadcast %428 : vector<16x1xf32> to vector<16x64xf32>
    %437 = arith.subf %424, %436 : vector<16x64xf32>
    %cst_331 = arith.constant 9.99999974E-6 : f32
    %438 = vector.broadcast %cst_331 : f32 to vector<16x1xf32>
    %439 = arith.addf %435, %438 : vector<16x1xf32>
    %440 = math.rsqrt %439 : vector<16x1xf32>
    %441 = vector.broadcast %440 : vector<16x1xf32> to vector<16x64xf32>
    %442 = arith.mulf %437, %441 : vector<16x64xf32>
    %443 = vector.broadcast %243 : vector<1x64xf32> to vector<16x64xf32>
    %444 = arith.mulf %442, %443 : vector<16x64xf32>
    %445 = vector.broadcast %244 : vector<1x64xf32> to vector<16x64xf32>
    %446 = arith.addf %444, %445 : vector<16x64xf32>
    %c0_332 = arith.constant 0 : index
    %c0_333 = arith.constant 0 : index
    %447 = vector.load %arg13[%c0_332, %c0_333] : memref<64x64xf32, #tpu.memory_space<vmem>>, vector<64x64xf32>
    %cst_334 = arith.constant dense<0.000000e+00> : vector<16x64xf32>
    %448 = tpu.matmul %446, %447, %cst_334 {dimension_numbers = #tpu.dot_dimension_numbers<[1], [0], [0], [1], [0, 0, 1, 1], [], []>} : vector<16x64xf32>, vector<64x64xf32>, vector<16x64xf32> -> vector<16x64xf32>
    %449 = vector.broadcast %245 : vector<1x64xf32> to vector<16x64xf32>
    %450 = arith.addf %448, %449 : vector<16x64xf32>
    %cst_335 = arith.constant 0.000000e+00 : f32
    %451 = vector.broadcast %cst_335 : f32 to vector<16x64xf32>
    %452 = arith.maximumf %450, %451 : vector<16x64xf32>
    %c0_336 = arith.constant 0 : index
    %c0_337 = arith.constant 0 : index
    %453 = vector.load %arg14[%c0_336, %c0_337] : memref<64x64xf32, #tpu.memory_space<vmem>>, vector<64x64xf32>
    %cst_338 = arith.constant dense<0.000000e+00> : vector<16x64xf32>
    %454 = tpu.matmul %452, %453, %cst_338 {dimension_numbers = #tpu.dot_dimension_numbers<[1], [0], [0], [1], [0, 0, 1, 1], [], []>} : vector<16x64xf32>, vector<64x64xf32>, vector<16x64xf32> -> vector<16x64xf32>
    %455 = vector.broadcast %246 : vector<1x64xf32> to vector<16x64xf32>
    %456 = arith.addf %454, %455 : vector<16x64xf32>
    %457 = arith.addf %456, %446 : vector<16x64xf32>
    %cst_339 = arith.constant dense<0.000000e+00> : vector<16xf32>
    %458 = vector.multi_reduction <add>, %457, %cst_339 [1] : vector<16x64xf32> to vector<16xf32>
    %459 = vector.shape_cast %458 : vector<16xf32> to vector<16x1xf32>
    %cst_340 = arith.constant 6.400000e+01 : f32
    %460 = vector.broadcast %cst_340 : f32 to vector<16x1xf32>
    %461 = arith.divf %459, %460 : vector<16x1xf32>
    %462 = arith.mulf %457, %457 : vector<16x64xf32>
    %cst_341 = arith.constant dense<0.000000e+00> : vector<16xf32>
    %463 = vector.multi_reduction <add>, %462, %cst_341 [1] : vector<16x64xf32> to vector<16xf32>
    %464 = vector.shape_cast %463 : vector<16xf32> to vector<16x1xf32>
    %cst_342 = arith.constant 6.400000e+01 : f32
    %465 = vector.broadcast %cst_342 : f32 to vector<16x1xf32>
    %466 = arith.divf %464, %465 : vector<16x1xf32>
    %467 = arith.mulf %461, %461 : vector<16x1xf32>
    %468 = arith.subf %466, %467 : vector<16x1xf32>
    %469 = vector.broadcast %461 : vector<16x1xf32> to vector<16x64xf32>
    %470 = arith.subf %457, %469 : vector<16x64xf32>
    %cst_343 = arith.constant 9.99999974E-6 : f32
    %471 = vector.broadcast %cst_343 : f32 to vector<16x1xf32>
    %472 = arith.addf %468, %471 : vector<16x1xf32>
    %473 = math.rsqrt %472 : vector<16x1xf32>
    %474 = vector.broadcast %473 : vector<16x1xf32> to vector<16x64xf32>
    %475 = arith.mulf %470, %474 : vector<16x64xf32>
    %476 = vector.broadcast %247 : vector<1x64xf32> to vector<16x64xf32>
    %477 = arith.mulf %475, %476 : vector<16x64xf32>
    %478 = vector.broadcast %248 : vector<1x64xf32> to vector<16x64xf32>
    %479 = arith.addf %477, %478 : vector<16x64xf32>
    %c0_344 = arith.constant 0 : index
    %c0_345 = arith.constant 0 : index
    %480 = vector.load %arg15[%c0_344, %c0_345] : memref<16x64xf32, #tpu.memory_space<vmem>>, vector<16x64xf32>
    tpu.vector_store %arg15[%c0_344, %c0_345], %479 {strides = array<i32>} : memref<16x64xf32, #tpu.memory_space<vmem>>, vector<16x64xf32>,
    return
  }
  func.func @transform_0(%arg0: i32) -> (i32, i32) {
    %c0_i32 = arith.constant 0 : i32
    %c0_i32_0 = arith.constant 0 : i32
    %c0_i32_1 = arith.constant 0 : i32
    return %c0_i32, %c0_i32_0 : i32, i32
  }
  func.func @transform_1(%arg0: i32) -> (i32, i32) {
    %c0_i32 = arith.constant 0 : i32
    %c0_i32_0 = arith.constant 0 : i32
    %c0_i32_1 = arith.constant 0 : i32
    return %c0_i32, %c0_i32_0 : i32, i32
  }
  func.func @transform_2(%arg0: i32) -> (i32, i32) {
    %c0_i32 = arith.constant 0 : i32
    %c0_i32_0 = arith.constant 0 : i32
    %c0_i32_1 = arith.constant 0 : i32
    return %c0_i32, %c0_i32_0 : i32, i32
  }
  func.func @transform_3(%arg0: i32) -> (i32, i32) {
    %c0_i32 = arith.constant 0 : i32
    %c0_i32_0 = arith.constant 0 : i32
    %c0_i32_1 = arith.constant 0 : i32
    return %c0_i32, %c0_i32_0 : i32, i32
  }
  func.func @transform_4(%arg0: i32) -> (i32, i32, i32, i32) {
    %c0_i32 = arith.constant 0 : i32
    %c0_i32_0 = arith.constant 0 : i32
    %c0_i32_1 = arith.constant 0 : i32
    %c0_i32_2 = arith.constant 0 : i32
    %c0_i32_3 = arith.constant 0 : i32
    return %c0_i32, %c0_i32_0, %c0_i32_1, %c0_i32_2 : i32, i32, i32, i32
  }
  func.func @transform_5(%arg0: i32) -> (i32, i32, i32, i32) {
    %c0_i32 = arith.constant 0 : i32
    %c0_i32_0 = arith.constant 0 : i32
    %c0_i32_1 = arith.constant 0 : i32
    %c0_i32_2 = arith.constant 0 : i32
    %c0_i32_3 = arith.constant 0 : i32
    return %c0_i32, %c0_i32_0, %c0_i32_1, %c0_i32_2 : i32, i32, i32, i32
  }
  func.func @transform_6(%arg0: i32) -> (i32, i32, i32) {
    %c0_i32 = arith.constant 0 : i32
    %c0_i32_0 = arith.constant 0 : i32
    %c0_i32_1 = arith.constant 0 : i32
    %c0_i32_2 = arith.constant 0 : i32
    return %c0_i32, %c0_i32_0, %c0_i32_1 : i32, i32, i32
  }
  func.func @transform_7(%arg0: i32) -> (i32, i32) {
    %c0_i32 = arith.constant 0 : i32
    %c0_i32_0 = arith.constant 0 : i32
    %c0_i32_1 = arith.constant 0 : i32
    return %c0_i32, %c0_i32_0 : i32, i32
  }
  func.func @transform_8(%arg0: i32) -> (i32, i32) {
    %c0_i32 = arith.constant 0 : i32
    %c0_i32_0 = arith.constant 0 : i32
    %c0_i32_1 = arith.constant 0 : i32
    return %c0_i32, %c0_i32_0 : i32, i32
  }
  func.func @transform_9(%arg0: i32) -> (i32, i32, i32, i32) {
    %c0_i32 = arith.constant 0 : i32
    %c0_i32_0 = arith.constant 0 : i32
    %c0_i32_1 = arith.constant 0 : i32
    %c0_i32_2 = arith.constant 0 : i32
    %c0_i32_3 = arith.constant 0 : i32
    return %c0_i32, %c0_i32_0, %c0_i32_1, %c0_i32_2 : i32, i32, i32, i32
  }
  func.func @transform_10(%arg0: i32) -> (i32, i32, i32, i32) {
    %c0_i32 = arith.constant 0 : i32
    %c0_i32_0 = arith.constant 0 : i32
    %c0_i32_1 = arith.constant 0 : i32
    %c0_i32_2 = arith.constant 0 : i32
    %c0_i32_3 = arith.constant 0 : i32
    return %c0_i32, %c0_i32_0, %c0_i32_1, %c0_i32_2 : i32, i32, i32, i32
  }
  func.func @transform_11(%arg0: i32) -> (i32, i32, i32) {
    %c0_i32 = arith.constant 0 : i32
    %c0_i32_0 = arith.constant 0 : i32
    %c0_i32_1 = arith.constant 0 : i32
    %c0_i32_2 = arith.constant 0 : i32
    return %c0_i32, %c0_i32_0, %c0_i32_1 : i32, i32, i32
  }
  func.func @transform_12(%arg0: i32) -> (i32, i32) {
    %c0_i32 = arith.constant 0 : i32
    %c0_i32_0 = arith.constant 0 : i32
    %c0_i32_1 = arith.constant 0 : i32
    return %c0_i32, %c0_i32_0 : i32, i32
  }
  func.func @transform_13(%arg0: i32) -> (i32, i32) {
    %c0_i32 = arith.constant 0 : i32
    %c0_i32_0 = arith.constant 0 : i32
    %c0_i32_1 = arith.constant 0 : i32
    return %c0_i32, %c0_i32_0 : i32, i32
  }
  func.func @transform_14(%arg0: i32) -> (i32, i32) {
    %c0_i32 = arith.constant 0 : i32
    %c0_i32_0 = arith.constant 0 : i32
    %c0_i32_1 = arith.constant 0 : i32
    return %c0_i32, %c0_i32_0 : i32, i32
  }
}

</mosaic_0001>

<bundles_post_ra>
// kernel: threats_nn_forward.1
= control target key start
LH: loop header
LB: loop body
LE: loop exit
PB: predicated region body
PF: predicated region fallthrough
CT: control target
= control target key end

     0   :  { %vm54_vm0 = vcmask 130048   ;;  %s8707_s0 = inlined_call_operand.vmem [shape: f32[16,16], index: 0, kind: input, shape index: {}]   ;;  %s8708_s1 = inlined_call_operand.vmem [shape: f32[16,32], index: 1, kind: input, shape index: {}]   ;;  %s8709_s2 = inlined_call_operand.vmem [shape: f32[16,32], index: 2, kind: input, shape index: {}]   ;;  %s8710_s3 = inlined_call_operand.vmem [shape: f32[14,128], index: 3, kind: input, shape index: {}]   ;;  %s8711_s4 = inlined_call_operand.vmem [shape: f32[3,4,32,8], index: 4, kind: input, shape index: {}]   ;;  %s8712_s5 = inlined_call_operand.vmem [shape: f32[3,4,1,8], index: 5, kind: input, shape index: {}]   ;;  %s8713_s6 = inlined_call_operand.vmem [shape: f32[4,8,32], index: 6, kind: input, shape index: {}]   ;;  %s8714_s7 = inlined_call_operand.vmem [shape: f32[32,64], index: 7, kind: input, shape index: {}]   ;;  %s8715_s8 = inlined_call_operand.vmem [shape: f32[64,64], index: 8, kind: input, shape index: {}]   ;;  %s8716_s9 = inlined_call_operand.vmem [shape: f32[3,4,64,16], index: 9, kind: input, shape index: {}]   ;;  %s8717_s10 = inlined_call_operand.vmem [shape: f32[3,4,1,16], index: 10, kind: input, shape index: {}]   ;;  %s8718_s11 = inlined_call_operand.vmem [shape: f32[4,16,64], index: 11, kind: input, shape index: {}]   ;;  %s8719_s12 = inlined_call_operand.vmem [shape: f32[64,64], index: 12, kind: input, shape index: {}]   ;;  %s8720_s13 = inlined_call_operand.vmem [shape: f32[64,64], index: 13, kind: input, shape index: {}]   ;;  %s8721_s14 = inlined_call_operand.hbm [shape: f32[16,64], index: 14, kind: output, shape index: {}]  }
   0x1   :  { %v51_v0 = vld [vmem:[%s8709_s2 + $0x8] sm:$0xff]  ;;  %v50_v1 = vld [vmem:[%s8709_s2] sm:$0xff]  ;;  %v151_v4 = vld [vmem:[%s8711_s4 + $0x18] sm:$0xff] }
   0x2   :  { %v48_v2 = vld [vmem:[%s8707_s0] sm:$0xff]  ;;  %6802 = vmatprep.subr.mxu0 %v51_v0  ;;  %v49_v3 = vld [vmem:[%s8707_s0 + $0x8] sm:$0xff]  ;;  %6809 = vmatprep.subr.mxu1 %v151_v4  ;;  %v6164_v5 = vld [vmem:[%s8711_s4 + $0x98] sm:$0xff] }
   0x3   :  { %6806 = vmatprep.mubr.msk.f32.mxu0 %vm54_vm0, %v48_v2  ;;  %6803 = vmatpush3.msra.mxu0 %v51_v0  ;;  %v150_v6 = vld [vmem:[%s8711_s4 + $0x10] sm:$0xff] }
   0x4   :  { %19 = vsyncpa [#allocation3], 0  ;;  %6804 = vmatprep.subr.mxu0 %v50_v1  ;;  %6810 = vmatpush3.msra.mxu1 %v151_v4  ;;  %v6163_v7 = vld [vmem:[%s8711_s4 + $0x90] sm:$0xff]  ;;  %v149_v8 = vld [vmem:[%s8711_s4 + $0x8] sm:$0xff]  ;;  %vm159_vm1 = vcmask 261120   ;;  %v7552_v22 = vmov 0.0  }
   0x5   :  { %6805 = vmatpush3.msra.mxu0 %v50_v1  ;;  %6811 = vmatprep.subr.mxu1 %v150_v6  ;;  %v6162_v9 = vld [vmem:[%s8711_s4 + $0x88] sm:$0xff]  ;;  %v148_v10 = vld [vmem:[%s8711_s4] sm:$0xff]  ;;  %v6172_v12 = vld [vmem:[%s8711_s4 + $0x118] sm:$0xff]  ;;  %vm7553_vm2 = vmmov 0   ;;  %vm417_vm3 = vcmask 64512   ;;  %vm2985_vm4 = vcmask 523264  }
   0x6   :  { %6807 = vmatmul.mubr.msk.f32.vlgmr.msra.gmra.mxu0 %vm54_vm0, %v49_v3  ;;  %6820 = vmatprep.subr.mxu0 %v6164_v5  ;;  %v6161_v11 = vld [vmem:[%s8711_s4 + $0x80] sm:$0xff]  ;;  %v53_v15 = vld [vmem:[%s8708_s1 + $0x8] sm:$0xff]  ;;  %v6171_v19 = vld [vmem:[%s8711_s4 + $0x110] sm:$0xff]  ;;  %s7554_s17 = smov [#allocation2]  }
   0x7   :  { %6821 = vmatpush3.msra.mxu0 %v6164_v5  ;;  %6812 = vmatpush3.msra.mxu1 %v150_v6  ;;  %v52_v14 = vld [vmem:[%s8708_s1] sm:$0xff]  ;;  %v6170_v20 = vld [vmem:[%s8711_s4 + $0x108] sm:$0xff]  ;;  %v6188_v56 = vld [vmem:[%s8711_s4 + $0x38] sm:$0xff]  ;;  %s6144_s18 = sshll.u32 %s7554_s17, 4  ;;  %s6145_s18 = int_to_ptr.vmem [resolvable:$true] %s6144_s18 }
   0x8   :  { %6822 = vmatprep.subr.mxu0 %v6163_v7  ;;  %6813 = vmatprep.subr.mxu1 %v149_v8  ;;  %v6169_v21 = vld [vmem:[%s8711_s4 + $0x100] sm:$0xff]  ;;  %v6174_v33 = vld [vmem:[%s8712_s5 + $0x8] ss:$0 sm:$0xff]  ;;  %v6187_v63 = vld [vmem:[%s8711_s4 + $0x30] sm:$0xff]  ;;  %s7530_s19 = scalar_lea.vmem %s6145_s18, 256  ;;  %p7535_p1 = scmp.lt.s32.totalorder %s6145_s18, %s6145_s18 }
   0x9   :  { %6823 = vmatpush3.msra.mxu0 %v6163_v7  ;;  %6814 = vmatpush3.msra.mxu1 %v149_v8  ;;  %v6166_v25 = vld [vmem:[%s8712_s5 + $0x4] ss:$0 sm:$0xff]  ;;  %v6158_v29 = vld [vmem:[%s8712_s5] ss:$0 sm:$0xff]  ;;  %v6186_v0 = vld [vmem:[%s8711_s4 + $0x28] sm:$0xff]  ;;  %p7531_p0 = scmp.ne.s32.totalorder %s6145_s18, %s7530_s19  ;;  %p7536_p2 = scmp.lt.s32.totalorder %s7530_s19, %s7530_s19 }
   0xa   :  { %6824 = vmatprep.subr.mxu0 %v6162_v9  ;;  %6815 = vmatprep.subr.mxu1 %v148_v10  ;;  %v6185_v1 = vld [vmem:[%s8711_s4 + $0x20] sm:$0xff]  ;;  %v6204_v2 = vld [vmem:[%s8711_s4 + $0x138] sm:$0xff]  ;;  %v6203_v3 = vld [vmem:[%s8711_s4 + $0x130] sm:$0xff] }
   0xb   :  { %6825 = vmatpush3.msra.mxu0 %v6162_v9  ;;  %6816 = vmatpush3.msra.mxu1 %v148_v10  ;;  %v6202_v4 = vld [vmem:[%s8711_s4 + $0x128] sm:$0xff]  ;;  %v6201_v5 = vld [vmem:[%s8711_s4 + $0x120] sm:$0xff]  ;;  %v6196_v7 = vld [vmem:[%s8711_s4 + $0xb8] sm:$0xff]  ;;  %p7537_p3 = por %p7536_p2, %p7535_p1 }
   0xc   :  { %6826 = vmatprep.subr.mxu0 %v6161_v11  ;;  %6831 = vmatprep.subr.mxu1 %v6172_v12  ;;  %v740_v6 = vld [vmem:[%s8713_s6] sm:$0xff] }
   0xd   :  { %6827 = vmatpush3.msra.mxu0 %v6161_v11  ;;  %v6195_v11 = vld [vmem:[%s8711_s4 + $0xb0] sm:$0xff]  ;;  %p7538_p4 = pnand %p7537_p3, %p7531_p0 }
   0xe   :  { %6842 = vmatprep.subr.mxu0 %v7552_v22 }
  0xc6   :  { %v6808_v13 = vpop.f32.mrf.mxu0 }
  0xc7   :  { %v7681_v18 = vadd.f32 %v6808_v13, %v53_v15  ;;  %v6194_v13 = vld [vmem:[%s8711_s4 + $0xa8] sm:$0xff] }
  0xc8   :  { %v127_v16 = vpop.f32.mrf.mxu0 }
  0xc9   :  { %v7679_v17 = vadd.f32 %v127_v16, %v52_v14  ;;  %v6193_v14 = vld [vmem:[%s8711_s4 + $0xa0] sm:$0xff] }
  0xcb   :  { %6817 = vmatprep.mubr.msk.f32.mxu1 %vm159_vm1, %v7679_v17  ;;  %6828 = vmatprep.mubr.msk.f32.mxu0 %vm159_vm1, %v7679_v17 }
  0xcc   :  { %6818 = vmatmul.mubr.msk.f32.vlgmr.msra.gmra.mxu1 %vm159_vm1, %v7681_v18  ;;  %6829 = vmatmul.mubr.msk.f32.vlgmr.msra.gmra.mxu0 %vm159_vm1, %v7681_v18 }
  0xcd   :  { %6832 = vmatpush3.msra.mxu1 %v6172_v12  ;;  %6839 = vmatprep.mubr.msk.f32.mxu1 %vm159_vm1, %v7679_v17 }
  0xce   :  { %6833 = vmatprep.subr.mxu1 %v6171_v19  ;;  %6844 = vmatprep.mubr.msk.f32.mxu0 %vm7553_vm2, %v7552_v22 }
  0xcf   :  { %6834 = vmatpush3.msra.mxu1 %v6171_v19  ;;  %v6206_v19 = vld [vmem:[%s8712_s5 + $0x9] ss:$0 sm:$0xff] }
  0xd0   :  { %6835 = vmatprep.subr.mxu1 %v6170_v20 }
  0xd1   :  { %6836 = vmatpush3.msra.mxu1 %v6170_v20 }
  0xd2   :  { %6837 = vmatprep.subr.mxu1 %v6169_v21 }
  0xd3   :  { %6838 = vmatpush3.msra.mxu1 %v6169_v21 }
  0xd4   :  { %6840 = vmatmul.mubr.msk.f32.vlgmr.msra.gmra.mxu1 %vm159_vm1, %v7681_v18  ;;  %6852 = vmatprep.subr.mxu1 %v7552_v22 }
  0xd5   :  { %6854 = vmatprep.mubr.msk.f32.mxu1 %vm7553_vm2, %v7552_v22 }
 0x18c   :  { %v6819_v23 = vpop.f32.mrf.mxu1  ;;  %v6830_v24 = vpop.f32.mrf.mxu0 }
 0x18d   :  { %v326_v31 = vadd.f32 %v6830_v24, %v6166_v25  ;;  %v238_v34 = vadd.f32 %v6819_v23, %v6158_v29 }
 0x18e   :  { %v320_v26 = vpop.f32.mrf.mxu0  ;;  %v232_v27 = vpop.f32.mrf.mxu1 }
 0x18f   :  { %v321_v28 = vadd.f32 %v6166_v25, %v320_v26  ;;  %v233_v30 = vadd.f32 %v6158_v29, %v232_v27 }
 0x191   :  { %6843 = vmatpush3.xpose.msk.msra.mxu0 %vm417_vm3, %v321_v28  ;;  %v6198_v28 = vld [vmem:[%s8712_s5 + $0x5] ss:$0 sm:$0xff] }
 0x192   :  { %6847 = vmatprep.subr.mxu0 %v7552_v22 }
 0x194   :  { %v6841_v32 = vpop.f32.mrf.mxu1  ;;  %6845 = vmatmul.mubr.msk.f32.vlgmr.msra.gmra.mxu0 %vm417_vm3, %v233_v30 }
 0x195   :  { %6848 = vmatpush3.xpose.msk.msra.mxu0 %vm417_vm3, %v326_v31  ;;  %6849 = vmatprep.mubr.msk.f32.mxu0 %vm7553_vm2, %v7552_v22  ;;  %v414_v36 = vadd.f32 %v6841_v32, %v6174_v33  ;;  %v6190_v31 = vld [vmem:[%s8712_s5 + $0x1] ss:$0 sm:$0xff] }
 0x196   :  { %v408_v35 = vpop.f32.mrf.mxu1  ;;  %6857 = vmatprep.subr.mxu0 %v7552_v22 }
 0x197   :  { %v409_v37 = vadd.f32 %v6174_v33, %v408_v35 }
 0x198   :  { %6850 = vmatmul.mubr.msk.f32.vlgmr.msra.gmra.mxu0 %vm417_vm3, %v238_v34 }
 0x199   :  { %6853 = vmatpush3.msra.mxu1 %v409_v37  ;;  %6858 = vmatpush3.msra.mxu0 %v414_v36 }
 0x19a   :  { %6859 = vmatprep.mubr.msk.f32.mxu0 %vm7553_vm2, %v7552_v22  ;;  %6867 = vmatprep.subr.mxu0 %v6188_v56 }
 0x19b   :  { %6862 = vmatprep.subr.mxu1 %v740_v6 }
 0x254   :  { %v490_v38 = vpop.f32.mrf.mxu0 }
 0x255   :  { %v570_v39 = vmul.f32 0.35355338, %v490_v38 }
 0x256   :  { %v6846_v40 = vpop.f32.mrf.mxu0 }
 0x257   :  { %v572_v41 = vsel %vm417_vm3, %v570_v39, -inf }
 0x258   :  { %573 = vmax.xlane.f32.xlu0 %v572_v41  ;;  %v566_v42 = vpop.f32.mrf.mxu0 }
 0x259   :  { %v571_v43 = vmul.f32 0.35355338, %v566_v42 }
 0x25a   :  { %v6851_v44 = vpop.f32.mrf.mxu0 }
 0x25b   :  { %v575_v45 = vsel %vm417_vm3, %v571_v43, -inf }
 0x25c   :  { %576 = vmax.xlane.f32.xlu0 %v575_v45 }
 0x2e1   :  { %v574_v46 = vpop.xlane.xlu0 %573 }
 0x2e2   :  { %v578_v47 = vsub.f32 %v570_v39, %v574_v46 }
 0x2e4   :  { %v580_v48 = vmul.f32 1.442695, %v578_v47 }
 0x2e5   :  { %v577_v49 = vpop.xlane.xlu0 %576 }
 0x2e6   :  { %7450 = vpow2.f32 %v580_v48  ;;  %v579_v50 = vsub.f32 %v571_v43, %v577_v49 }
 0x2e8   :  { %v582_v51 = vmul.f32 1.442695, %v579_v50 }
 0x2ea   :  { %7452 = vpow2.f32 %v582_v51 }
 0x2f3   :  { %v7451_v52 = vpop.eup %7450 }
 0x2f4   :  { %v584_v53 = vsel %vm417_vm3, %v7451_v52, 0.0 }
 0x2f5   :  { %585 = vadd.xlane.f32.xlu1 %v584_v53  ;;  %v6221_v53 = vld [vmem:[%s8711_s4 + $0x58] sm:$0xff] }
 0x2f7   :  { %v7453_v54 = vpop.eup %7452 }
 0x2f8   :  { %v587_v55 = vsel %vm417_vm3, %v7453_v54, 0.0 }
 0x2f9   :  { %588 = vadd.xlane.f32.xlu1 %v587_v55 }
 0x37e   :  { %v586_v57 = vpop.xlane.xlu1 %585 }
 0x37f   :  { %7454 = vrcp.f32 %v586_v57 }
 0x382   :  { %v589_v58 = vpop.xlane.xlu1 %588 }
 0x383   :  { %7456 = vrcp.f32 %v589_v58 }
 0x38c   :  { %v7455_v59 = vpop.eup %7454 }
 0x38d   :  { %v592_v60 = vmul.f32 %v7455_v59, %v7451_v52 }
 0x38f   :  { %6855 = vmatmul.mubr.msk.f32.vlgmr.msra.gmra.mxu1 %vm417_vm3, %v592_v60  ;;  %v6220_v60 = vld [vmem:[%s8711_s4 + $0x50] sm:$0xff] }
 0x390   :  { %v7457_v61 = vpop.eup %7456  ;;  %6863 = vmatpush3.msra.mxu1 %v740_v6 }
 0x391   :  { %v593_v62 = vmul.f32 %v7457_v61, %v7453_v54  ;;  %6878 = vmatprep.subr.mxu1 %v6196_v7  ;;  %v6219_v61 = vld [vmem:[%s8711_s4 + $0x48] sm:$0xff] }
 0x393   :  { %6860 = vmatmul.mubr.msk.f32.vlgmr.msra.gmra.mxu0 %vm417_vm3, %v593_v62  ;;  %v6218_v62 = vld [vmem:[%s8711_s4 + $0x40] sm:$0xff] }
 0x394   :  { %6868 = vmatpush3.msra.mxu0 %v6188_v56  ;;  %6875 = vmatprep.mubr.msk.f32.mxu0 %vm159_vm1, %v7679_v17 }
 0x395   :  { %6869 = vmatprep.subr.mxu0 %v6187_v63 }
 0x396   :  { %6870 = vmatpush3.msra.mxu0 %v6187_v63  ;;  %v6237_v63 = vld [vmem:[%s8711_s4 + $0x158] sm:$0xff] }
 0x397   :  { %6871 = vmatprep.subr.mxu0 %v6186_v0 }
 0x398   :  { %6872 = vmatpush3.msra.mxu0 %v6186_v0  ;;  %v6236_v0 = vld [vmem:[%s8711_s4 + $0x150] sm:$0xff] }
 0x399   :  { %6873 = vmatprep.subr.mxu0 %v6185_v1 }
 0x39a   :  { %6874 = vmatpush3.msra.mxu0 %v6185_v1  ;;  %v6235_v1 = vld [vmem:[%s8711_s4 + $0x148] sm:$0xff] }
 0x39b   :  { %6876 = vmatmul.mubr.msk.f32.vlgmr.msra.gmra.mxu0 %vm159_vm1, %v7681_v18  ;;  %6889 = vmatprep.subr.mxu0 %v6204_v2 }
 0x39c   :  { %6890 = vmatpush3.msra.mxu0 %v6204_v2  ;;  %6897 = vmatprep.mubr.msk.f32.mxu0 %vm159_vm1, %v7679_v17  ;;  %v6234_v2 = vld [vmem:[%s8711_s4 + $0x140] sm:$0xff] }
 0x39d   :  { %6891 = vmatprep.subr.mxu0 %v6203_v3 }
 0x39e   :  { %6892 = vmatpush3.msra.mxu0 %v6203_v3  ;;  %v6215_v3 = vld [vmem:[%s8713_s6 + $0x8] sm:$0xff] }
 0x39f   :  { %6893 = vmatprep.subr.mxu0 %v6202_v4 }
 0x3a0   :  { %6894 = vmatpush3.msra.mxu0 %v6202_v4  ;;  %v6229_v4 = vld [vmem:[%s8711_s4 + $0xd8] sm:$0xff] }
 0x3a1   :  { %6895 = vmatprep.subr.mxu0 %v6201_v5 }
 0x3a2   :  { %6896 = vmatpush3.msra.mxu0 %v6201_v5 }
 0x3a3   :  { %6898 = vmatmul.mubr.msk.f32.vlgmr.msra.gmra.mxu0 %vm159_vm1, %v7681_v18  ;;  %6910 = vmatprep.subr.mxu0 %v7552_v22 }
 0x3a4   :  { %6912 = vmatprep.mubr.msk.f32.mxu0 %vm7553_vm2, %v7552_v22 }
 0x44f   :  { %v663_v8 = vpop.f32.mrf.mxu1 }
 0x450   :  { %6864 = vmatprep.mubr.msk.f32.mxu1 %vm417_vm3, %v663_v8  ;;  %v6228_v8 = vld [vmem:[%s8711_s4 + $0xd0] sm:$0xff] }
 0x451   :  { %v6856_v9 = vpop.f32.mrf.mxu1 }
 0x453   :  { %v736_v10 = vpop.f32.mrf.mxu0 }
 0x454   :  { %6865 = vmatmul.mubr.msk.f32.vlgmr.msra.gmra.mxu1 %vm417_vm3, %v736_v10  ;;  %v6227_v10 = vld [vmem:[%s8711_s4 + $0xc8] sm:$0xff] }
 0x455   :  { %6879 = vmatpush3.msra.mxu1 %v6196_v7  ;;  %v6861_v12 = vpop.f32.mrf.mxu0  ;;  %6886 = vmatprep.mubr.msk.f32.mxu1 %vm159_vm1, %v7679_v17 }
 0x456   :  { %6880 = vmatprep.subr.mxu1 %v6195_v11 }
 0x457   :  { %6881 = vmatpush3.msra.mxu1 %v6195_v11  ;;  %v6226_v11 = vld [vmem:[%s8711_s4 + $0xc0] sm:$0xff] }
 0x458   :  { %6882 = vmatprep.subr.mxu1 %v6194_v13 }
 0x459   :  { %6883 = vmatpush3.msra.mxu1 %v6194_v13 }
 0x45a   :  { %6884 = vmatprep.subr.mxu1 %v6193_v14 }
 0x45b   :  { %6885 = vmatpush3.msra.mxu1 %v6193_v14  ;;  %v6877_v15 = vpop.f32.mrf.mxu0  ;;  %v6239_v14 = vld [vmem:[%s8712_s5 + $0xa] ss:$0 sm:$0xff] }
 0x45c   :  { %6887 = vmatmul.mubr.msk.f32.vlgmr.msra.gmra.mxu1 %vm159_vm1, %v7681_v18  ;;  %6900 = vmatprep.subr.mxu1 %v7552_v22  ;;  %v909_v34 = vadd.f32 %v6877_v15, %v6190_v31 }
 0x45d   :  { %6902 = vmatprep.mubr.msk.f32.mxu1 %vm7553_vm2, %v7552_v22  ;;  %v903_v16 = vpop.f32.mrf.mxu0 }
 0x45e   :  { %v904_v32 = vadd.f32 %v6190_v31, %v903_v16 }
 0x463   :  { %v6899_v20 = vpop.f32.mrf.mxu0 }
 0x464   :  { %v1085_v21 = vadd.f32 %v6899_v20, %v6206_v19 }
 0x465   :  { %v1079_v23 = vpop.f32.mrf.mxu0 }
 0x466   :  { %v1080_v24 = vadd.f32 %v6206_v19, %v1079_v23 }
 0x468   :  { %6911 = vmatpush3.msra.mxu0 %v1080_v24 }
 0x469   :  { %6920 = vmatprep.subr.mxu0 %v6215_v3 }
 0x514   :  { %v7797_v25 = vpop.f32.mrf.mxu1 }
 0x516   :  { %v7799_v26 = vpop.f32.mrf.mxu1 }
 0x51c   :  { %v6888_v27 = vpop.f32.mrf.mxu1 }
 0x51d   :  { %v997_v33 = vadd.f32 %v6888_v27, %v6198_v28 }
 0x51e   :  { %v991_v29 = vpop.f32.mrf.mxu1 }
 0x51f   :  { %v992_v30 = vadd.f32 %v6198_v28, %v991_v29 }
 0x521   :  { %6901 = vmatpush3.xpose.msk.msra.mxu1 %vm417_vm3, %v992_v30 }
 0x522   :  { %6905 = vmatprep.subr.mxu1 %v7552_v22 }
 0x524   :  { %6903 = vmatmul.mubr.msk.f32.vlgmr.msra.gmra.mxu1 %vm417_vm3, %v904_v32  ;;  %v6231_v32 = vld [vmem:[%s8712_s5 + $0x6] ss:$0 sm:$0xff] }
 0x525   :  { %6906 = vmatpush3.xpose.msk.msra.mxu1 %vm417_vm3, %v997_v33  ;;  %6907 = vmatprep.mubr.msk.f32.mxu1 %vm7553_vm2, %v7552_v22 }
 0x526   :  { %6915 = vmatprep.subr.mxu1 %v7552_v22 }
 0x528   :  { %6908 = vmatmul.mubr.msk.f32.vlgmr.msra.gmra.mxu1 %vm417_vm3, %v909_v34 }
 0x529   :  { %6916 = vmatpush3.msra.mxu1 %v1085_v21  ;;  %6917 = vmatprep.mubr.msk.f32.mxu1 %vm7553_vm2, %v7552_v22  ;;  %v6157_v21 = vld [vmem:[%s8710_s3] ss:$0 sm:$0xff] }
 0x52a   :  { %6925 = vmatprep.subr.mxu1 %v6221_v53  ;;  %v823_v23 = vadd.f32 %v7797_v25, %v6157_v21  ;;  %v822_v27 = vadd.f32 %v6157_v21, %v7799_v26 }
 0x5e4   :  { %v1160_v35 = vpop.f32.mrf.mxu1 }
 0x5e5   :  { %v1240_v36 = vmul.f32 0.35355338, %v1160_v35  ;;  %v6223_v35 = vld [vmem:[%s8712_s5 + $0x2] ss:$0 sm:$0xff] }
 0x5e6   :  { %v6904_v37 = vpop.f32.mrf.mxu1 }
 0x5e7   :  { %v1242_v38 = vsel %vm417_vm3, %v1240_v36, -inf }
 0x5e8   :  { %1243 = vmax.xlane.f32.xlu0 %v1242_v38  ;;  %v1236_v39 = vpop.f32.mrf.mxu1 }
 0x5e9   :  { %v1241_v40 = vmul.f32 0.35355338, %v1236_v39 }
 0x5ea   :  { %v6909_v41 = vpop.f32.mrf.mxu1 }
 0x5eb   :  { %v1245_v42 = vsel %vm417_vm3, %v1241_v40, -inf }
 0x5ec   :  { %1246 = vmax.xlane.f32.xlu1 %v1245_v42 }
 0x671   :  { %v1244_v43 = vpop.xlane.xlu0 %1243 }
 0x672   :  { %v1248_v44 = vsub.f32 %v1240_v36, %v1244_v43 }
 0x674   :  { %v1250_v45 = vmul.f32 1.442695, %v1248_v44 }
 0x675   :  { %v1247_v46 = vpop.xlane.xlu1 %1246 }
 0x676   :  { %7458 = vpow2.f32 %v1250_v45  ;;  %v1249_v47 = vsub.f32 %v1241_v40, %v1247_v46 }
 0x678   :  { %v1252_v48 = vmul.f32 1.442695, %v1249_v47 }
 0x67a   :  { %7460 = vpow2.f32 %v1252_v48 }
 0x683   :  { %v7459_v49 = vpop.eup %7458 }
 0x684   :  { %v1254_v50 = vsel %vm417_vm3, %v7459_v49, 0.0 }
 0x685   :  { %1255 = vadd.xlane.f32.xlu0 %v1254_v50 }
 0x687   :  { %v7461_v51 = vpop.eup %7460 }
 0x688   :  { %v1257_v52 = vsel %vm417_vm3, %v7461_v51, 0.0 }
 0x689   :  { %1258 = vadd.xlane.f32.xlu1 %v1257_v52 }
 0x70e   :  { %v1256_v54 = vpop.xlane.xlu0 %1255 }
 0x70f   :  { %7462 = vrcp.f32 %v1256_v54 }
 0x712   :  { %v1259_v55 = vpop.xlane.xlu1 %1258 }
 0x713   :  { %7464 = vrcp.f32 %v1259_v55  ;;  %v6254_v55 = vld [vmem:[%s8711_s4 + $0x78] sm:$0xff] }
 0x71c   :  { %v7463_v56 = vpop.eup %7462 }
 0x71d   :  { %v1262_v57 = vmul.f32 %v7463_v56, %v7459_v49 }
 0x71f   :  { %6913 = vmatmul.mubr.msk.f32.vlgmr.msra.gmra.mxu0 %vm417_vm3, %v1262_v57 }
 0x720   :  { %v7465_v58 = vpop.eup %7464  ;;  %6921 = vmatpush3.msra.mxu0 %v6215_v3  ;;  %v6268_v3 = vld [vmem:[%s8711_s4 + $0x168] sm:$0xff] }
 0x721   :  { %v1263_v59 = vmul.f32 %v7465_v58, %v7461_v51  ;;  %6936 = vmatprep.subr.mxu0 %v6229_v4 }
 0x723   :  { %6918 = vmatmul.mubr.msk.f32.vlgmr.msra.gmra.mxu1 %vm417_vm3, %v1263_v59 }
 0x724   :  { %6926 = vmatpush3.msra.mxu1 %v6221_v53  ;;  %6933 = vmatprep.mubr.msk.f32.mxu1 %vm159_vm1, %v7679_v17 }
 0x725   :  { %6927 = vmatprep.subr.mxu1 %v6220_v60 }
 0x726   :  { %6928 = vmatpush3.msra.mxu1 %v6220_v60 }
 0x727   :  { %6929 = vmatprep.subr.mxu1 %v6219_v61 }
 0x728   :  { %6930 = vmatpush3.msra.mxu1 %v6219_v61 }
 0x729   :  { %6931 = vmatprep.subr.mxu1 %v6218_v62 }
 0x72a   :  { %6932 = vmatpush3.msra.mxu1 %v6218_v62  ;;  %v6253_v62 = vld [vmem:[%s8711_s4 + $0x70] sm:$0xff] }
 0x72b   :  { %6934 = vmatmul.mubr.msk.f32.vlgmr.msra.gmra.mxu1 %vm159_vm1, %v7681_v18  ;;  %6947 = vmatprep.subr.mxu1 %v6237_v63 }
 0x72c   :  { %6948 = vmatpush3.msra.mxu1 %v6237_v63  ;;  %6955 = vmatprep.mubr.msk.f32.mxu1 %vm159_vm1, %v7679_v17  ;;  %v6252_v63 = vld [vmem:[%s8711_s4 + $0x68] sm:$0xff] }
 0x72d   :  { %6949 = vmatprep.subr.mxu1 %v6236_v0 }
 0x72e   :  { %6950 = vmatpush3.msra.mxu1 %v6236_v0  ;;  %v6251_v0 = vld [vmem:[%s8711_s4 + $0x60] sm:$0xff] }
 0x72f   :  { %6951 = vmatprep.subr.mxu1 %v6235_v1 }
 0x730   :  { %6952 = vmatpush3.msra.mxu1 %v6235_v1  ;;  %v6270_v1 = vld [vmem:[%s8711_s4 + $0x178] sm:$0xff] }
 0x731   :  { %6953 = vmatprep.subr.mxu1 %v6234_v2 }
 0x732   :  { %6954 = vmatpush3.msra.mxu1 %v6234_v2  ;;  %v6269_v2 = vld [vmem:[%s8711_s4 + $0x170] sm:$0xff] }
 0x733   :  { %6956 = vmatmul.mubr.msk.f32.vlgmr.msra.gmra.mxu1 %vm159_vm1, %v7681_v18  ;;  %6968 = vmatprep.subr.mxu1 %v7552_v22 }
 0x734   :  { %6970 = vmatprep.mubr.msk.f32.mxu1 %vm7553_vm2, %v7552_v22 }
 0x7df   :  { %v1333_v5 = vpop.f32.mrf.mxu0 }
 0x7e0   :  { %6922 = vmatprep.mubr.msk.f32.mxu0 %vm417_vm3, %v1333_v5  ;;  %v6248_v5 = vld [vmem:[%s8713_s6 + $0x10] sm:$0xff] }
 0x7e1   :  { %v6914_v6 = vpop.f32.mrf.mxu0 }
 0x7e2   :  { %v6262_v6 = vld [vmem:[%s8711_s4 + $0xf8] sm:$0xff] }
 0x7e3   :  { %v1406_v7 = vpop.f32.mrf.mxu1 }
 0x7e4   :  { %6923 = vmatmul.mubr.msk.f32.vlgmr.msra.gmra.mxu0 %vm417_vm3, %v1406_v7 }
 0x7e5   :  { %6937 = vmatpush3.msra.mxu0 %v6229_v4  ;;  %v6919_v9 = vpop.f32.mrf.mxu1  ;;  %6944 = vmatprep.mubr.msk.f32.mxu0 %vm159_vm1, %v7679_v17  ;;  %v6267_v4 = vld [vmem:[%s8711_s4 + $0x160] sm:$0xff] }
 0x7e6   :  { %6938 = vmatprep.subr.mxu0 %v6228_v8 }
 0x7e7   :  { %6939 = vmatpush3.msra.mxu0 %v6228_v8 }
 0x7e8   :  { %6940 = vmatprep.subr.mxu0 %v6227_v10 }
 0x7e9   :  { %6941 = vmatpush3.msra.mxu0 %v6227_v10  ;;  %v6261_v10 = vld [vmem:[%s8711_s4 + $0xf0] sm:$0xff] }
 0x7ea   :  { %6942 = vmatprep.subr.mxu0 %v6226_v11 }
 0x7eb   :  { %6943 = vmatpush3.msra.mxu0 %v6226_v11  ;;  %v6935_v12 = vpop.f32.mrf.mxu1 }
 0x7ec   :  { %6945 = vmatmul.mubr.msk.f32.vlgmr.msra.gmra.mxu0 %vm159_vm1, %v7681_v18  ;;  %6958 = vmatprep.subr.mxu0 %v7552_v22  ;;  %v1580_v36 = vadd.f32 %v6935_v12, %v6223_v35  ;;  %v6260_v12 = vld [vmem:[%s8711_s4 + $0xe8] sm:$0xff] }
 0x7ed   :  { %6960 = vmatprep.mubr.msk.f32.mxu0 %vm7553_vm2, %v7552_v22  ;;  %v1574_v13 = vpop.f32.mrf.mxu1 }
 0x7ee   :  { %v1575_v25 = vadd.f32 %v6223_v35, %v1574_v13  ;;  %v6259_v13 = vld [vmem:[%s8711_s4 + $0xe0] sm:$0xff] }
 0x7f3   :  { %v6957_v15 = vpop.f32.mrf.mxu1 }
 0x7f4   :  { %v1756_v16 = vadd.f32 %v6957_v15, %v6239_v14 }
 0x7f5   :  { %v1750_v19 = vpop.f32.mrf.mxu1 }
 0x7f6   :  { %v1751_v20 = vadd.f32 %v6239_v14, %v1750_v19 }
 0x7f8   :  { %6969 = vmatpush3.msra.mxu1 %v1751_v20 }
 0x7f9   :  { %6978 = vmatprep.subr.mxu1 %v6248_v5 }
 0x8a4   :  { %v6924_v24 = vpop.f32.mrf.mxu0 }
 0x8a5   :  { %v7890_v28 = vadd.f32 %v6924_v24, %v823_v23 }
 0x8a6   :  { %v1484_v29 = vpop.f32.mrf.mxu0 }
 0x8a7   :  { %v7892_v30 = vadd.f32 %v1484_v29, %v822_v27 }
 0x8ac   :  { %v6946_v31 = vpop.f32.mrf.mxu0 }
 0x8ad   :  { %v1668_v26 = vadd.f32 %v6946_v31, %v6231_v32 }
 0x8ae   :  { %v1662_v33 = vpop.f32.mrf.mxu0 }
 0x8af   :  { %v1663_v34 = vadd.f32 %v6231_v32, %v1662_v33  ;;  %v6264_v33 = vld [vmem:[%s8712_s5 + $0x7] ss:$0 sm:$0xff] }
 0x8b1   :  { %6959 = vmatpush3.xpose.msk.msra.mxu0 %vm417_vm3, %v1663_v34 }
 0x8b2   :  { %6963 = vmatprep.subr.mxu0 %v7552_v22 }
 0x8b4   :  { %6961 = vmatmul.mubr.msk.f32.vlgmr.msra.gmra.mxu0 %vm417_vm3, %v1575_v25  ;;  %v6256_v25 = vld [vmem:[%s8712_s5 + $0x3] ss:$0 sm:$0xff] }
 0x8b5   :  { %6964 = vmatpush3.xpose.msk.msra.mxu0 %vm417_vm3, %v1668_v26  ;;  %6965 = vmatprep.mubr.msk.f32.mxu0 %vm7553_vm2, %v7552_v22 }
 0x8b6   :  { %6973 = vmatprep.subr.mxu0 %v7552_v22 }
 0x8b8   :  { %6966 = vmatmul.mubr.msk.f32.vlgmr.msra.gmra.mxu0 %vm417_vm3, %v1580_v36 }
 0x8b9   :  { %6974 = vmatpush3.msra.mxu0 %v1756_v16  ;;  %6975 = vmatprep.mubr.msk.f32.mxu0 %vm7553_vm2, %v7552_v22  ;;  %v6272_v16 = vld [vmem:[%s8712_s5 + $0xb] ss:$0 sm:$0xff] }
 0x8ba   :  { %6983 = vmatprep.subr.mxu0 %v6254_v55 }
 0x974   :  { %v1831_v37 = vpop.f32.mrf.mxu0 }
 0x975   :  { %v1911_v38 = vmul.f32 0.35355338, %v1831_v37 }
 0x976   :  { %v6962_v39 = vpop.f32.mrf.mxu0 }
 0x977   :  { %v1913_v40 = vsel %vm417_vm3, %v1911_v38, -inf }
 0x978   :  { %1914 = vmax.xlane.f32.xlu0 %v1913_v40  ;;  %v1907_v41 = vpop.f32.mrf.mxu0 }
 0x979   :  { %v1912_v42 = vmul.f32 0.35355338, %v1907_v41 }
 0x97a   :  { %v6967_v43 = vpop.f32.mrf.mxu0 }
 0x97b   :  { %v1916_v44 = vsel %vm417_vm3, %v1912_v42, -inf }
 0x97c   :  { %1917 = vmax.xlane.f32.xlu1 %v1916_v44 }
 0xa01   :  { %v1915_v45 = vpop.xlane.xlu0 %1914 }
 0xa02   :  { %v1919_v46 = vsub.f32 %v1911_v38, %v1915_v45 }
 0xa04   :  { %v1921_v47 = vmul.f32 1.442695, %v1919_v46 }
 0xa05   :  { %v1918_v48 = vpop.xlane.xlu1 %1917 }
 0xa06   :  { %7466 = vpow2.f32 %v1921_v47  ;;  %v1920_v49 = vsub.f32 %v1912_v42, %v1918_v48 }
 0xa08   :  { %v1923_v50 = vmul.f32 1.442695, %v1920_v49 }
 0xa0a   :  { %7468 = vpow2.f32 %v1923_v50 }
 0xa13   :  { %v7467_v51 = vpop.eup %7466 }
 0xa14   :  { %v1925_v52 = vsel %vm417_vm3, %v7467_v51, 0.0 }
 0xa15   :  { %1926 = vadd.xlane.f32.xlu0 %v1925_v52 }
 0xa17   :  { %v7469_v53 = vpop.eup %7468 }
 0xa18   :  { %v1928_v54 = vsel %vm417_vm3, %v7469_v53, 0.0 }
 0xa19   :  { %1929 = vadd.xlane.f32.xlu1 %v1928_v54 }
 0xa9e   :  { %v1927_v56 = vpop.xlane.xlu0 %1926 }
 0xa9f   :  { %7470 = vrcp.f32 %v1927_v56 }
 0xaa2   :  { %v1930_v57 = vpop.xlane.xlu1 %1929 }
 0xaa3   :  { %7472 = vrcp.f32 %v1930_v57 }
 0xaac   :  { %v7471_v58 = vpop.eup %7470 }
 0xaad   :  { %v1933_v59 = vmul.f32 %v7471_v58, %v7467_v51 }
 0xaaf   :  { %6971 = vmatmul.mubr.msk.f32.vlgmr.msra.gmra.mxu1 %vm417_vm3, %v1933_v59 }
 0xab0   :  { %v7473_v60 = vpop.eup %7472  ;;  %6979 = vmatpush3.msra.mxu1 %v6248_v5 }
 0xab1   :  { %v1934_v61 = vmul.f32 %v7473_v60, %v7469_v53  ;;  %6994 = vmatprep.subr.mxu1 %v6262_v6  ;;  %v6281_v60 = vld [vmem:[%s8713_s6 + $0x18] sm:$0xff] }
 0xab3   :  { %6976 = vmatmul.mubr.msk.f32.vlgmr.msra.gmra.mxu0 %vm417_vm3, %v1934_v61 }
 0xab4   :  { %6984 = vmatpush3.msra.mxu0 %v6254_v55  ;;  %6991 = vmatprep.mubr.msk.f32.mxu0 %vm159_vm1, %v7679_v17 }
 0xab5   :  { %6985 = vmatprep.subr.mxu0 %v6253_v62 }
 0xab6   :  { %6986 = vmatpush3.msra.mxu0 %v6253_v62 }
 0xab7   :  { %6987 = vmatprep.subr.mxu0 %v6252_v63 }
 0xab8   :  { %6988 = vmatpush3.msra.mxu0 %v6252_v63 }
 0xab9   :  { %6989 = vmatprep.subr.mxu0 %v6251_v0 }
 0xaba   :  { %6990 = vmatpush3.msra.mxu0 %v6251_v0 }
 0xabb   :  { %6992 = vmatmul.mubr.msk.f32.vlgmr.msra.gmra.mxu0 %vm159_vm1, %v7681_v18  ;;  %7005 = vmatprep.subr.mxu0 %v6270_v1 }
 0xabc   :  { %7006 = vmatpush3.msra.mxu0 %v6270_v1  ;;  %7013 = vmatprep.mubr.msk.f32.mxu0 %vm159_vm1, %v7679_v17 }
 0xabd   :  { %7007 = vmatprep.subr.mxu0 %v6269_v2 }
 0xabe   :  { %7008 = vmatpush3.msra.mxu0 %v6269_v2 }
 0xabf   :  { %7009 = vmatprep.subr.mxu0 %v6268_v3 }
 0xac0   :  { %7010 = vmatpush3.msra.mxu0 %v6268_v3 }
 0xac1   :  { %7011 = vmatprep.subr.mxu0 %v6267_v4 }
 0xac2   :  { %7012 = vmatpush3.msra.mxu0 %v6267_v4 }
 0xac3   :  { %7014 = vmatmul.mubr.msk.f32.vlgmr.msra.gmra.mxu0 %vm159_vm1, %v7681_v18  ;;  %7026 = vmatprep.subr.mxu0 %v7552_v22 }
 0xac4   :  { %7028 = vmatprep.mubr.msk.f32.mxu0 %vm7553_vm2, %v7552_v22 }
 0xb6f   :  { %v2004_v7 = vpop.f32.mrf.mxu1 }
 0xb70   :  { %6980 = vmatprep.mubr.msk.f32.mxu1 %vm417_vm3, %v2004_v7 }
 0xb71   :  { %v6972_v8 = vpop.f32.mrf.mxu1 }
 0xb73   :  { %v2077_v9 = vpop.f32.mrf.mxu0 }
 0xb74   :  { %6981 = vmatmul.mubr.msk.f32.vlgmr.msra.gmra.mxu1 %vm417_vm3, %v2077_v9 }
 0xb75   :  { %6995 = vmatpush3.msra.mxu1 %v6262_v6  ;;  %v6977_v11 = vpop.f32.mrf.mxu0  ;;  %7002 = vmatprep.mubr.msk.f32.mxu1 %vm159_vm1, %v7679_v17 }
 0xb76   :  { %6996 = vmatprep.subr.mxu1 %v6261_v10 }
 0xb77   :  { %6997 = vmatpush3.msra.mxu1 %v6261_v10 }
 0xb78   :  { %6998 = vmatprep.subr.mxu1 %v6260_v12 }
 0xb79   :  { %6999 = vmatpush3.msra.mxu1 %v6260_v12 }
 0xb7a   :  { %7000 = vmatprep.subr.mxu1 %v6259_v13 }
 0xb7b   :  { %7001 = vmatpush3.msra.mxu1 %v6259_v13  ;;  %v6993_v14 = vpop.f32.mrf.mxu0  ;;  %v2883_v13 = vld [vmem:[%s8714_s7 + $0x8] sm:$0xff] }
 0xb7c   :  { %7003 = vmatmul.mubr.msk.f32.vlgmr.msra.gmra.mxu1 %vm159_vm1, %v7681_v18  ;;  %7016 = vmatprep.subr.mxu1 %v7552_v22 }
 0xb7d   :  { %7018 = vmatprep.mubr.msk.f32.mxu1 %vm7553_vm2, %v7552_v22  ;;  %v2245_v15 = vpop.f32.mrf.mxu0 }
 0xb7e   :  { %v2246_v26 = vadd.f32 %v6256_v25, %v2245_v15  ;;  %v2980_v15 = vld [vmem:[%s8715_s8 + $0x38] sm:$0xff] }
 0xb83   :  { %v7015_v19 = vpop.f32.mrf.mxu0 }
 0xb84   :  { %v2427_v20 = vadd.f32 %v7015_v19, %v6272_v16  ;;  %v2978_v19 = vld [vmem:[%s8715_s8 + $0x28] sm:$0xff] }
 0xb85   :  { %v2421_v21 = vpop.f32.mrf.mxu0 }
 0xb86   :  { %v2422_v23 = vadd.f32 %v6272_v16, %v2421_v21  ;;  %v2979_v16 = vld [vmem:[%s8715_s8 + $0x30] sm:$0xff] }
 0xb88   :  { %7027 = vmatpush3.msra.mxu0 %v2422_v23 }
 0xb89   :  { %7036 = vmatprep.subr.mxu0 %v6281_v60 }
 0xc34   :  { %v6982_v24 = vpop.f32.mrf.mxu1 }
 0xc35   :  { %v7979_v27 = vadd.f32 %v6982_v24, %v7890_v28 }
 0xc36   :  { %v2155_v29 = vpop.f32.mrf.mxu1 }
 0xc37   :  { %v7982_v31 = vadd.f32 %v2155_v29, %v7892_v30  ;;  %v2251_v30 = vadd.f32 %v6993_v14, %v6256_v25  ;;  %v2882_v14 = vld [vmem:[%s8714_s7] sm:$0xff] }
 0xc3c   :  { %v7004_v32 = vpop.f32.mrf.mxu1 }
 0xc3d   :  { %v2339_v28 = vadd.f32 %v7004_v32, %v6264_v33 }
 0xc3e   :  { %v2333_v34 = vpop.f32.mrf.mxu1 }
 0xc3f   :  { %v2334_v35 = vadd.f32 %v6264_v33, %v2333_v34 }
 0xc41   :  { %7017 = vmatpush3.xpose.msk.msra.mxu1 %vm417_vm3, %v2334_v35 }
 0xc42   :  { %7021 = vmatprep.subr.mxu1 %v7552_v22 }
 0xc44   :  { %7019 = vmatmul.mubr.msk.f32.vlgmr.msra.gmra.mxu1 %vm417_vm3, %v2246_v26 }
 0xc45   :  { %7022 = vmatpush3.xpose.msk.msra.mxu1 %vm417_vm3, %v2339_v28  ;;  %7023 = vmatprep.mubr.msk.f32.mxu1 %vm7553_vm2, %v7552_v22 }
 0xc46   :  { %7031 = vmatprep.subr.mxu1 %v7552_v22 }
 0xc48   :  { %7024 = vmatmul.mubr.msk.f32.vlgmr.msra.gmra.mxu1 %vm417_vm3, %v2251_v30 }
 0xc49   :  { %7032 = vmatpush3.msra.mxu1 %v2427_v20  ;;  %7033 = vmatprep.mubr.msk.f32.mxu1 %vm7553_vm2, %v7552_v22  ;;  %v2977_v20 = vld [vmem:[%s8715_s8 + $0x20] sm:$0xff] }
 0xd04   :  { %v2502_v36 = vpop.f32.mrf.mxu1 }
 0xd05   :  { %v2582_v37 = vmul.f32 0.35355338, %v2502_v36 }
 0xd06   :  { %v7020_v38 = vpop.f32.mrf.mxu1 }
 0xd07   :  { %v2584_v39 = vsel %vm417_vm3, %v2582_v37, -inf }
 0xd08   :  { %2585 = vmax.xlane.f32.xlu0 %v2584_v39  ;;  %v2578_v40 = vpop.f32.mrf.mxu1  ;;  %v6284_v39 = vld [vmem:[%s8710_s3 + $0x1] ss:$0 sm:$0xff] }
 0xd09   :  { %v2583_v41 = vmul.f32 0.35355338, %v2578_v40 }
 0xd0a   :  { %v7025_v42 = vpop.f32.mrf.mxu1 }
 0xd0b   :  { %v2587_v43 = vsel %vm417_vm3, %v2583_v41, -inf }
 0xd0c   :  { %2588 = vmax.xlane.f32.xlu1 %v2587_v43 }
 0xd91   :  { %v2586_v44 = vpop.xlane.xlu0 %2585 }
 0xd92   :  { %v2590_v45 = vsub.f32 %v2582_v37, %v2586_v44  ;;  %v6285_v44 = vld [vmem:[%s8710_s3 + $0x2] ss:$0 sm:$0xff] }
 0xd94   :  { %v2592_v46 = vmul.f32 1.442695, %v2590_v45 }
 0xd95   :  { %v2589_v47 = vpop.xlane.xlu1 %2588 }
 0xd96   :  { %7474 = vpow2.f32 %v2592_v46  ;;  %v2591_v48 = vsub.f32 %v2583_v41, %v2589_v47 }
 0xd98   :  { %v2594_v49 = vmul.f32 1.442695, %v2591_v48  ;;  %v2976_v48 = vld [vmem:[%s8715_s8 + $0x18] sm:$0xff] }
 0xd9a   :  { %7476 = vpow2.f32 %v2594_v49  ;;  %v2975_v49 = vld [vmem:[%s8715_s8 + $0x10] sm:$0xff] }
 0xda3   :  { %v7475_v50 = vpop.eup %7474 }
 0xda4   :  { %v2596_v51 = vsel %vm417_vm3, %v7475_v50, 0.0 }
 0xda5   :  { %2597 = vadd.xlane.f32.xlu0 %v2596_v51  ;;  %v2973_v51 = vld [vmem:[%s8715_s8] sm:$0xff] }
 0xda7   :  { %v7477_v52 = vpop.eup %7476 }
 0xda8   :  { %v2599_v53 = vsel %vm417_vm3, %v7477_v52, 0.0 }
 0xda9   :  { %2600 = vadd.xlane.f32.xlu1 %v2599_v53 }
 0xe2e   :  { %v2598_v54 = vpop.xlane.xlu0 %2597 }
 0xe2f   :  { %7478 = vrcp.f32 %v2598_v54 }
 0xe32   :  { %v2601_v55 = vpop.xlane.xlu1 %2600 }
 0xe33   :  { %7480 = vrcp.f32 %v2601_v55 }
 0xe3c   :  { %v7479_v56 = vpop.eup %7478 }
 0xe3d   :  { %v2604_v57 = vmul.f32 %v7479_v56, %v7475_v50  ;;  %v2974_v50 = vld [vmem:[%s8715_s8 + $0x8] sm:$0xff] }
 0xe3f   :  { %7029 = vmatmul.mubr.msk.f32.vlgmr.msra.gmra.mxu0 %vm417_vm3, %v2604_v57 }
 0xe40   :  { %v7481_v58 = vpop.eup %7480  ;;  %7037 = vmatpush3.msra.mxu0 %v6281_v60 }
 0xe41   :  { %v2605_v59 = vmul.f32 %v7481_v58, %v7477_v52  ;;  %7052 = vmatprep.subr.mxu0 %v2980_v15  ;;  %v6286_v52 = vld [vmem:[%s8710_s3 + $0x3] ss:$0 sm:$0xff] }
 0xe43   :  { %7034 = vmatmul.mubr.msk.f32.vlgmr.msra.gmra.mxu1 %vm417_vm3, %v2605_v59  ;;  %v6289_v59 = vld [vmem:[%s8710_s3 + $0x4] ss:$0 sm:$0xff] }
 0xeff   :  { %v2675_v61 = vpop.f32.mrf.mxu0 }
 0xf00   :  { %7038 = vmatprep.mubr.msk.f32.mxu0 %vm417_vm3, %v2675_v61 }
 0xf01   :  { %v7030_v62 = vpop.f32.mrf.mxu0 }
 0xf03   :  { %v2748_v63 = vpop.f32.mrf.mxu1 }
 0xf04   :  { %7039 = vmatmul.mubr.msk.f32.vlgmr.msra.gmra.mxu0 %vm417_vm3, %v2748_v63 }
 0xf05   :  { %v7035_v0 = vpop.f32.mrf.mxu1  ;;  %7053 = vmatpush3.msra.mxu0 %v2980_v15  ;;  %v6300_v15 = vld [vmem:[%s8716_s9 + $0x110] sm:$0xff] }
 0xf06   :  { %7054 = vmatprep.subr.mxu0 %v2979_v16 }
 0xf07   :  { %7055 = vmatpush3.msra.mxu0 %v2979_v16  ;;  %v3123_v16 = vld [vmem:[%s8716_s9 + $0x8] sm:$0xff] }
 0xf08   :  { %7056 = vmatprep.subr.mxu0 %v2978_v19 }
 0xf09   :  { %7057 = vmatpush3.msra.mxu0 %v2978_v19  ;;  %v6299_v19 = vld [vmem:[%s8716_s9 + $0x108] sm:$0xff] }
 0xf0a   :  { %7058 = vmatprep.subr.mxu0 %v2977_v20 }
 0xf0b   :  { %7059 = vmatpush3.msra.mxu0 %v2977_v20  ;;  %v3122_v20 = vld [vmem:[%s8716_s9] sm:$0xff] }
 0xf0c   :  { %7060 = vmatprep.subr.mxu0 %v2976_v48 }
 0xf0d   :  { %7061 = vmatpush3.msra.mxu0 %v2976_v48 }
 0xf0e   :  { %7062 = vmatprep.subr.mxu0 %v2975_v49 }
 0xf0f   :  { %7063 = vmatpush3.msra.mxu0 %v2975_v49 }
 0xf10   :  { %7064 = vmatprep.subr.mxu0 %v2974_v50 }
 0xf11   :  { %7065 = vmatpush3.msra.mxu0 %v2974_v50  ;;  %v6316_v50 = vld [vmem:[%s8716_s9 + $0x230] sm:$0xff] }
 0xf12   :  { %7066 = vmatprep.subr.mxu0 %v2973_v51 }
 0xf13   :  { %7067 = vmatpush3.msra.mxu0 %v2973_v51  ;;  %v6315_v51 = vld [vmem:[%s8716_s9 + $0x228] sm:$0xff] }
 0xfc4   :  { %v7040_v1 = vpop.f32.mrf.mxu0 }
 0xfc5   :  { %v2836_v2 = vadd.f32 %v7040_v1, %v7979_v27 }
 0xfc6   :  { %v2826_v3 = vpop.f32.mrf.mxu0 }
 0xfc7   :  { %v2838_v4 = vadd.f32 %v2836_v2, %v7681_v18  ;;  %v2835_v5 = vadd.f32 %v2826_v3, %v7982_v31  ;;  %v2885_v18 = vld [vmem:[%s8714_s7 + $0x18] sm:$0xff] }
 0xfc8   :  { %7041 = vmatprep.subr.mxu1 %v2885_v18 }
 0xfc9   :  { %v2837_v6 = vadd.f32 %v2835_v5, %v7679_v17  ;;  %v2842_v7 = vsel %vm159_vm1, %v2838_v4, 0.0  ;;  %v2849_v8 = vmul.f32 %v2838_v4, %v2838_v4  ;;  %v2884_v17 = vld [vmem:[%s8714_s7 + $0x10] sm:$0xff]  ;;  %7042 = vmatpush3.msra.mxu1 %v2885_v18  ;;  %v6302_v18 = vld [vmem:[%s8716_s9 + $0x120] sm:$0xff] }
 0xfca   :  { %2843 = vadd.xlane.f32.xlu1 %v2842_v7  ;;  %7043 = vmatprep.subr.mxu1 %v2884_v17  ;;  %v6305_v7 = vld [vmem:[%s8716_s9 + $0x138] sm:$0xff] }
 0xfcb   :  { %v2839_v9 = vsel %vm159_vm1, %v2837_v6, 0.0  ;;  %v2848_v10 = vmul.f32 %v2837_v6, %v2837_v6  ;;  %v2853_v11 = vsel %vm159_vm1, %v2849_v8, 0.0  ;;  %7044 = vmatpush3.msra.mxu1 %v2884_v17  ;;  %7090 = vmatprep.subr.mxu0 %v6305_v7  ;;  %v3128_v8 = vld [vmem:[%s8716_s9 + $0x30] sm:$0xff]  ;;  %v3125_v17 = vld [vmem:[%s8716_s9 + $0x18] sm:$0xff] }
 0xfcc   :  { %2840 = vadd.xlane.f32.xlu0 %v2839_v9  ;;  %7045 = vmatprep.subr.mxu1 %v2883_v13  ;;  %v6304_v9 = vld [vmem:[%s8716_s9 + $0x130] sm:$0xff] }
 0xfcd   :  { %v2850_v12 = vsel %vm159_vm1, %v2848_v10, 0.0  ;;  %7046 = vmatpush3.msra.mxu1 %v2883_v13  ;;  %v3127_v10 = vld [vmem:[%s8716_s9 + $0x28] sm:$0xff]  ;;  %v6301_v13 = vld [vmem:[%s8716_s9 + $0x118] sm:$0xff] }
 0xfce   :  { %2854 = vadd.xlane.f32.xlu1 %v2853_v11  ;;  %7047 = vmatprep.subr.mxu1 %v2882_v14  ;;  %v6303_v11 = vld [vmem:[%s8716_s9 + $0x128] sm:$0xff] }
 0xfcf   :  { %7048 = vmatpush3.msra.mxu1 %v2882_v14  ;;  %v3124_v14 = vld [vmem:[%s8716_s9 + $0x10] sm:$0xff] }
 0xfd0   :  { %2851 = vadd.xlane.f32.xlu0 %v2850_v12  ;;  %v3126_v12 = vld [vmem:[%s8716_s9 + $0x20] sm:$0xff] }
0x1053   :  { %v2844_v21 = vpop.xlane.xlu1 %2843 }
0x1054   :  { %v2847_v23 = vmul.f32 0.03125, %v2844_v21  ;;  %v6298_v21 = vld [vmem:[%s8716_s9 + $0x100] sm:$0xff] }
0x1055   :  { %v2841_v24 = vpop.xlane.xlu0 %2840 }
0x1056   :  { %v2846_v27 = vmul.f32 0.03125, %v2841_v24  ;;  %v2859_v31 = vmul.f32 %v2847_v23, %v2847_v23  ;;  %v2863_v36 = vsub.f32 %v2838_v4, %v2847_v23  ;;  %v6317_v23 = vld [vmem:[%s8716_s9 + $0x238] sm:$0xff] }
0x1057   :  { %v2855_v29 = vpop.xlane.xlu1 %2854 }
0x1058   :  { %v2857_v32 = vmul.f32 0.03125, %v2855_v29  ;;  %v2858_v34 = vmul.f32 %v2846_v27, %v2846_v27  ;;  %v2862_v38 = vsub.f32 %v2837_v6, %v2846_v27  ;;  %v3129_v6 = vld [vmem:[%s8716_s9 + $0x38] sm:$0xff] }
0x1059   :  { %v2852_v33 = vpop.xlane.xlu0 %2851  ;;  %7071 = vmatprep.subr.mxu1 %v3129_v6 }
0x105a   :  { %v2861_v35 = vsub.f32 %v2857_v32, %v2859_v31  ;;  %v2856_v25 = vmul.f32 0.03125, %v2852_v33 }
0x105c   :  { %v2865_v26 = vadd.f32 1e-05, %v2861_v35  ;;  %v2860_v28 = vsub.f32 %v2856_v25, %v2858_v34 }
0x105e   :  { %7482 = vrsqrt.f32 %v2865_v26  ;;  %v2864_v30 = vadd.f32 1e-05, %v2860_v28 }
0x1060   :  { %7484 = vrsqrt.f32 %v2864_v30 }
0x106b   :  { %v7483_v37 = vpop.eup %7482 }
0x106c   :  { %v2869_v40 = vmul.f32 %v7483_v37, %v2863_v36 }
0x106d   :  { %v7485_v41 = vpop.eup %7484 }
0x106e   :  { %v2868_v42 = vmul.f32 %v7485_v41, %v2862_v38  ;;  %v2875_v43 = vmul.f32 %v6284_v39, %v2869_v40  ;;  %v6292_v41 = vld [vmem:[%s8710_s3 + $0x5] ss:$0 sm:$0xff] }
0x1070   :  { %v2874_v45 = vmul.f32 %v6284_v39, %v2868_v42  ;;  %v2881_v47 = vadd.f32 %v6285_v44, %v2875_v43 }
0x1072   :  { %v2880_v46 = vadd.f32 %v6285_v44, %v2874_v45 }
0x1074   :  { %7049 = vmatprep.mubr.msk.f32.mxu1 %vm159_vm1, %v2880_v46  ;;  %v6293_v46 = vld [vmem:[%s8710_s3 + $0x6] ss:$0 sm:$0xff] }
0x1075   :  { %7050 = vmatmul.mubr.msk.f32.vlgmr.msra.gmra.mxu1 %vm159_vm1, %v2881_v47 }
0x1076   :  { %7072 = vmatpush3.msra.mxu1 %v3129_v6 }
0x1077   :  { %7073 = vmatprep.subr.mxu1 %v3128_v8 }
0x1078   :  { %7074 = vmatpush3.msra.mxu1 %v3128_v8 }
0x1079   :  { %7075 = vmatprep.subr.mxu1 %v3127_v10 }
0x107a   :  { %7076 = vmatpush3.msra.mxu1 %v3127_v10 }
0x107b   :  { %7077 = vmatprep.subr.mxu1 %v3126_v12 }
0x107c   :  { %7078 = vmatpush3.msra.mxu1 %v3126_v12 }
0x107d   :  { %7079 = vmatprep.subr.mxu1 %v3125_v17 }
0x107e   :  { %7080 = vmatpush3.msra.mxu1 %v3125_v17 }
0x107f   :  { %7081 = vmatprep.subr.mxu1 %v3124_v14 }
0x1080   :  { %7082 = vmatpush3.msra.mxu1 %v3124_v14 }
0x1081   :  { %7083 = vmatprep.subr.mxu1 %v3123_v16 }
0x1082   :  { %7084 = vmatpush3.msra.mxu1 %v3123_v16 }
0x1083   :  { %7085 = vmatprep.subr.mxu1 %v3122_v20 }
0x1084   :  { %7086 = vmatpush3.msra.mxu1 %v3122_v20 }
0x1085   :  { %7109 = vmatprep.subr.mxu1 %v6317_v23 }
0x1135   :  { %v7051_v53 = vpop.f32.mrf.mxu1 }
0x1136   :  { %v2968_v54 = vadd.f32 %v7051_v53, %v6286_v52  ;;  %v6313_v53 = vld [vmem:[%s8716_s9 + $0x218] sm:$0xff] }
0x1137   :  { %v2962_v55 = vpop.f32.mrf.mxu1 }
0x1138   :  { %v2963_v56 = vadd.f32 %v6286_v52, %v2962_v55  ;;  %v2972_v58 = vmax.f32 %v2968_v54, 0.0  ;;  %v6314_v52 = vld [vmem:[%s8716_s9 + $0x220] sm:$0xff]  ;;  %v6312_v54 = vld [vmem:[%s8716_s9 + $0x210] sm:$0xff]  ;;  %v6311_v55 = vld [vmem:[%s8716_s9 + $0x208] sm:$0xff] }
0x113a   :  { %v2971_v57 = vmax.f32 %v2963_v56, 0.0  ;;  %v6310_v56 = vld [vmem:[%s8716_s9 + $0x200] sm:$0xff] }
0x113c   :  { %7068 = vmatprep.mubr.msk.f32.mxu0 %vm2985_vm4, %v2971_v57 }
0x113d   :  { %7069 = vmatmul.mubr.msk.f32.vlgmr.msra.gmra.mxu0 %vm2985_vm4, %v2972_v58 }
0x113e   :  { %7091 = vmatpush3.msra.mxu0 %v6305_v7 }
0x113f   :  { %7092 = vmatprep.subr.mxu0 %v6304_v9 }
0x1140   :  { %7093 = vmatpush3.msra.mxu0 %v6304_v9 }
0x1141   :  { %7094 = vmatprep.subr.mxu0 %v6303_v11 }
0x1142   :  { %7095 = vmatpush3.msra.mxu0 %v6303_v11 }
0x1143   :  { %7096 = vmatprep.subr.mxu0 %v6302_v18 }
0x1144   :  { %7097 = vmatpush3.msra.mxu0 %v6302_v18 }
0x1145   :  { %7098 = vmatprep.subr.mxu0 %v6301_v13 }
0x1146   :  { %7099 = vmatpush3.msra.mxu0 %v6301_v13 }
0x1147   :  { %7100 = vmatprep.subr.mxu0 %v6300_v15 }
0x1148   :  { %7101 = vmatpush3.msra.mxu0 %v6300_v15 }
0x1149   :  { %7102 = vmatprep.subr.mxu0 %v6299_v19 }
0x114a   :  { %7103 = vmatpush3.msra.mxu0 %v6299_v19 }
0x114b   :  { %7104 = vmatprep.subr.mxu0 %v6298_v21 }
0x114c   :  { %7105 = vmatpush3.msra.mxu0 %v6298_v21 }
0x114d   :  { %7128 = vmatprep.subr.mxu0 %v7552_v22 }
0x11fd   :  { %v7070_v60 = vpop.f32.mrf.mxu0 }
0x11fe   :  { %v8071_v61 = vadd.f32 %v7070_v60, %v6289_v59 }
0x11ff   :  { %v3058_v62 = vpop.f32.mrf.mxu0 }
0x1200   :  { %v8073_v63 = vadd.f32 %v6289_v59, %v3058_v62  ;;  %v3070_v0 = vsel %vm2985_vm4, %v8071_v61, 0.0  ;;  %v3077_v1 = vmul.f32 %v8071_v61, %v8071_v61  ;;  %v6307_v59 = vld [vmem:[%s8717_s10 + $0x4] ss:$0 sm:$0xff] }
0x1201   :  { %3071 = vadd.xlane.f32.xlu1 %v3070_v0 }
0x1202   :  { %v3067_v2 = vsel %vm2985_vm4, %v8073_v63, 0.0  ;;  %v3076_v3 = vmul.f32 %v8073_v63, %v8073_v63  ;;  %v3081_v4 = vsel %vm2985_vm4, %v3077_v1, 0.0 }
0x1203   :  { %3068 = vadd.xlane.f32.xlu0 %v3067_v2 }
0x1204   :  { %v3078_v5 = vsel %vm2985_vm4, %v3076_v3, 0.0  ;;  %v6319_v3 = vld [vmem:[%s8717_s10 + $0x8] ss:$0 sm:$0xff] }
0x1205   :  { %3082 = vadd.xlane.f32.xlu1 %v3081_v4 }
0x1207   :  { %3079 = vadd.xlane.f32.xlu0 %v3078_v5 }
0x128a   :  { %v3072_v24 = vpop.xlane.xlu1 %3071 }
0x128b   :  { %v3075_v27 = vmul.f32 0.015625, %v3072_v24 }
0x128c   :  { %v3069_v29 = vpop.xlane.xlu0 %3068 }
0x128d   :  { %v3074_v31 = vmul.f32 0.015625, %v3069_v29  ;;  %v3087_v33 = vmul.f32 %v3075_v27, %v3075_v27  ;;  %v3091_v38 = vsub.f32 %v8071_v61, %v3075_v27 }
0x128e   :  { %v3083_v32 = vpop.xlane.xlu1 %3082 }
0x128f   :  { %v3085_v34 = vmul.f32 0.015625, %v3083_v32  ;;  %v3086_v25 = vmul.f32 %v3074_v31, %v3074_v31  ;;  %v3090_v40 = vsub.f32 %v8073_v63, %v3074_v31  ;;  %v6295_v63 = vld [vmem:[%s8717_s10] ss:$0 sm:$0xff]  ;;  %v6337_v31 = vld [vmem:[%s8716_s9 + $0x78] sm:$0xff] }
0x1290   :  { %v3080_v35 = vpop.xlane.xlu0 %3079 }
0x1291   :  { %v3089_v26 = vsub.f32 %v3085_v34, %v3087_v33  ;;  %v3084_v28 = vmul.f32 0.015625, %v3080_v35 }
0x1293   :  { %v3093_v30 = vadd.f32 1e-05, %v3089_v26  ;;  %v3088_v36 = vsub.f32 %v3084_v28, %v3086_v25  ;;  %v6336_v28 = vld [vmem:[%s8716_s9 + $0x70] sm:$0xff] }
0x1295   :  { %7486 = vrsqrt.f32 %v3093_v30  ;;  %v3092_v37 = vadd.f32 1e-05, %v3088_v36  ;;  %v6335_v30 = vld [vmem:[%s8716_s9 + $0x68] sm:$0xff]  ;;  %v6334_v36 = vld [vmem:[%s8716_s9 + $0x60] sm:$0xff] }
0x1297   :  { %7488 = vrsqrt.f32 %v3092_v37  ;;  %v6333_v37 = vld [vmem:[%s8716_s9 + $0x58] sm:$0xff] }
0x12a2   :  { %v7487_v39 = vpop.eup %7486 }
0x12a3   :  { %v3097_v42 = vmul.f32 %v7487_v39, %v3091_v38  ;;  %v6332_v38 = vld [vmem:[%s8716_s9 + $0x50] sm:$0xff]  ;;  %v6331_v39 = vld [vmem:[%s8716_s9 + $0x48] sm:$0xff] }
0x12a4   :  { %v7489_v43 = vpop.eup %7488 }
0x12a5   :  { %v3096_v44 = vmul.f32 %v7489_v43, %v3090_v40  ;;  %v3103_v45 = vmul.f32 %v6292_v41, %v3097_v42  ;;  %v6330_v40 = vld [vmem:[%s8716_s9 + $0x40] sm:$0xff]  ;;  %v6360_v42 = vld [vmem:[%s8716_s9 + $0x270] sm:$0xff]  ;;  %v6359_v43 = vld [vmem:[%s8716_s9 + $0x268] sm:$0xff] }
0x12a7   :  { %v3102_v47 = vmul.f32 %v6292_v41, %v3096_v44  ;;  %v8147_v49 = vadd.f32 %v6293_v46, %v3103_v45  ;;  %v6361_v41 = vld [vmem:[%s8716_s9 + $0x278] sm:$0xff]  ;;  %v6358_v44 = vld [vmem:[%s8716_s9 + $0x260] sm:$0xff] }
0x12a8   :  { %v6357_v45 = vld [vmem:[%s8716_s9 + $0x258] sm:$0xff] }
0x12a9   :  { %v8145_v48 = vadd.f32 %v6293_v46, %v3102_v47  ;;  %v6356_v46 = vld [vmem:[%s8716_s9 + $0x250] sm:$0xff]  ;;  %v6355_v47 = vld [vmem:[%s8716_s9 + $0x248] sm:$0xff] }
0x12ab   :  { %7087 = vmatprep.mubr.msk.f32.mxu1 %vm2985_vm4, %v8145_v48  ;;  %7106 = vmatprep.mubr.msk.f32.mxu0 %vm2985_vm4, %v8145_v48 }
0x12ac   :  { %7088 = vmatmul.mubr.msk.f32.vlgmr.msra.gmra.mxu1 %vm2985_vm4, %v8147_v49  ;;  %7107 = vmatmul.mubr.msk.f32.vlgmr.msra.gmra.mxu0 %vm2985_vm4, %v8147_v49 }
0x12ad   :  { %7110 = vmatpush3.msra.mxu1 %v6317_v23  ;;  %7125 = vmatprep.mubr.msk.f32.mxu1 %vm2985_vm4, %v8145_v48 }
0x12ae   :  { %7111 = vmatprep.subr.mxu1 %v6316_v50  ;;  %7130 = vmatprep.mubr.msk.f32.mxu0 %vm7553_vm2, %v7552_v22 }
0x12af   :  { %7112 = vmatpush3.msra.mxu1 %v6316_v50  ;;  %v6354_v50 = vld [vmem:[%s8716_s9 + $0x240] sm:$0xff] }
0x12b0   :  { %7113 = vmatprep.subr.mxu1 %v6315_v51 }
0x12b1   :  { %7114 = vmatpush3.msra.mxu1 %v6315_v51  ;;  %v3725_v51 = vld [vmem:[%s8718_s11 + $0x8] sm:$0xff] }
0x12b2   :  { %7115 = vmatprep.subr.mxu1 %v6314_v52 }
0x12b3   :  { %7116 = vmatpush3.msra.mxu1 %v6314_v52  ;;  %v3724_v52 = vld [vmem:[%s8718_s11] sm:$0xff] }
0x12b4   :  { %7117 = vmatprep.subr.mxu1 %v6313_v53 }
0x12b5   :  { %7118 = vmatpush3.msra.mxu1 %v6313_v53  ;;  %v6349_v53 = vld [vmem:[%s8716_s9 + $0x178] sm:$0xff] }
0x12b6   :  { %7119 = vmatprep.subr.mxu1 %v6312_v54 }
0x12b7   :  { %7120 = vmatpush3.msra.mxu1 %v6312_v54 }
0x12b8   :  { %7121 = vmatprep.subr.mxu1 %v6311_v55 }
0x12b9   :  { %7122 = vmatpush3.msra.mxu1 %v6311_v55 }
0x12ba   :  { %7123 = vmatprep.subr.mxu1 %v6310_v56 }
0x12bb   :  { %7124 = vmatpush3.msra.mxu1 %v6310_v56 }
0x12bc   :  { %7126 = vmatmul.mubr.msk.f32.vlgmr.msra.gmra.mxu1 %vm2985_vm4, %v8147_v49  ;;  %7138 = vmatprep.subr.mxu1 %v7552_v22 }
0x12bd   :  { %7140 = vmatprep.mubr.msk.f32.mxu1 %vm7553_vm2, %v7552_v22 }
0x136c   :  { %v7089_v57 = vpop.f32.mrf.mxu1  ;;  %v7108_v58 = vpop.f32.mrf.mxu0 }
0x136d   :  { %v3307_v1 = vadd.f32 %v7108_v58, %v6307_v59  ;;  %v3215_v2 = vadd.f32 %v7089_v57, %v6295_v63  ;;  %v6348_v57 = vld [vmem:[%s8716_s9 + $0x170] sm:$0xff] }
0x136e   :  { %v3301_v60 = vpop.f32.mrf.mxu0  ;;  %v3209_v61 = vpop.f32.mrf.mxu1 }
0x136f   :  { %v3302_v62 = vadd.f32 %v6307_v59, %v3301_v60  ;;  %v3210_v0 = vadd.f32 %v6295_v63, %v3209_v61  ;;  %v6347_v59 = vld [vmem:[%s8716_s9 + $0x168] sm:$0xff]  ;;  %v6346_v60 = vld [vmem:[%s8716_s9 + $0x160] sm:$0xff]  ;;  %v6345_v61 = vld [vmem:[%s8716_s9 + $0x158] sm:$0xff] }
0x1370   :  { %v6343_v63 = vld [vmem:[%s8716_s9 + $0x148] sm:$0xff] }
0x1371   :  { %7129 = vmatpush3.xpose.msk.msra.mxu0 %vm54_vm0, %v3302_v62  ;;  %v6344_v62 = vld [vmem:[%s8716_s9 + $0x150] sm:$0xff] }
0x1372   :  { %7133 = vmatprep.subr.mxu0 %v7552_v22 }
0x1374   :  { %7131 = vmatmul.mubr.msk.f32.vlgmr.msra.gmra.mxu0 %vm54_vm0, %v3210_v0  ;;  %v6342_v0 = vld [vmem:[%s8716_s9 + $0x140] sm:$0xff] }
0x1375   :  { %7134 = vmatpush3.xpose.msk.msra.mxu0 %vm54_vm0, %v3307_v1  ;;  %7135 = vmatprep.mubr.msk.f32.mxu0 %vm7553_vm2, %v7552_v22 }
0x1376   :  { %7143 = vmatprep.subr.mxu0 %v7552_v22 }
0x1378   :  { %7136 = vmatmul.mubr.msk.f32.vlgmr.msra.gmra.mxu0 %vm54_vm0, %v3215_v2 }
0x1379   :  { %7145 = vmatprep.mubr.msk.f32.mxu0 %vm7553_vm2, %v7552_v22 }
0x137c   :  { %v7127_v4 = vpop.f32.mrf.mxu1 }
0x137d   :  { %v3399_v5 = vadd.f32 %v7127_v4, %v6319_v3 }
0x137e   :  { %v3393_v6 = vpop.f32.mrf.mxu1 }
0x137f   :  { %v3394_v7 = vadd.f32 %v6319_v3, %v3393_v6  ;;  %7144 = vmatpush3.msra.mxu0 %v3399_v5  ;;  %v6363_v3 = vld [vmem:[%s8717_s10 + $0x9] ss:$0 sm:$0xff] }
0x1380   :  { %7155 = vmatprep.subr.mxu0 %v6337_v31 }
0x1381   :  { %7139 = vmatpush3.msra.mxu1 %v3394_v7 }
0x1382   :  { %7148 = vmatprep.subr.mxu1 %v3725_v51 }
0x1434   :  { %v3474_v8 = vpop.f32.mrf.mxu0 }
0x1435   :  { %v3554_v9 = vmul.f32 0.25, %v3474_v8 }
0x1436   :  { %v7132_v10 = vpop.f32.mrf.mxu0 }
0x1437   :  { %v3556_v11 = vsel %vm417_vm3, %v3554_v9, -inf }
0x1438   :  { %3557 = vmax.xlane.f32.xlu0 %v3556_v11  ;;  %v3550_v12 = vpop.f32.mrf.mxu0 }
0x1439   :  { %v3555_v18 = vmul.f32 0.25, %v3550_v12  ;;  %v6339_v12 = vld [vmem:[%s8717_s10 + $0x1] ss:$0 sm:$0xff] }
0x143a   :  { %v7137_v17 = vpop.f32.mrf.mxu0 }
0x143b   :  { %v3559_v13 = vsel %vm417_vm3, %v3555_v18, -inf }
0x143c   :  { %3560 = vmax.xlane.f32.xlu1 %v3559_v13 }
0x14c1   :  { %v3558_v14 = vpop.xlane.xlu0 %3557 }
0x14c2   :  { %v3562_v15 = vsub.f32 %v3554_v9, %v3558_v14  ;;  %v6351_v9 = vld [vmem:[%s8717_s10 + $0x5] ss:$0 sm:$0xff] }
0x14c4   :  { %v3564_v16 = vmul.f32 1.442695, %v3562_v15 }
0x14c5   :  { %v3561_v19 = vpop.xlane.xlu1 %3560 }
0x14c6   :  { %7490 = vpow2.f32 %v3564_v16  ;;  %v3563_v20 = vsub.f32 %v3555_v18, %v3561_v19 }
0x14c8   :  { %v3566_v21 = vmul.f32 1.442695, %v3563_v20 }
0x14ca   :  { %7492 = vpow2.f32 %v3566_v21 }
0x14d3   :  { %v7491_v23 = vpop.eup %7490 }
0x14d4   :  { %v3568_v24 = vsel %vm417_vm3, %v7491_v23, 0.0 }
0x14d5   :  { %3569 = vadd.xlane.f32.xlu0 %v3568_v24 }
0x14d7   :  { %v7493_v27 = vpop.eup %7492 }
0x14d8   :  { %v3571_v29 = vsel %vm417_vm3, %v7493_v27, 0.0 }
0x14d9   :  { %3572 = vadd.xlane.f32.xlu1 %v3571_v29 }
0x155e   :  { %v3570_v32 = vpop.xlane.xlu0 %3569 }
0x155f   :  { %7494 = vrcp.f32 %v3570_v32 }
0x1562   :  { %v3573_v33 = vpop.xlane.xlu1 %3572 }
0x1563   :  { %7496 = vrcp.f32 %v3573_v33 }
0x156c   :  { %v7495_v34 = vpop.eup %7494 }
0x156d   :  { %v3576_v35 = vmul.f32 %v7495_v34, %v7491_v23 }
0x156f   :  { %7141 = vmatmul.mubr.msk.f32.vlgmr.msra.gmra.mxu1 %vm417_vm3, %v3576_v35 }
0x1570   :  { %v7497_v25 = vpop.eup %7496  ;;  %7149 = vmatpush3.msra.mxu1 %v3725_v51  ;;  %v6377_v51 = vld [vmem:[%s8716_s9 + $0x88] sm:$0xff] }
0x1571   :  { %v3577_v26 = vmul.f32 %v7497_v25, %v7493_v27  ;;  %7150 = vmatprep.subr.mxu1 %v3724_v52 }
0x1572   :  { %7151 = vmatpush3.msra.mxu1 %v3724_v52  ;;  %v6376_v52 = vld [vmem:[%s8716_s9 + $0x80] sm:$0xff] }
0x1573   :  { %7146 = vmatmul.mubr.msk.f32.vlgmr.msra.gmra.mxu0 %vm417_vm3, %v3577_v26  ;;  %7174 = vmatprep.subr.mxu1 %v6349_v53 }
0x1574   :  { %7156 = vmatpush3.msra.mxu0 %v6337_v31  ;;  %7171 = vmatprep.mubr.msk.f32.mxu0 %vm2985_vm4, %v8145_v48 }
0x1575   :  { %7157 = vmatprep.subr.mxu0 %v6336_v28 }
0x1576   :  { %7158 = vmatpush3.msra.mxu0 %v6336_v28 }
0x1577   :  { %7159 = vmatprep.subr.mxu0 %v6335_v30 }
0x1578   :  { %7160 = vmatpush3.msra.mxu0 %v6335_v30 }
0x1579   :  { %7161 = vmatprep.subr.mxu0 %v6334_v36 }
0x157a   :  { %7162 = vmatpush3.msra.mxu0 %v6334_v36 }
0x157b   :  { %7163 = vmatprep.subr.mxu0 %v6333_v37 }
0x157c   :  { %7164 = vmatpush3.msra.mxu0 %v6333_v37 }
0x157d   :  { %7165 = vmatprep.subr.mxu0 %v6332_v38 }
0x157e   :  { %7166 = vmatpush3.msra.mxu0 %v6332_v38 }
0x157f   :  { %7167 = vmatprep.subr.mxu0 %v6331_v39 }
0x1580   :  { %7168 = vmatpush3.msra.mxu0 %v6331_v39 }
0x1581   :  { %7169 = vmatprep.subr.mxu0 %v6330_v40 }
0x1582   :  { %7170 = vmatpush3.msra.mxu0 %v6330_v40 }
0x1583   :  { %7172 = vmatmul.mubr.msk.f32.vlgmr.msra.gmra.mxu0 %vm2985_vm4, %v8147_v49  ;;  %7193 = vmatprep.subr.mxu0 %v6361_v41 }
0x1584   :  { %7194 = vmatpush3.msra.mxu0 %v6361_v41  ;;  %7209 = vmatprep.mubr.msk.f32.mxu0 %vm2985_vm4, %v8145_v48  ;;  %v6383_v41 = vld [vmem:[%s8716_s9 + $0xb8] sm:$0xff] }
0x1585   :  { %7195 = vmatprep.subr.mxu0 %v6360_v42 }
0x1586   :  { %7196 = vmatpush3.msra.mxu0 %v6360_v42 }
0x1587   :  { %7197 = vmatprep.subr.mxu0 %v6359_v43 }
0x1588   :  { %7198 = vmatpush3.msra.mxu0 %v6359_v43 }
0x1589   :  { %7199 = vmatprep.subr.mxu0 %v6358_v44 }
0x158a   :  { %7200 = vmatpush3.msra.mxu0 %v6358_v44  ;;  %v6382_v44 = vld [vmem:[%s8716_s9 + $0xb0] sm:$0xff] }
0x158b   :  { %7201 = vmatprep.subr.mxu0 %v6357_v45 }
0x158c   :  { %7202 = vmatpush3.msra.mxu0 %v6357_v45  ;;  %v6381_v45 = vld [vmem:[%s8716_s9 + $0xa8] sm:$0xff] }
0x158d   :  { %7203 = vmatprep.subr.mxu0 %v6356_v46 }
0x158e   :  { %7204 = vmatpush3.msra.mxu0 %v6356_v46  ;;  %v6380_v46 = vld [vmem:[%s8716_s9 + $0xa0] sm:$0xff] }
0x158f   :  { %7205 = vmatprep.subr.mxu0 %v6355_v47 }
0x1590   :  { %7206 = vmatpush3.msra.mxu0 %v6355_v47  ;;  %v6379_v47 = vld [vmem:[%s8716_s9 + $0x98] sm:$0xff] }
0x1591   :  { %7207 = vmatprep.subr.mxu0 %v6354_v50 }
0x1592   :  { %7208 = vmatpush3.msra.mxu0 %v6354_v50  ;;  %v6378_v50 = vld [vmem:[%s8716_s9 + $0x90] sm:$0xff] }
0x1593   :  { %7210 = vmatmul.mubr.msk.f32.vlgmr.msra.gmra.mxu0 %vm2985_vm4, %v8147_v49 }
0x162f   :  { %v3647_v54 = vpop.f32.mrf.mxu1 }
0x1630   :  { %7152 = vmatprep.mubr.msk.f32.mxu1 %vm54_vm0, %v3647_v54  ;;  %v6406_v54 = vld [vmem:[%s8716_s9 + $0x2b0] sm:$0xff] }
0x1631   :  { %v7142_v55 = vpop.f32.mrf.mxu1 }
0x1632   :  { %v6405_v55 = vld [vmem:[%s8716_s9 + $0x2a8] sm:$0xff] }
0x1633   :  { %v3720_v56 = vpop.f32.mrf.mxu0 }
0x1634   :  { %7153 = vmatmul.mubr.msk.f32.vlgmr.msra.gmra.mxu1 %vm54_vm0, %v3720_v56  ;;  %v6404_v56 = vld [vmem:[%s8716_s9 + $0x2a0] sm:$0xff] }
0x1635   :  { %7175 = vmatpush3.msra.mxu1 %v6349_v53  ;;  %v7147_v58 = vpop.f32.mrf.mxu0  ;;  %7190 = vmatprep.mubr.msk.f32.mxu1 %vm2985_vm4, %v8145_v48  ;;  %v6407_v53 = vld [vmem:[%s8716_s9 + $0x2b8] sm:$0xff] }
0x1636   :  { %7176 = vmatprep.subr.mxu1 %v6348_v57  ;;  %v6402_v58 = vld [vmem:[%s8716_s9 + $0x290] sm:$0xff] }
0x1637   :  { %7177 = vmatpush3.msra.mxu1 %v6348_v57  ;;  %v6403_v57 = vld [vmem:[%s8716_s9 + $0x298] sm:$0xff] }
0x1638   :  { %7178 = vmatprep.subr.mxu1 %v6347_v59 }
0x1639   :  { %7179 = vmatpush3.msra.mxu1 %v6347_v59  ;;  %v6401_v59 = vld [vmem:[%s8716_s9 + $0x288] sm:$0xff] }
0x163a   :  { %7180 = vmatprep.subr.mxu1 %v6346_v60 }
0x163b   :  { %7181 = vmatpush3.msra.mxu1 %v6346_v60  ;;  %v6400_v60 = vld [vmem:[%s8716_s9 + $0x280] sm:$0xff] }
0x163c   :  { %7182 = vmatprep.subr.mxu1 %v6345_v61 }
0x163d   :  { %7183 = vmatpush3.msra.mxu1 %v6345_v61  ;;  %v6373_v61 = vld [vmem:[%s8718_s11 + $0x18] sm:$0xff] }
0x163e   :  { %7184 = vmatprep.subr.mxu1 %v6344_v62  ;;  %7232 = vmatprep.subr.mxu0 %v6373_v61 }
0x163f   :  { %7185 = vmatpush3.msra.mxu1 %v6344_v62  ;;  %7233 = vmatpush3.msra.mxu0 %v6373_v61  ;;  %v6372_v62 = vld [vmem:[%s8718_s11 + $0x10] sm:$0xff] }
0x1640   :  { %7186 = vmatprep.subr.mxu1 %v6343_v63  ;;  %7234 = vmatprep.subr.mxu0 %v6372_v62  ;;  %v6428_v61 = vld [vmem:[%s8716_s9 + $0xf0] sm:$0xff] }
0x1641   :  { %7187 = vmatpush3.msra.mxu1 %v6343_v63  ;;  %7235 = vmatpush3.msra.mxu0 %v6372_v62  ;;  %v6395_v63 = vld [vmem:[%s8716_s9 + $0x1b8] sm:$0xff]  ;;  %v6427_v62 = vld [vmem:[%s8716_s9 + $0xe8] sm:$0xff] }
0x1642   :  { %7188 = vmatprep.subr.mxu1 %v6342_v0  ;;  %7258 = vmatprep.subr.mxu0 %v6395_v63 }
0x1643   :  { %7189 = vmatpush3.msra.mxu1 %v6342_v0  ;;  %v7173_v1 = vpop.f32.mrf.mxu0 }
0x1644   :  { %7191 = vmatmul.mubr.msk.f32.vlgmr.msra.gmra.mxu1 %vm2985_vm4, %v8147_v49  ;;  %7212 = vmatprep.subr.mxu1 %v7552_v22  ;;  %v3898_v14 = vadd.f32 %v7173_v1, %v6339_v12 }
0x1645   :  { %7214 = vmatprep.mubr.msk.f32.mxu1 %vm7553_vm2, %v7552_v22  ;;  %v3892_v2 = vpop.f32.mrf.mxu0 }
0x1646   :  { %v3893_v18 = vadd.f32 %v6339_v12, %v3892_v2  ;;  %v6388_v12 = vld [vmem:[%s8716_s9 + $0x180] sm:$0xff] }
0x1653   :  { %v7211_v4 = vpop.f32.mrf.mxu0 }
0x1654   :  { %v4082_v5 = vadd.f32 %v7211_v4, %v6363_v3 }
0x1655   :  { %v4076_v13 = vpop.f32.mrf.mxu0 }
0x1656   :  { %v4077_v15 = vadd.f32 %v6363_v3, %v4076_v13  ;;  %v6394_v3 = vld [vmem:[%s8716_s9 + $0x1b0] sm:$0xff]  ;;  %v6409_v13 = vld [vmem:[%s8717_s10 + $0xa] ss:$0 sm:$0xff] }
0x16f4   :  { %v8310_v6 = vpop.f32.mrf.mxu1 }
0x16f6   :  { %v8312_v7 = vpop.f32.mrf.mxu1 }
0x1704   :  { %v7192_v8 = vpop.f32.mrf.mxu1 }
0x1705   :  { %v3990_v17 = vadd.f32 %v7192_v8, %v6351_v9  ;;  %v6392_v8 = vld [vmem:[%s8716_s9 + $0x1a0] sm:$0xff] }
0x1706   :  { %v3984_v10 = vpop.f32.mrf.mxu1 }
0x1707   :  { %v3985_v11 = vadd.f32 %v6351_v9, %v3984_v10  ;;  %v6391_v9 = vld [vmem:[%s8716_s9 + $0x198] sm:$0xff]  ;;  %v6390_v10 = vld [vmem:[%s8716_s9 + $0x190] sm:$0xff] }
0x1709   :  { %7213 = vmatpush3.xpose.msk.msra.mxu1 %vm54_vm0, %v3985_v11  ;;  %v6389_v11 = vld [vmem:[%s8716_s9 + $0x188] sm:$0xff] }
0x170a   :  { %7217 = vmatprep.subr.mxu1 %v7552_v22 }
0x170c   :  { %7215 = vmatmul.mubr.msk.f32.vlgmr.msra.gmra.mxu1 %vm54_vm0, %v3893_v18 }
0x170d   :  { %7218 = vmatpush3.xpose.msk.msra.mxu1 %vm54_vm0, %v3990_v17  ;;  %7219 = vmatprep.mubr.msk.f32.mxu1 %vm7553_vm2, %v7552_v22 }
0x170e   :  { %7222 = vmatprep.subr.mxu1 %v7552_v22 }
0x1710   :  { %7220 = vmatmul.mubr.msk.f32.vlgmr.msra.gmra.mxu1 %vm54_vm0, %v3898_v14 }
0x1711   :  { %7223 = vmatpush3.msra.mxu1 %v4077_v15  ;;  %7224 = vmatprep.mubr.msk.f32.mxu1 %vm7553_vm2, %v7552_v22 }
0x1712   :  { %7227 = vmatprep.subr.mxu1 %v7552_v22 }
0x17cc   :  { %v4157_v16 = vpop.f32.mrf.mxu1 }
0x17cd   :  { %v4237_v19 = vmul.f32 0.25, %v4157_v16  ;;  %v6294_v16 = vld [vmem:[%s8710_s3 + $0x7] ss:$0 sm:$0xff] }
0x17ce   :  { %v7216_v20 = vpop.f32.mrf.mxu1 }
0x17cf   :  { %v4239_v21 = vsel %vm417_vm3, %v4237_v19, -inf }
0x17d0   :  { %4240 = vmax.xlane.f32.xlu0 %v4239_v21  ;;  %v4233_v23 = vpop.f32.mrf.mxu1  ;;  %v3807_v21 = vadd.f32 %v6294_v16, %v8312_v7 }
0x17d1   :  { %v4238_v24 = vmul.f32 0.25, %v4233_v23 }
0x17d2   :  { %v7221_v27 = vpop.f32.mrf.mxu1 }
0x17d3   :  { %v4242_v29 = vsel %vm417_vm3, %v4238_v24, -inf }
0x17d4   :  { %4243 = vmax.xlane.f32.xlu1 %v4242_v29 }
0x1859   :  { %v4241_v31 = vpop.xlane.xlu0 %4240 }
0x185a   :  { %v4245_v32 = vsub.f32 %v4237_v19, %v4241_v31  ;;  %v3808_v19 = vadd.f32 %v8310_v6, %v6294_v16  ;;  %v6397_v31 = vld [vmem:[%s8717_s10 + $0x6] ss:$0 sm:$0xff] }
0x185c   :  { %v4247_v33 = vmul.f32 1.442695, %v4245_v32 }
0x185d   :  { %v4244_v34 = vpop.xlane.xlu1 %4243 }
0x185e   :  { %7498 = vpow2.f32 %v4247_v33  ;;  %v4246_v35 = vsub.f32 %v4238_v24, %v4244_v34  ;;  %v6385_v34 = vld [vmem:[%s8717_s10 + $0x2] ss:$0 sm:$0xff] }
0x1860   :  { %v4249_v25 = vmul.f32 1.442695, %v4246_v35 }
0x1862   :  { %7500 = vpow2.f32 %v4249_v25 }
0x186b   :  { %v7499_v26 = vpop.eup %7498 }
0x186c   :  { %v4251_v28 = vsel %vm417_vm3, %v7499_v26, 0.0 }
0x186d   :  { %4252 = vadd.xlane.f32.xlu0 %v4251_v28 }
0x186f   :  { %v7501_v30 = vpop.eup %7500 }
0x1870   :  { %v4254_v36 = vsel %vm417_vm3, %v7501_v30, 0.0 }
0x1871   :  { %4255 = vadd.xlane.f32.xlu1 %v4254_v36 }
0x18f6   :  { %v4253_v37 = vpop.xlane.xlu0 %4252 }
0x18f7   :  { %7502 = vrcp.f32 %v4253_v37 }
0x18fa   :  { %v4256_v38 = vpop.xlane.xlu1 %4255 }
0x18fb   :  { %7504 = vrcp.f32 %v4256_v38 }
0x1904   :  { %v7503_v39 = vpop.eup %7502 }
0x1905   :  { %v4259_v40 = vmul.f32 %v7503_v39, %v7499_v26 }
0x1907   :  { %7225 = vmatmul.mubr.msk.f32.vlgmr.msra.gmra.mxu1 %vm417_vm3, %v4259_v40 }
0x1908   :  { %v7505_v42 = vpop.eup %7504  ;;  %7228 = vmatpush3.msra.mxu1 %v4082_v5  ;;  %7229 = vmatprep.mubr.msk.f32.mxu1 %vm7553_vm2, %v7552_v22  ;;  %v6393_v5 = vld [vmem:[%s8716_s9 + $0x1a8] sm:$0xff] }
0x1909   :  { %7239 = vmatprep.subr.mxu1 %v6383_v41  ;;  %v4260_v43 = vmul.f32 %v7505_v42, %v7501_v30 }
0x190b   :  { %7230 = vmatmul.mubr.msk.f32.vlgmr.msra.gmra.mxu1 %vm417_vm3, %v4260_v43 }
0x190c   :  { %7240 = vmatpush3.msra.mxu1 %v6383_v41  ;;  %7255 = vmatprep.mubr.msk.f32.mxu1 %vm2985_vm4, %v8145_v48 }
0x190d   :  { %7241 = vmatprep.subr.mxu1 %v6382_v44 }
0x190e   :  { %7242 = vmatpush3.msra.mxu1 %v6382_v44 }
0x190f   :  { %7243 = vmatprep.subr.mxu1 %v6381_v45 }
0x1910   :  { %7244 = vmatpush3.msra.mxu1 %v6381_v45 }
0x1911   :  { %7245 = vmatprep.subr.mxu1 %v6380_v46 }
0x1912   :  { %7246 = vmatpush3.msra.mxu1 %v6380_v46 }
0x1913   :  { %7247 = vmatprep.subr.mxu1 %v6379_v47 }
0x1914   :  { %7248 = vmatpush3.msra.mxu1 %v6379_v47 }
0x1915   :  { %7249 = vmatprep.subr.mxu1 %v6378_v50 }
0x1916   :  { %7250 = vmatpush3.msra.mxu1 %v6378_v50 }
0x1917   :  { %7251 = vmatprep.subr.mxu1 %v6377_v51 }
0x1918   :  { %7252 = vmatpush3.msra.mxu1 %v6377_v51 }
0x1919   :  { %7253 = vmatprep.subr.mxu1 %v6376_v52 }
0x191a   :  { %7254 = vmatpush3.msra.mxu1 %v6376_v52 }
0x191b   :  { %7256 = vmatmul.mubr.msk.f32.vlgmr.msra.gmra.mxu1 %vm2985_vm4, %v8147_v49  ;;  %7277 = vmatprep.subr.mxu1 %v6407_v53 }
0x191c   :  { %7278 = vmatpush3.msra.mxu1 %v6407_v53  ;;  %7293 = vmatprep.mubr.msk.f32.mxu1 %vm2985_vm4, %v8145_v48 }
0x191d   :  { %7279 = vmatprep.subr.mxu1 %v6406_v54 }
0x191e   :  { %7280 = vmatpush3.msra.mxu1 %v6406_v54 }
0x191f   :  { %7281 = vmatprep.subr.mxu1 %v6405_v55 }
0x1920   :  { %7282 = vmatpush3.msra.mxu1 %v6405_v55 }
0x1921   :  { %7283 = vmatprep.subr.mxu1 %v6404_v56 }
0x1922   :  { %7284 = vmatpush3.msra.mxu1 %v6404_v56 }
0x1923   :  { %7285 = vmatprep.subr.mxu1 %v6403_v57 }
0x1924   :  { %7286 = vmatpush3.msra.mxu1 %v6403_v57 }
0x1925   :  { %7287 = vmatprep.subr.mxu1 %v6402_v58 }
0x1926   :  { %7288 = vmatpush3.msra.mxu1 %v6402_v58  ;;  %v6429_v58 = vld [vmem:[%s8716_s9 + $0xf8] sm:$0xff] }
0x1927   :  { %7289 = vmatprep.subr.mxu1 %v6401_v59 }
0x1928   :  { %7290 = vmatpush3.msra.mxu1 %v6401_v59 }
0x1929   :  { %7291 = vmatprep.subr.mxu1 %v6400_v60 }
0x192a   :  { %7292 = vmatpush3.msra.mxu1 %v6400_v60 }
0x192b   :  { %7294 = vmatmul.mubr.msk.f32.vlgmr.msra.gmra.mxu1 %vm2985_vm4, %v8147_v49 }
0x19c7   :  { %v4330_v0 = vpop.f32.mrf.mxu1 }
0x19c8   :  { %7236 = vmatprep.mubr.msk.f32.mxu0 %vm54_vm0, %v4330_v0  ;;  %v6425_v0 = vld [vmem:[%s8716_s9 + $0xd8] sm:$0xff] }
0x19c9   :  { %v7226_v1 = vpop.f32.mrf.mxu1 }
0x19ca   :  { %v6424_v1 = vld [vmem:[%s8716_s9 + $0xd0] sm:$0xff] }
0x19cb   :  { %v4403_v2 = vpop.f32.mrf.mxu1 }
0x19cc   :  { %7237 = vmatmul.mubr.msk.f32.vlgmr.msra.gmra.mxu0 %vm54_vm0, %v4403_v2  ;;  %v6423_v2 = vld [vmem:[%s8716_s9 + $0xc8] sm:$0xff] }
0x19cd   :  { %7259 = vmatpush3.msra.mxu0 %v6395_v63  ;;  %v7231_v4 = vpop.f32.mrf.mxu1  ;;  %7274 = vmatprep.mubr.msk.f32.mxu0 %vm2985_vm4, %v8145_v48  ;;  %v6426_v63 = vld [vmem:[%s8716_s9 + $0xe0] sm:$0xff] }
0x19ce   :  { %7260 = vmatprep.subr.mxu0 %v6394_v3  ;;  %v6453_v4 = vld [vmem:[%s8716_s9 + $0x2f8] sm:$0xff] }
0x19cf   :  { %7261 = vmatpush3.msra.mxu0 %v6394_v3  ;;  %v6422_v3 = vld [vmem:[%s8716_s9 + $0xc0] sm:$0xff] }
0x19d0   :  { %7262 = vmatprep.subr.mxu0 %v6393_v5 }
0x19d1   :  { %7263 = vmatpush3.msra.mxu0 %v6393_v5  ;;  %v6452_v5 = vld [vmem:[%s8716_s9 + $0x2f0] sm:$0xff] }
0x19d2   :  { %7264 = vmatprep.subr.mxu0 %v6392_v8 }
0x19d3   :  { %7265 = vmatpush3.msra.mxu0 %v6392_v8  ;;  %v6451_v8 = vld [vmem:[%s8716_s9 + $0x2e8] sm:$0xff] }
0x19d4   :  { %7266 = vmatprep.subr.mxu0 %v6391_v9 }
0x19d5   :  { %7267 = vmatpush3.msra.mxu0 %v6391_v9  ;;  %v6450_v9 = vld [vmem:[%s8716_s9 + $0x2e0] sm:$0xff] }
0x19d6   :  { %7268 = vmatprep.subr.mxu0 %v6390_v10 }
0x19d7   :  { %7269 = vmatpush3.msra.mxu0 %v6390_v10  ;;  %v6449_v10 = vld [vmem:[%s8716_s9 + $0x2d8] sm:$0xff] }
0x19d8   :  { %7270 = vmatprep.subr.mxu0 %v6389_v11 }
0x19d9   :  { %7271 = vmatpush3.msra.mxu0 %v6389_v11  ;;  %v6448_v11 = vld [vmem:[%s8716_s9 + $0x2d0] sm:$0xff] }
0x19da   :  { %7272 = vmatprep.subr.mxu0 %v6388_v12 }
0x19db   :  { %7273 = vmatpush3.msra.mxu0 %v6388_v12  ;;  %v7257_v18 = vpop.f32.mrf.mxu1  ;;  %v6447_v12 = vld [vmem:[%s8716_s9 + $0x2c8] sm:$0xff] }
0x19dc   :  { %7275 = vmatmul.mubr.msk.f32.vlgmr.msra.gmra.mxu0 %vm2985_vm4, %v8147_v49  ;;  %7296 = vmatprep.subr.mxu0 %v7552_v22  ;;  %v4582_v25 = vadd.f32 %v7257_v18, %v6385_v34  ;;  %v6446_v18 = vld [vmem:[%s8716_s9 + $0x2c0] sm:$0xff] }
0x19dd   :  { %7298 = vmatprep.mubr.msk.f32.mxu0 %vm7553_vm2, %v7552_v22  ;;  %v4576_v17 = vpop.f32.mrf.mxu1 }
0x19de   :  { %v4577_v6 = vadd.f32 %v6385_v34, %v4576_v17  ;;  %v6419_v17 = vld [vmem:[%s8718_s11 + $0x28] sm:$0xff]  ;;  %v6434_v34 = vld [vmem:[%s8716_s9 + $0x1c0] sm:$0xff] }
0x19df   :  { %7316 = vmatprep.subr.mxu1 %v6419_v17 }
0x19e0   :  { %7317 = vmatpush3.msra.mxu1 %v6419_v17 }
0x19eb   :  { %v7295_v14 = vpop.f32.mrf.mxu1 }
0x19ec   :  { %v4766_v15 = vadd.f32 %v7295_v14, %v6409_v13  ;;  %v6441_v14 = vld [vmem:[%s8716_s9 + $0x1f8] sm:$0xff] }
0x19ed   :  { %v4760_v35 = vpop.f32.mrf.mxu1 }
0x19ee   :  { %v4761_v26 = vadd.f32 %v6409_v13, %v4760_v35  ;;  %v6418_v13 = vld [vmem:[%s8718_s11 + $0x20] sm:$0xff]  ;;  %v6455_v35 = vld [vmem:[%s8717_s10 + $0xb] ss:$0 sm:$0xff] }
0x19ef   :  { %7318 = vmatprep.subr.mxu1 %v6418_v13 }
0x19f0   :  { %7319 = vmatpush3.msra.mxu1 %v6418_v13 }
0x19f1   :  { %7342 = vmatprep.subr.mxu1 %v6441_v14 }
0x1a8c   :  { %v7238_v20 = vpop.f32.mrf.mxu0 }
0x1a8d   :  { %v8442_v23 = vadd.f32 %v7238_v20, %v3808_v19  ;;  %v6440_v20 = vld [vmem:[%s8716_s9 + $0x1f0] sm:$0xff] }
0x1a8e   :  { %v4482_v24 = vpop.f32.mrf.mxu0 }
0x1a8f   :  { %v8444_v27 = vadd.f32 %v4482_v24, %v3807_v21  ;;  %v6439_v24 = vld [vmem:[%s8716_s9 + $0x1e8] sm:$0xff] }
0x1a9c   :  { %v7276_v29 = vpop.f32.mrf.mxu0 }
0x1a9d   :  { %v4674_v7 = vadd.f32 %v7276_v29, %v6397_v31  ;;  %v6438_v29 = vld [vmem:[%s8716_s9 + $0x1e0] sm:$0xff] }
0x1a9e   :  { %v4668_v32 = vpop.f32.mrf.mxu0 }
0x1a9f   :  { %v4669_v33 = vadd.f32 %v6397_v31, %v4668_v32  ;;  %v6437_v31 = vld [vmem:[%s8716_s9 + $0x1d8] sm:$0xff]  ;;  %v6436_v32 = vld [vmem:[%s8716_s9 + $0x1d0] sm:$0xff] }
0x1aa1   :  { %7297 = vmatpush3.xpose.msk.msra.mxu0 %vm54_vm0, %v4669_v33  ;;  %v6435_v33 = vld [vmem:[%s8716_s9 + $0x1c8] sm:$0xff] }
0x1aa2   :  { %7301 = vmatprep.subr.mxu0 %v7552_v22 }
0x1aa4   :  { %7299 = vmatmul.mubr.msk.f32.vlgmr.msra.gmra.mxu0 %vm54_vm0, %v4577_v6 }
0x1aa5   :  { %7302 = vmatpush3.xpose.msk.msra.mxu0 %vm54_vm0, %v4674_v7  ;;  %7303 = vmatprep.mubr.msk.f32.mxu0 %vm7553_vm2, %v7552_v22 }
0x1aa6   :  { %7306 = vmatprep.subr.mxu0 %v7552_v22 }
0x1aa8   :  { %7304 = vmatmul.mubr.msk.f32.vlgmr.msra.gmra.mxu0 %vm54_vm0, %v4582_v25 }
0x1aa9   :  { %7307 = vmatpush3.msra.mxu0 %v4761_v26  ;;  %7308 = vmatprep.mubr.msk.f32.mxu0 %vm7553_vm2, %v7552_v22 }
0x1aaa   :  { %7311 = vmatprep.subr.mxu0 %v7552_v22 }
0x1b64   :  { %v4841_v28 = vpop.f32.mrf.mxu0 }
0x1b65   :  { %v4921_v30 = vmul.f32 0.25, %v4841_v28 }
0x1b66   :  { %v7300_v36 = vpop.f32.mrf.mxu0 }
0x1b67   :  { %v4923_v37 = vsel %vm417_vm3, %v4921_v30, -inf }
0x1b68   :  { %4924 = vmax.xlane.f32.xlu0 %v4923_v37  ;;  %v4917_v38 = vpop.f32.mrf.mxu0 }
0x1b69   :  { %v4922_v39 = vmul.f32 0.25, %v4917_v38 }
0x1b6a   :  { %v7305_v40 = vpop.f32.mrf.mxu0 }
0x1b6b   :  { %v4926_v41 = vsel %vm417_vm3, %v4922_v39, -inf }
0x1b6c   :  { %4927 = vmax.xlane.f32.xlu1 %v4926_v41 }
0x1bf1   :  { %v4925_v42 = vpop.xlane.xlu0 %4924 }
0x1bf2   :  { %v4929_v43 = vsub.f32 %v4921_v30, %v4925_v42  ;;  %v6431_v42 = vld [vmem:[%s8717_s10 + $0x3] ss:$0 sm:$0xff] }
0x1bf4   :  { %v4931_v44 = vmul.f32 1.442695, %v4929_v43 }
0x1bf5   :  { %v4928_v45 = vpop.xlane.xlu1 %4927 }
0x1bf6   :  { %7506 = vpow2.f32 %v4931_v44  ;;  %v4930_v46 = vsub.f32 %v4922_v39, %v4928_v45  ;;  %v6443_v39 = vld [vmem:[%s8717_s10 + $0x7] ss:$0 sm:$0xff] }
0x1bf8   :  { %v4933_v47 = vmul.f32 1.442695, %v4930_v46 }
0x1bfa   :  { %7508 = vpow2.f32 %v4933_v47 }
0x1c03   :  { %v7507_v50 = vpop.eup %7506 }
0x1c04   :  { %v4935_v51 = vsel %vm417_vm3, %v7507_v50, 0.0 }
0x1c05   :  { %4936 = vadd.xlane.f32.xlu0 %v4935_v51 }
0x1c07   :  { %v7509_v52 = vpop.eup %7508 }
0x1c08   :  { %v4938_v53 = vsel %vm417_vm3, %v7509_v52, 0.0 }
0x1c09   :  { %4939 = vadd.xlane.f32.xlu1 %v4938_v53 }
0x1c8e   :  { %v4937_v54 = vpop.xlane.xlu0 %4936 }
0x1c8f   :  { %7510 = vrcp.f32 %v4937_v54 }
0x1c92   :  { %v4940_v55 = vpop.xlane.xlu1 %4939 }
0x1c93   :  { %7512 = vrcp.f32 %v4940_v55 }
0x1c9c   :  { %v7511_v56 = vpop.eup %7510 }
0x1c9d   :  { %v4943_v57 = vmul.f32 %v7511_v56, %v7507_v50 }
0x1c9f   :  { %7309 = vmatmul.mubr.msk.f32.vlgmr.msra.gmra.mxu0 %vm417_vm3, %v4943_v57 }
0x1ca0   :  { %v7513_v59 = vpop.eup %7512  ;;  %7312 = vmatpush3.msra.mxu0 %v4766_v15  ;;  %7313 = vmatprep.mubr.msk.f32.mxu0 %vm7553_vm2, %v7552_v22 }
0x1ca1   :  { %7323 = vmatprep.subr.mxu0 %v6429_v58  ;;  %v4944_v60 = vmul.f32 %v7513_v59, %v7509_v52 }
0x1ca3   :  { %7314 = vmatmul.mubr.msk.f32.vlgmr.msra.gmra.mxu0 %vm417_vm3, %v4944_v60 }
0x1ca4   :  { %7324 = vmatpush3.msra.mxu0 %v6429_v58  ;;  %7339 = vmatprep.mubr.msk.f32.mxu0 %vm2985_vm4, %v8145_v48 }
0x1ca5   :  { %7325 = vmatprep.subr.mxu0 %v6428_v61 }
0x1ca6   :  { %7326 = vmatpush3.msra.mxu0 %v6428_v61 }
0x1ca7   :  { %7327 = vmatprep.subr.mxu0 %v6427_v62 }
0x1ca8   :  { %7328 = vmatpush3.msra.mxu0 %v6427_v62 }
0x1ca9   :  { %7329 = vmatprep.subr.mxu0 %v6426_v63 }
0x1caa   :  { %7330 = vmatpush3.msra.mxu0 %v6426_v63 }
0x1cab   :  { %7331 = vmatprep.subr.mxu0 %v6425_v0 }
0x1cac   :  { %7332 = vmatpush3.msra.mxu0 %v6425_v0 }
0x1cad   :  { %7333 = vmatprep.subr.mxu0 %v6424_v1 }
0x1cae   :  { %7334 = vmatpush3.msra.mxu0 %v6424_v1 }
0x1caf   :  { %7335 = vmatprep.subr.mxu0 %v6423_v2 }
0x1cb0   :  { %7336 = vmatpush3.msra.mxu0 %v6423_v2 }
0x1cb1   :  { %7337 = vmatprep.subr.mxu0 %v6422_v3 }
0x1cb2   :  { %7338 = vmatpush3.msra.mxu0 %v6422_v3 }
0x1cb3   :  { %7340 = vmatmul.mubr.msk.f32.vlgmr.msra.gmra.mxu0 %vm2985_vm4, %v8147_v49  ;;  %7361 = vmatprep.subr.mxu0 %v6453_v4 }
0x1cb4   :  { %7362 = vmatpush3.msra.mxu0 %v6453_v4  ;;  %7377 = vmatprep.mubr.msk.f32.mxu0 %vm2985_vm4, %v8145_v48 }
0x1cb5   :  { %7363 = vmatprep.subr.mxu0 %v6452_v5 }
0x1cb6   :  { %7364 = vmatpush3.msra.mxu0 %v6452_v5 }
0x1cb7   :  { %7365 = vmatprep.subr.mxu0 %v6451_v8 }
0x1cb8   :  { %7366 = vmatpush3.msra.mxu0 %v6451_v8 }
0x1cb9   :  { %7367 = vmatprep.subr.mxu0 %v6450_v9 }
0x1cba   :  { %7368 = vmatpush3.msra.mxu0 %v6450_v9 }
0x1cbb   :  { %7369 = vmatprep.subr.mxu0 %v6449_v10 }
0x1cbc   :  { %7370 = vmatpush3.msra.mxu0 %v6449_v10  ;;  %v6465_v10 = vld [vmem:[%s8718_s11 + $0x38] sm:$0xff] }
0x1cbd   :  { %7371 = vmatprep.subr.mxu0 %v6448_v11 }
0x1cbe   :  { %7372 = vmatpush3.msra.mxu0 %v6448_v11  ;;  %v6464_v11 = vld [vmem:[%s8718_s11 + $0x30] sm:$0xff] }
0x1cbf   :  { %7373 = vmatprep.subr.mxu0 %v6447_v12 }
0x1cc0   :  { %7374 = vmatpush3.msra.mxu0 %v6447_v12 }
0x1cc1   :  { %7375 = vmatprep.subr.mxu0 %v6446_v18 }
0x1cc2   :  { %7376 = vmatpush3.msra.mxu0 %v6446_v18 }
0x1cc3   :  { %7378 = vmatmul.mubr.msk.f32.vlgmr.msra.gmra.mxu0 %vm2985_vm4, %v8147_v49  ;;  %7400 = vmatprep.subr.mxu0 %v6465_v10 }
0x1cc4   :  { %7401 = vmatpush3.msra.mxu0 %v6465_v10 }
0x1cc5   :  { %7402 = vmatprep.subr.mxu0 %v6464_v11 }
0x1cc6   :  { %7403 = vmatpush3.msra.mxu0 %v6464_v11 }
0x1d5f   :  { %v5014_v15 = vpop.f32.mrf.mxu0 }
0x1d60   :  { %7320 = vmatprep.mubr.msk.f32.mxu1 %vm54_vm0, %v5014_v15 }
0x1d61   :  { %v7310_v16 = vpop.f32.mrf.mxu0 }
0x1d63   :  { %v5087_v19 = vpop.f32.mrf.mxu0 }
0x1d64   :  { %7321 = vmatmul.mubr.msk.f32.vlgmr.msra.gmra.mxu1 %vm54_vm0, %v5087_v19 }
0x1d65   :  { %7343 = vmatpush3.msra.mxu1 %v6441_v14  ;;  %v7315_v21 = vpop.f32.mrf.mxu0  ;;  %7358 = vmatprep.mubr.msk.f32.mxu1 %vm2985_vm4, %v8145_v48 }
0x1d66   :  { %7344 = vmatprep.subr.mxu1 %v6440_v20 }
0x1d67   :  { %7345 = vmatpush3.msra.mxu1 %v6440_v20 }
0x1d68   :  { %7346 = vmatprep.subr.mxu1 %v6439_v24 }
0x1d69   :  { %7347 = vmatpush3.msra.mxu1 %v6439_v24 }
0x1d6a   :  { %7348 = vmatprep.subr.mxu1 %v6438_v29 }
0x1d6b   :  { %7349 = vmatpush3.msra.mxu1 %v6438_v29 }
0x1d6c   :  { %7350 = vmatprep.subr.mxu1 %v6437_v31 }
0x1d6d   :  { %7351 = vmatpush3.msra.mxu1 %v6437_v31 }
0x1d6e   :  { %7352 = vmatprep.subr.mxu1 %v6436_v32 }
0x1d6f   :  { %7353 = vmatpush3.msra.mxu1 %v6436_v32  ;;  %v5912_v32 = vld [vmem:[%s8719_s12 + $0x38] sm:$0xff] }
0x1d70   :  { %7354 = vmatprep.subr.mxu1 %v6435_v33 }
0x1d71   :  { %7355 = vmatpush3.msra.mxu1 %v6435_v33  ;;  %v5911_v33 = vld [vmem:[%s8719_s12 + $0x30] sm:$0xff] }
0x1d72   :  { %7356 = vmatprep.subr.mxu1 %v6434_v34 }
0x1d73   :  { %7357 = vmatpush3.msra.mxu1 %v6434_v34  ;;  %v7341_v6 = vpop.f32.mrf.mxu0  ;;  %v5910_v34 = vld [vmem:[%s8719_s12 + $0x28] sm:$0xff] }
0x1d74   :  { %7359 = vmatmul.mubr.msk.f32.vlgmr.msra.gmra.mxu1 %vm2985_vm4, %v8147_v49  ;;  %7380 = vmatprep.subr.mxu1 %v7552_v22 }
0x1d75   :  { %7382 = vmatprep.mubr.msk.f32.mxu1 %vm7553_vm2, %v7552_v22  ;;  %v5260_v7 = vpop.f32.mrf.mxu0 }
0x1d76   :  { %v5261_v43 = vadd.f32 %v6431_v42, %v5260_v7  ;;  %v5908_v7 = vld [vmem:[%s8719_s12 + $0x18] sm:$0xff] }
0x1d83   :  { %v7379_v25 = vpop.f32.mrf.mxu0 }
0x1d84   :  { %v5450_v26 = vadd.f32 %v7379_v25, %v6455_v35  ;;  %v5906_v25 = vld [vmem:[%s8719_s12 + $0x8] sm:$0xff] }
0x1d85   :  { %v5444_v44 = vpop.f32.mrf.mxu0 }
0x1d86   :  { %v5445_v45 = vadd.f32 %v6455_v35, %v5444_v44  ;;  %v5907_v35 = vld [vmem:[%s8719_s12 + $0x10] sm:$0xff] }
0x1e24   :  { %v7322_v28 = vpop.f32.mrf.mxu1 }
0x1e25   :  { %v8570_v30 = vadd.f32 %v7322_v28, %v8442_v23  ;;  %v6007_v28 = vld [vmem:[%s8720_s13 + $0x38] sm:$0xff] }
0x1e26   :  { %v5166_v36 = vpop.f32.mrf.mxu1  ;;  %7426 = vmatprep.subr.mxu0 %v6007_v28 }
0x1e27   :  { %v8573_v37 = vadd.f32 %v5166_v36, %v8444_v27  ;;  %v5266_v27 = vadd.f32 %v7341_v6, %v6431_v42  ;;  %v5909_v6 = vld [vmem:[%s8719_s12 + $0x20] sm:$0xff]  ;;  %v6005_v36 = vld [vmem:[%s8720_s13 + $0x28] sm:$0xff] }
0x1e34   :  { %v7360_v38 = vpop.f32.mrf.mxu1 }
0x1e35   :  { %v5358_v23 = vadd.f32 %v7360_v38, %v6443_v39 }
0x1e36   :  { %v5352_v40 = vpop.f32.mrf.mxu1 }
0x1e37   :  { %v5353_v41 = vadd.f32 %v6443_v39, %v5352_v40 }
0x1e39   :  { %7381 = vmatpush3.xpose.msk.msra.mxu1 %vm54_vm0, %v5353_v41 }
0x1e3a   :  { %7385 = vmatprep.subr.mxu1 %v7552_v22 }
0x1e3c   :  { %7383 = vmatmul.mubr.msk.f32.vlgmr.msra.gmra.mxu1 %vm54_vm0, %v5261_v43 }
0x1e3d   :  { %7386 = vmatpush3.xpose.msk.msra.mxu1 %vm54_vm0, %v5358_v23  ;;  %7387 = vmatprep.mubr.msk.f32.mxu1 %vm7553_vm2, %v7552_v22 }
0x1e3e   :  { %7390 = vmatprep.subr.mxu1 %v7552_v22 }
0x1e40   :  { %7388 = vmatmul.mubr.msk.f32.vlgmr.msra.gmra.mxu1 %vm54_vm0, %v5266_v27 }
0x1e41   :  { %7391 = vmatpush3.msra.mxu1 %v5445_v45  ;;  %7392 = vmatprep.mubr.msk.f32.mxu1 %vm7553_vm2, %v7552_v22 }
0x1e42   :  { %7395 = vmatprep.subr.mxu1 %v7552_v22 }
0x1efc   :  { %v5525_v46 = vpop.f32.mrf.mxu1 }
0x1efd   :  { %v5605_v47 = vmul.f32 0.25, %v5525_v46 }
0x1efe   :  { %v7384_v50 = vpop.f32.mrf.mxu1 }
0x1eff   :  { %v5607_v51 = vsel %vm417_vm3, %v5605_v47, -inf }
0x1f00   :  { %5608 = vmax.xlane.f32.xlu0 %v5607_v51  ;;  %v5601_v52 = vpop.f32.mrf.mxu1 }
0x1f01   :  { %v5606_v53 = vmul.f32 0.25, %v5601_v52 }
0x1f02   :  { %v7389_v54 = vpop.f32.mrf.mxu1 }
0x1f03   :  { %v5610_v55 = vsel %vm417_vm3, %v5606_v53, -inf }
0x1f04   :  { %5611 = vmax.xlane.f32.xlu1 %v5610_v55  ;;  %v6468_v55 = vld [vmem:[%s8710_s3 + $0x8] ss:$0 sm:$0xff] }
0x1f89   :  { %v5609_v56 = vpop.xlane.xlu0 %5608 }
0x1f8a   :  { %v5613_v57 = vsub.f32 %v5605_v47, %v5609_v56 }
0x1f8c   :  { %v5615_v58 = vmul.f32 1.442695, %v5613_v57 }
0x1f8d   :  { %v5612_v59 = vpop.xlane.xlu1 %5611 }
0x1f8e   :  { %7514 = vpow2.f32 %v5615_v58  ;;  %v5614_v60 = vsub.f32 %v5606_v53, %v5612_v59 }
0x1f90   :  { %v5617_v61 = vmul.f32 1.442695, %v5614_v60  ;;  %v6469_v60 = vld [vmem:[%s8710_s3 + $0x9] ss:$0 sm:$0xff] }
0x1f92   :  { %7516 = vpow2.f32 %v5617_v61 }
0x1f9b   :  { %v7515_v62 = vpop.eup %7514 }
0x1f9c   :  { %v5619_v63 = vsel %vm417_vm3, %v7515_v62, 0.0 }
0x1f9d   :  { %5620 = vadd.xlane.f32.xlu0 %v5619_v63 }
0x1f9f   :  { %v7517_v0 = vpop.eup %7516 }
0x1fa0   :  { %v5622_v1 = vsel %vm417_vm3, %v7517_v0, 0.0 }
0x1fa1   :  { %5623 = vadd.xlane.f32.xlu1 %v5622_v1  ;;  %v6002_v1 = vld [vmem:[%s8720_s13 + $0x10] sm:$0xff] }
0x2026   :  { %v5621_v2 = vpop.xlane.xlu0 %5620 }
0x2027   :  { %7518 = vrcp.f32 %v5621_v2  ;;  %v6001_v2 = vld [vmem:[%s8720_s13 + $0x8] sm:$0xff] }
0x202a   :  { %v5624_v3 = vpop.xlane.xlu1 %5623 }
0x202b   :  { %7520 = vrcp.f32 %v5624_v3  ;;  %v6000_v3 = vld [vmem:[%s8720_s13] sm:$0xff] }
0x2034   :  { %v7519_v4 = vpop.eup %7518 }
0x2035   :  { %v5627_v5 = vmul.f32 %v7519_v4, %v7515_v62  ;;  %v6470_v4 = vld [vmem:[%s8710_s3 + $0xa] ss:$0 sm:$0xff] }
0x2037   :  { %7393 = vmatmul.mubr.msk.f32.vlgmr.msra.gmra.mxu1 %vm417_vm3, %v5627_v5 }
0x2038   :  { %v7521_v8 = vpop.eup %7520  ;;  %7396 = vmatpush3.msra.mxu1 %v5450_v26  ;;  %7397 = vmatprep.mubr.msk.f32.mxu1 %vm7553_vm2, %v7552_v22  ;;  %v5905_v26 = vld [vmem:[%s8719_s12] sm:$0xff] }
0x2039   :  { %v5628_v9 = vmul.f32 %v7521_v8, %v7517_v0  ;;  %7407 = vmatprep.subr.mxu1 %v5912_v32  ;;  %v6003_v0 = vld [vmem:[%s8720_s13 + $0x18] sm:$0xff] }
0x203b   :  { %7398 = vmatmul.mubr.msk.f32.vlgmr.msra.gmra.mxu1 %vm417_vm3, %v5628_v9 }
0x203c   :  { %7408 = vmatpush3.msra.mxu1 %v5912_v32 }
0x203d   :  { %7409 = vmatprep.subr.mxu1 %v5911_v33 }
0x203e   :  { %7410 = vmatpush3.msra.mxu1 %v5911_v33 }
0x203f   :  { %7411 = vmatprep.subr.mxu1 %v5910_v34 }
0x2040   :  { %7412 = vmatpush3.msra.mxu1 %v5910_v34 }
0x2041   :  { %7413 = vmatprep.subr.mxu1 %v5909_v6 }
0x2042   :  { %7414 = vmatpush3.msra.mxu1 %v5909_v6 }
0x2043   :  { %7415 = vmatprep.subr.mxu1 %v5908_v7 }
0x2044   :  { %7416 = vmatpush3.msra.mxu1 %v5908_v7 }
0x2045   :  { %7417 = vmatprep.subr.mxu1 %v5907_v35 }
0x2046   :  { %7418 = vmatpush3.msra.mxu1 %v5907_v35 }
0x2047   :  { %7419 = vmatprep.subr.mxu1 %v5906_v25 }
0x2048   :  { %7420 = vmatpush3.msra.mxu1 %v5906_v25 }
0x2049   :  { %7421 = vmatprep.subr.mxu1 %v5905_v26 }
0x204a   :  { %7422 = vmatpush3.msra.mxu1 %v5905_v26 }
0x20f7   :  { %v5698_v12 = vpop.f32.mrf.mxu1 }
0x20f8   :  { %7404 = vmatprep.mubr.msk.f32.mxu0 %vm54_vm0, %v5698_v12 }
0x20f9   :  { %v7394_v18 = vpop.f32.mrf.mxu1 }
0x20fa   :  { %v6473_v18 = vld [vmem:[%s8710_s3 + $0xb] ss:$0 sm:$0xff] }
0x20fb   :  { %v5771_v22 = vpop.f32.mrf.mxu1 }
0x20fc   :  { %7405 = vmatmul.mubr.msk.f32.vlgmr.msra.gmra.mxu0 %vm54_vm0, %v5771_v22 }
0x20fd   :  { %v7399_v17 = vpop.f32.mrf.mxu1  ;;  %7427 = vmatpush3.msra.mxu0 %v6007_v28 }
0x21bc   :  { %v7406_v13 = vpop.f32.mrf.mxu0 }
0x21bd   :  { %v5860_v14 = vadd.f32 %v7406_v13, %v8570_v30  ;;  %v6006_v30 = vld [vmem:[%s8720_s13 + $0x30] sm:$0xff] }
0x21be   :  { %v5850_v15 = vpop.f32.mrf.mxu0  ;;  %7428 = vmatprep.subr.mxu0 %v6006_v30 }
0x21bf   :  { %v8610_v16 = vadd.f32 %v5860_v14, %v8147_v49  ;;  %v5859_v19 = vadd.f32 %v5850_v15, %v8573_v37  ;;  %7429 = vmatpush3.msra.mxu0 %v6006_v30  ;;  %v6004_v37 = vld [vmem:[%s8720_s13 + $0x20] sm:$0xff] }
0x21c0   :  { %7430 = vmatprep.subr.mxu0 %v6005_v36 }
0x21c1   :  { %v8614_v20 = vadd.f32 %v5859_v19, %v8145_v48  ;;  %v5866_v21 = vsel %vm2985_vm4, %v8610_v16, 0.0  ;;  %v5872_v24 = vmul.f32 %v8610_v16, %v8610_v16  ;;  %7431 = vmatpush3.msra.mxu0 %v6005_v36 }
0x21c2   :  { %5867 = vadd.xlane.f32.xlu1 %v5866_v21  ;;  %7432 = vmatprep.subr.mxu0 %v6004_v37 }
0x21c3   :  { %v5863_v29 = vsel %vm2985_vm4, %v8614_v20, 0.0  ;;  %v5871_v31 = vmul.f32 %v8614_v20, %v8614_v20  ;;  %v5876_v49 = vsel %vm2985_vm4, %v5872_v24, 0.0  ;;  %7433 = vmatpush3.msra.mxu0 %v6004_v37 }
0x21c4   :  { %5864 = vadd.xlane.f32.xlu0 %v5863_v29  ;;  %7434 = vmatprep.subr.mxu0 %v6003_v0 }
0x21c5   :  { %v5873_v48 = vsel %vm2985_vm4, %v5871_v31, 0.0  ;;  %7435 = vmatpush3.msra.mxu0 %v6003_v0 }
0x21c6   :  { %5877 = vadd.xlane.f32.xlu1 %v5876_v49  ;;  %7436 = vmatprep.subr.mxu0 %v6002_v1 }
0x21c7   :  { %7437 = vmatpush3.msra.mxu0 %v6002_v1 }
0x21c8   :  { %5874 = vadd.xlane.f32.xlu0 %v5873_v48  ;;  %7438 = vmatprep.subr.mxu0 %v6001_v2 }
0x21c9   :  { %7439 = vmatpush3.msra.mxu0 %v6001_v2 }
0x21ca   :  { %7440 = vmatprep.subr.mxu0 %v6000_v3 }
0x21cb   :  { %7441 = vmatpush3.msra.mxu0 %v6000_v3 }
0x224b   :  { %v5868_v38 = vpop.xlane.xlu1 %5867 }
0x224c   :  { %v5870_v39 = vmul.f32 0.015625, %v5868_v38 }
0x224d   :  { %v5865_v40 = vpop.xlane.xlu0 %5864 }
0x224e   :  { %v5869_v41 = vmul.f32 0.015625, %v5865_v40  ;;  %v5882_v43 = vmul.f32 %v5870_v39, %v5870_v39  ;;  %v5886_v52 = vsub.f32 %v8610_v16, %v5870_v39  ;;  %v6476_v40 = vld [vmem:[%s8710_s3 + $0xc] ss:$0 sm:$0xff] }
0x224f   :  { %v5878_v42 = vpop.xlane.xlu1 %5877 }
0x2250   :  { %v5880_v23 = vmul.f32 0.015625, %v5878_v42  ;;  %v5881_v27 = vmul.f32 %v5869_v41, %v5869_v41  ;;  %v5885_v54 = vsub.f32 %v8614_v20, %v5869_v41 }
0x2251   :  { %v5875_v44 = vpop.xlane.xlu0 %5874 }
0x2252   :  { %v5884_v45 = vsub.f32 %v5880_v23, %v5882_v43  ;;  %v5879_v46 = vmul.f32 0.015625, %v5875_v44  ;;  %v6477_v23 = vld [vmem:[%s8710_s3 + $0xd] ss:$0 sm:$0xff] }
0x2254   :  { %v5888_v47 = vadd.f32 1e-05, %v5884_v45  ;;  %v5883_v50 = vsub.f32 %v5879_v46, %v5881_v27 }
0x2256   :  { %7522 = vrsqrt.f32 %v5888_v47  ;;  %v5887_v51 = vadd.f32 1e-05, %v5883_v50 }
0x2258   :  { %7524 = vrsqrt.f32 %v5887_v51 }
0x2263   :  { %v7523_v53 = vpop.eup %7522 }
0x2264   :  { %v5892_v56 = vmul.f32 %v7523_v53, %v5886_v52 }
0x2265   :  { %v7525_v57 = vpop.eup %7524 }
0x2266   :  { %v5891_v58 = vmul.f32 %v7525_v57, %v5885_v54  ;;  %v5898_v59 = vmul.f32 %v6468_v55, %v5892_v56 }
0x2268   :  { %v5897_v61 = vmul.f32 %v6468_v55, %v5891_v58  ;;  %v5904_v63 = vadd.f32 %v6469_v60, %v5898_v59 }
0x226a   :  { %v5903_v62 = vadd.f32 %v6469_v60, %v5897_v61 }
0x226c   :  { %7423 = vmatprep.mubr.msk.f32.mxu1 %vm2985_vm4, %v5903_v62 }
0x226d   :  { %7424 = vmatmul.mubr.msk.f32.vlgmr.msra.gmra.mxu1 %vm2985_vm4, %v5904_v63 }
0x232d   :  { %v7425_v5 = vpop.f32.mrf.mxu1 }
0x232e   :  { %v5995_v8 = vadd.f32 %v7425_v5, %v6470_v4 }
0x232f   :  { %v5989_v9 = vpop.f32.mrf.mxu1 }
0x2330   :  { %v5990_v10 = vadd.f32 %v6470_v4, %v5989_v9  ;;  %v5999_v12 = vmax.f32 %v5995_v8, 0.0 }
0x2332   :  { %v5998_v11 = vmax.f32 %v5990_v10, 0.0 }
0x2334   :  { %7442 = vmatprep.mubr.msk.f32.mxu0 %vm2985_vm4, %v5998_v11 }
0x2335   :  { %7443 = vmatmul.mubr.msk.f32.vlgmr.msra.gmra.mxu0 %vm2985_vm4, %v5999_v12 }
0x23f5   :  { %v7444_v22 = vpop.f32.mrf.mxu0 }
0x23f6   :  { %v6090_v17 = vadd.f32 %v7444_v22, %v6473_v18 }
0x23f7   :  { %v6084_v13 = vpop.f32.mrf.mxu0 }
0x23f8   :  { %v6094_v14 = vadd.f32 %v6090_v17, %v5904_v63  ;;  %v6085_v15 = vadd.f32 %v6473_v18, %v6084_v13 }
0x23fa   :  { %v6093_v16 = vadd.f32 %v6085_v15, %v5903_v62  ;;  %v6098_v19 = vsel %vm2985_vm4, %v6094_v14, 0.0  ;;  %v6104_v20 = vmul.f32 %v6094_v14, %v6094_v14 }
0x23fb   :  { %6099 = vadd.xlane.f32.xlu1 %v6098_v19 }
0x23fc   :  { %v6095_v21 = vsel %vm2985_vm4, %v6093_v16, 0.0  ;;  %v6103_v24 = vmul.f32 %v6093_v16, %v6093_v16  ;;  %v6108_v29 = vsel %vm2985_vm4, %v6104_v20, 0.0 }
0x23fd   :  { %6096 = vadd.xlane.f32.xlu0 %v6095_v21 }
0x23fe   :  { %v6105_v31 = vsel %vm2985_vm4, %v6103_v24, 0.0 }
0x23ff   :  { %6109 = vadd.xlane.f32.xlu1 %v6108_v29 }
0x2401   :  { %6106 = vadd.xlane.f32.xlu0 %v6105_v31 }
0x2484   :  { %v6100_v49 = vpop.xlane.xlu1 %6099 }
0x2485   :  { %v6102_v48 = vmul.f32 0.015625, %v6100_v49 }
0x2486   :  { %v6097_v32 = vpop.xlane.xlu0 %6096 }
0x2487   :  { %v6101_v33 = vmul.f32 0.015625, %v6097_v32  ;;  %v6114_v6 = vmul.f32 %v6102_v48, %v6102_v48  ;;  %v6118_v38 = vsub.f32 %v6094_v14, %v6102_v48 }
0x2488   :  { %v6110_v34 = vpop.xlane.xlu1 %6109 }
0x2489   :  { %v6112_v7 = vmul.f32 0.015625, %v6110_v34  ;;  %v6113_v25 = vmul.f32 %v6101_v33, %v6101_v33  ;;  %v6117_v41 = vsub.f32 %v6093_v16, %v6101_v33 }
0x248a   :  { %v6107_v35 = vpop.xlane.xlu0 %6106 }
0x248b   :  { %v6116_v26 = vsub.f32 %v6112_v7, %v6114_v6  ;;  %v6111_v28 = vmul.f32 0.015625, %v6107_v35 }
0x248d   :  { %v6120_v30 = vadd.f32 1e-05, %v6116_v26  ;;  %v6115_v36 = vsub.f32 %v6111_v28, %v6113_v25 }
0x248f   :  { %7526 = vrsqrt.f32 %v6120_v30  ;;  %v6119_v37 = vadd.f32 1e-05, %v6115_v36 }
0x2491   :  { %7528 = vrsqrt.f32 %v6119_v37 }
0x249c   :  { %v7527_v39 = vpop.eup %7526 }
0x249d   :  { %v6124_v42 = vmul.f32 %v7527_v39, %v6118_v38 }
0x249e   :  { %v7529_v43 = vpop.eup %7528 }
0x249f   :  { %v6123_v44 = vmul.f32 %v7529_v43, %v6117_v41  ;;  %v6130_v27 = vmul.f32 %v6476_v40, %v6124_v42 }
0x24a1   :  { %v6129_v45 = vmul.f32 %v6476_v40, %v6123_v44  ;;  %v6136_v46 = vadd.f32 %v6477_v23, %v6130_v27 }
0x24a3   :  { %v6135_v47 = vadd.f32 %v6477_v23, %v6129_v45  ;;  %6138 = vst.msk [vmem:[#allocation2 + $0x8] sm:$0xff] %vm2985_vm4, %v6136_v46 }
0x24a5   :  { %6137 = vst.msk [vmem:[#allocation2] sm:$0xff] %vm2985_vm4, %v6135_v47 }
0x24a6   :  { %7541 = shalt.err (!%p7538_p4)
}
0x24a7   :  { %s7555_s3 = smov 128   ;;  %s7556_s5 = smov 8  }
0x24a8   :  { %6150 = dma.vmem_to_hbm [thread:$0]  %s6145_s18, 256, %s8721_s14, [#allocation3], %s7555_s3, %s7555_s3, %s7556_s5  }
0x24a9   :  { %7550 = dma.done.wait [#allocation3], 256  }
0x24aa   :  { %7551 = vsyncadd [#allocation3], 4294967040 }
0x24ab   :  { %6154 = vsyncpa [#allocation3], 1 }

</bundles_post_ra>
